<compile_context>
chip_gen: v6e
topology: v6e:2x2x1
jax: 0.10.0
libtpu: 0.0.40
codegen_flags: <defaults>
</compile_context>

<pallas_src>
import functools

import jax
import jax.numpy as jnp
from jax import lax
from jax.experimental import pallas as pl
from jax.experimental.pallas import tpu as pltpu


def _pchnet_v2_kernel(x_ref, w_ref, w2_ref, o_ref, *, steps, eta, mu,
                      n_streams, compute_dtype):
    """Runs all `steps` Hopfield/PC updates on the resident VMEM tiles.

    The batch tile is split into `n_streams` independent sub-tiles updated
    inside the same (unrolled) loop iteration, so one stream's MXU matmuls
    overlap another stream's tanh (EUP) / subtract+update (VPU). The weights
    are read from VMEM inside the dots (not hoisted to values), keeping vreg
    pressure low.
    """
    sub = x_ref.shape[0] // n_streams
    unit_update = (eta == 1.0 and mu == 1.0)

    def step_one(x):
        # pred = tanh(x @ W_sym)   (compute_dtype operands, f32 MXU accumulation)
        pred = jnp.tanh(
            jnp.dot(x.astype(compute_dtype), w_ref[...],
                    preferred_element_type=jnp.float32))
        e = x - pred                       # f32 elementwise
        # update = e @ W2
        update = jnp.dot(e.astype(compute_dtype), w2_ref[...],
                         preferred_element_type=jnp.float32)
        # x = eta * x - mu * update   (actv_fn is None -> no extra activation)
        if unit_update:
            return x - update
        return eta * x - mu * update

    def body(_, xs):
        return tuple(step_one(x) for x in xs)

    xs0 = tuple(
        x_ref[i * sub:(i + 1) * sub, :].astype(jnp.float32)
        for i in range(n_streams))
    xs = lax.fori_loop(0, steps, body, xs0, unroll=True)
    for i in range(n_streams):
        o_ref[i * sub:(i + 1) * sub, :] = xs[i].astype(o_ref.dtype)


def _pick_batch_tile(B, requested, row_align):
    """Largest `row_align`-multiple divisor of B that is <= requested.

    Additionally clamps to B // 2 (when the batch allows) so the grid always
    has >= 2 programs -> both v7x TensorCores get work under "parallel"
    dimension semantics.
    """
    target = min(requested, B)
    if B >= 2 * row_align:
        target = min(target, B // 2)
    bt = target - (target % row_align)
    while bt >= row_align and B % bt:
        bt -= row_align
    if bt < row_align:
        bt = B   # tiny / ragged batch: a single full-batch block is always legal
    return bt


def _pick_streams(batch_tile, row_align, max_streams=4):
    """Cap per-stream rows at ~64 f32 rows; keep sub-tiles `row_align`-aligned."""
    n = max(1, batch_tile // 64)
    n = min(n, max_streams)
    while n > 1 and (batch_tile % (n * row_align)):
        n -= 1
    return n


def _vmem_limit_bytes(batch_tile, size, x_itemsize, w_itemsize):
    """Actual footprint + headroom, clamped to 90% of this chip's VMEM."""
    try:
        cap = int(pltpu.get_tpu_info().vmem_capacity_bytes)
    except Exception:
        cap = 64 * 1024 * 1024          # conservative (v7x per-TC) fallback
    w_bytes = 2 * size * size * w_itemsize          # single resident copy each
    io_bytes = 2 * 2 * batch_tile * size * x_itemsize   # double-buffered x/out
    tmp_bytes = 8 * batch_tile * size * 4           # f32 temporaries headroom
    need = int((w_bytes + io_bytes + tmp_bytes) * 1.25)
    need = max(need, 32 * 1024 * 1024)              # never below chip default
    return min(need, int(cap * 0.9))                # leave compiler scratch room


def prepare_pchnet_v2_weights(weight, weight2, *, use_bf16=True):
    """Symmetrize exactly as PCHNetV2.weight_sym_upper and cast for the MXU.

    Factored out so repeated forward calls can cache the result (pass
    prepared=True to pchnet_v2_forward) instead of re-running the triu +
    transpose + cast and its size^2 HBM round trip on every call.
    """
    compute_dtype = jnp.bfloat16 if use_bf16 else jnp.float32
    w_upper = jnp.triu(weight, k=1)
    w_sym = (w_upper + w_upper.T).astype(compute_dtype)
    w2 = weight2.astype(compute_dtype)
    return w_sym, w2


def pchnet_v2_forward(x, weight, weight2, *, steps=10, eta=1.0, mu=1.0,
                      batch_tile=128, use_bf16=True, prepared=False):
    """Pallas wrapper. x: (B, size), weight/weight2: (size, size)."""
    B, size = x.shape
    # Static-float guard for the unit-update fast path (and for partial capture).
    eta = float(eta)
    mu = float(mu)

    compute_dtype = jnp.bfloat16 if use_bf16 else jnp.float32
    row_align = 16 if use_bf16 else 8   # bf16 packs 16 rows / vreg sublane-wise

    batch_tile = _pick_batch_tile(B, batch_tile, row_align)
    n_streams = _pick_streams(batch_tile, row_align)

    if prepared:
        w_sym, w2 = weight.astype(compute_dtype), weight2.astype(compute_dtype)
    else:
        w_sym, w2 = prepare_pchnet_v2_weights(weight, weight2, use_bf16=use_bf16)

    kernel = functools.partial(
        _pchnet_v2_kernel, steps=steps, eta=eta, mu=mu,
        n_streams=n_streams, compute_dtype=compute_dtype)

    grid = (B // batch_tile,)

    # Advisory cost estimate (2 matmuls of (B,size)x(size,size) per step).
    flops = int(steps * 2 * (2 * B * size * size))
    transcendentals = int(steps * B * size)
    bytes_accessed = int(2 * B * size * jnp.dtype(x.dtype).itemsize
                         + 2 * size * size * jnp.dtype(compute_dtype).itemsize)
    cost = pl.CostEstimate(flops=flops, transcendentals=transcendentals,
                           bytes_accessed=bytes_accessed)

    vmem_limit = _vmem_limit_bytes(batch_tile, size,
                                   jnp.dtype(x.dtype).itemsize,
                                   jnp.dtype(compute_dtype).itemsize)

    # TODO(synk): when 2*size^2*weight_bytes exceeds ~40% of this chip's VMEM
    # (e.g. size>=4096 bf16 on v7x), switch the weights from whole-array VMEM
    # residents to a K-tiled pipelined BlockSpec; not needed at these sizes.
    return pl.pallas_call(
        kernel,
        out_shape=jax.ShapeDtypeStruct((B, size), x.dtype),
        grid_spec=pltpu.PrefetchScalarGridSpec(
            num_scalar_prefetch=0,
            grid=grid,
            in_specs=[
                # x tile: pipelined over the batch grid axis.
                pl.BlockSpec((batch_tile, size), lambda b: (b, 0)),
                # Weights: whole-array VMEM residents (single copy, DMA'd once,
                # no per-step double-buffering).
                pl.BlockSpec(memory_space=pltpu.MemorySpace.VMEM),   # W_sym
                pl.BlockSpec(memory_space=pltpu.MemorySpace.VMEM),   # W2
            ],
            out_specs=pl.BlockSpec((batch_tile, size), lambda b: (b, 0)),
        ),
        compiler_params=pltpu.CompilerParams(
            dimension_semantics=("parallel",),
            vmem_limit_bytes=vmem_limit,
        ),
        cost_estimate=cost,
    )(x, w_sym, w2)


def pchnet_v2_reference(x, weight, weight2, *, steps=10, eta=1.0, mu=1.0,
                        compute_dtype=jnp.float32):
    """Pure-JAX reference mirroring the PyTorch forward().

    With compute_dtype=float32 this is the exact module semantics; with
    bfloat16 it mirrors the kernel's mixed-precision dots (f32 accumulation).
    """
    w_upper = jnp.triu(weight, k=1)
    w_sym = (w_upper + w_upper.T).astype(compute_dtype)
    w2 = weight2.astype(compute_dtype)
    x = x.astype(jnp.float32)
    for _ in range(steps):
        pred = jnp.tanh(jnp.dot(x.astype(compute_dtype), w_sym,
                                preferred_element_type=jnp.float32))
        e = x - pred
        update = jnp.dot(e.astype(compute_dtype), w2,
                         preferred_element_type=jnp.float32)
        x = eta * x - mu * update
    return x


def xavier_uniform(key, shape, dtype=jnp.float32):
    fan_in, fan_out = shape
    a = (6.0 / (fan_in + fan_out)) ** 0.5
    return jax.random.uniform(key, shape, dtype=dtype, minval=-a, maxval=a)


if __name__ == "__main__":
    size = 128      # network size (lane-aligned)
    batch = 256     # batch size; batch_tile clamps to 128 -> grid=(2,) for v7x
    steps = 10

    key = jax.random.PRNGKey(0)
    k_x, k_w, k_w2 = jax.random.split(key, 3)

    x = jax.random.normal(k_x, (batch, size), dtype=jnp.float32)
    weight = xavier_uniform(k_w, (size, size))
    weight2 = xavier_uniform(k_w2, (size, size))

    # Optimized bf16-MXU path (>= 2 grid programs -> both v7x TensorCores).
    out = pchnet_v2_forward(x, weight, weight2, steps=steps, use_bf16=True)
    out = jax.block_until_ready(out)
    assert out.shape == (batch, size)
    assert bool(jnp.all(jnp.isfinite(out)))
    ref_bf16 = pchnet_v2_reference(x, weight, weight2, steps=steps,
                                   compute_dtype=jnp.bfloat16)
    assert jnp.allclose(out, ref_bf16, atol=1e-2, rtol=1e-2), \
        "mismatch vs mixed-precision reference"

    # Full-f32 path: matches the exact PyTorch forward semantics.
    out_f32 = pchnet_v2_forward(x, weight, weight2, steps=steps, use_bf16=False)
    out_f32 = jax.block_until_ready(out_f32)
    ref_f32 = pchnet_v2_reference(x, weight, weight2, steps=steps,
                                  compute_dtype=jnp.float32)
    assert jnp.allclose(out_f32, ref_f32, atol=1e-3, rtol=1e-3), \
        "mismatch vs f32 reference"

    # Cached-weight path (prepared=True) must be identical to the bf16 path.
    w_sym_c, w2_c = prepare_pchnet_v2_weights(weight, weight2, use_bf16=True)
    out_cached = pchnet_v2_forward(x, w_sym_c, w2_c, steps=steps,
                                   use_bf16=True, prepared=True)
    out_cached = jax.block_until_ready(out_cached)
    assert jnp.allclose(out, out_cached), "prepared-weights path mismatch"

    # TODO(synk): optional bias / bias2, actv_fn(x, step_i) and energy_fn are
    # disabled in the module defaults and are not implemented in-kernel.
    print("KERNEL_OK")
</pallas_src>

<mosaic_0001>
module attributes {stable_mosaic.version = 11 : i64} {
  func.func @_pchnet_v2_kernel(%arg0: i32, %arg1: memref<128x128xf32, #tpu.memory_space<vmem>>, %arg2: memref<128x128xbf16, #tpu.memory_space<vmem>>, %arg3: memref<128x128xbf16, #tpu.memory_space<vmem>>, %arg4: memref<128x128xf32, #tpu.memory_space<vmem>>) attributes {dimension_semantics = [#tpu.dimension_semantics<parallel>], iteration_bounds = array<i64: 2>, scalar_prefetch = 0 : i64, scratch_operands = 0 : i64, tpu.core_type = #tpu.core_type<tc>, window_params = [{transform_indices = @transform_0, window_bounds = array<i64: 128, 128>}, {pipeline_mode = #tpu.pipeline_mode<synchronous>, transform_indices = @transform_1, window_bounds = array<i64: 128, 128>}, {pipeline_mode = #tpu.pipeline_mode<synchronous>, transform_indices = @transform_2, window_bounds = array<i64: 128, 128>}, {transform_indices = @transform_3, window_bounds = array<i64: 128, 128>}]} {
    %c0 = arith.constant 0 : index
    %c0_0 = arith.constant 0 : index
    %0 = vector.load %arg1[%c0, %c0_0] : memref<128x128xf32, #tpu.memory_space<vmem>>, vector<64x128xf32>
    %c64 = arith.constant 64 : index
    %c0_1 = arith.constant 0 : index
    %1 = vector.load %arg1[%c64, %c0_1] : memref<128x128xf32, #tpu.memory_space<vmem>>, vector<64x128xf32>
    %c0_i32 = arith.constant 0 : i32
    %2 = arith.truncf %0 : vector<64x128xf32> to vector<64x128xbf16>
    %c0_2 = arith.constant 0 : index
    %c0_3 = arith.constant 0 : index
    %3 = vector.load %arg2[%c0_2, %c0_3] : memref<128x128xbf16, #tpu.memory_space<vmem>>, vector<128x128xbf16>
    %cst = arith.constant dense<0.000000e+00> : vector<64x128xf32>
    %4 = tpu.matmul %2, %3, %cst {dimension_numbers = #tpu.dot_dimension_numbers<[1], [0], [0], [1], [0, 0, 1, 1], [], []>} : vector<64x128xbf16>, vector<128x128xbf16>, vector<64x128xf32> -> vector<64x128xf32>
    %5 = math.tanh %4 : vector<64x128xf32>
    %6 = arith.subf %0, %5 : vector<64x128xf32>
    %7 = arith.truncf %6 : vector<64x128xf32> to vector<64x128xbf16>
    %c0_4 = arith.constant 0 : index
    %c0_5 = arith.constant 0 : index
    %8 = vector.load %arg3[%c0_4, %c0_5] : memref<128x128xbf16, #tpu.memory_space<vmem>>, vector<128x128xbf16>
    %cst_6 = arith.constant dense<0.000000e+00> : vector<64x128xf32>
    %9 = tpu.matmul %7, %8, %cst_6 {dimension_numbers = #tpu.dot_dimension_numbers<[1], [0], [0], [1], [0, 0, 1, 1], [], []>} : vector<64x128xbf16>, vector<128x128xbf16>, vector<64x128xf32> -> vector<64x128xf32>
    %10 = arith.subf %0, %9 : vector<64x128xf32>
    %11 = arith.truncf %1 : vector<64x128xf32> to vector<64x128xbf16>
    %c0_7 = arith.constant 0 : index
    %c0_8 = arith.constant 0 : index
    %12 = vector.load %arg2[%c0_7, %c0_8] : memref<128x128xbf16, #tpu.memory_space<vmem>>, vector<128x128xbf16>
    %cst_9 = arith.constant dense<0.000000e+00> : vector<64x128xf32>
    %13 = tpu.matmul %11, %12, %cst_9 {dimension_numbers = #tpu.dot_dimension_numbers<[1], [0], [0], [1], [0, 0, 1, 1], [], []>} : vector<64x128xbf16>, vector<128x128xbf16>, vector<64x128xf32> -> vector<64x128xf32>
    %14 = math.tanh %13 : vector<64x128xf32>
    %15 = arith.subf %1, %14 : vector<64x128xf32>
    %16 = arith.truncf %15 : vector<64x128xf32> to vector<64x128xbf16>
    %c0_10 = arith.constant 0 : index
    %c0_11 = arith.constant 0 : index
    %17 = vector.load %arg3[%c0_10, %c0_11] : memref<128x128xbf16, #tpu.memory_space<vmem>>, vector<128x128xbf16>
    %cst_12 = arith.constant dense<0.000000e+00> : vector<64x128xf32>
    %18 = tpu.matmul %16, %17, %cst_12 {dimension_numbers = #tpu.dot_dimension_numbers<[1], [0], [0], [1], [0, 0, 1, 1], [], []>} : vector<64x128xbf16>, vector<128x128xbf16>, vector<64x128xf32> -> vector<64x128xf32>
    %19 = arith.subf %1, %18 : vector<64x128xf32>
    %c1_i32 = arith.constant 1 : i32
    %20 = arith.truncf %10 : vector<64x128xf32> to vector<64x128xbf16>
    %c0_13 = arith.constant 0 : index
    %c0_14 = arith.constant 0 : index
    %21 = vector.load %arg2[%c0_13, %c0_14] : memref<128x128xbf16, #tpu.memory_space<vmem>>, vector<128x128xbf16>
    %cst_15 = arith.constant dense<0.000000e+00> : vector<64x128xf32>
    %22 = tpu.matmul %20, %21, %cst_15 {dimension_numbers = #tpu.dot_dimension_numbers<[1], [0], [0], [1], [0, 0, 1, 1], [], []>} : vector<64x128xbf16>, vector<128x128xbf16>, vector<64x128xf32> -> vector<64x128xf32>
    %23 = math.tanh %22 : vector<64x128xf32>
    %24 = arith.subf %10, %23 : vector<64x128xf32>
    %25 = arith.truncf %24 : vector<64x128xf32> to vector<64x128xbf16>
    %c0_16 = arith.constant 0 : index
    %c0_17 = arith.constant 0 : index
    %26 = vector.load %arg3[%c0_16, %c0_17] : memref<128x128xbf16, #tpu.memory_space<vmem>>, vector<128x128xbf16>
    %cst_18 = arith.constant dense<0.000000e+00> : vector<64x128xf32>
    %27 = tpu.matmul %25, %26, %cst_18 {dimension_numbers = #tpu.dot_dimension_numbers<[1], [0], [0], [1], [0, 0, 1, 1], [], []>} : vector<64x128xbf16>, vector<128x128xbf16>, vector<64x128xf32> -> vector<64x128xf32>
    %28 = arith.subf %10, %27 : vector<64x128xf32>
    %29 = arith.truncf %19 : vector<64x128xf32> to vector<64x128xbf16>
    %c0_19 = arith.constant 0 : index
    %c0_20 = arith.constant 0 : index
    %30 = vector.load %arg2[%c0_19, %c0_20] : memref<128x128xbf16, #tpu.memory_space<vmem>>, vector<128x128xbf16>
    %cst_21 = arith.constant dense<0.000000e+00> : vector<64x128xf32>
    %31 = tpu.matmul %29, %30, %cst_21 {dimension_numbers = #tpu.dot_dimension_numbers<[1], [0], [0], [1], [0, 0, 1, 1], [], []>} : vector<64x128xbf16>, vector<128x128xbf16>, vector<64x128xf32> -> vector<64x128xf32>
    %32 = math.tanh %31 : vector<64x128xf32>
    %33 = arith.subf %19, %32 : vector<64x128xf32>
    %34 = arith.truncf %33 : vector<64x128xf32> to vector<64x128xbf16>
    %c0_22 = arith.constant 0 : index
    %c0_23 = arith.constant 0 : index
    %35 = vector.load %arg3[%c0_22, %c0_23] : memref<128x128xbf16, #tpu.memory_space<vmem>>, vector<128x128xbf16>
    %cst_24 = arith.constant dense<0.000000e+00> : vector<64x128xf32>
    %36 = tpu.matmul %34, %35, %cst_24 {dimension_numbers = #tpu.dot_dimension_numbers<[1], [0], [0], [1], [0, 0, 1, 1], [], []>} : vector<64x128xbf16>, vector<128x128xbf16>, vector<64x128xf32> -> vector<64x128xf32>
    %37 = arith.subf %19, %36 : vector<64x128xf32>
    %c2_i32 = arith.constant 2 : i32
    %38 = arith.truncf %28 : vector<64x128xf32> to vector<64x128xbf16>
    %c0_25 = arith.constant 0 : index
    %c0_26 = arith.constant 0 : index
    %39 = vector.load %arg2[%c0_25, %c0_26] : memref<128x128xbf16, #tpu.memory_space<vmem>>, vector<128x128xbf16>
    %cst_27 = arith.constant dense<0.000000e+00> : vector<64x128xf32>
    %40 = tpu.matmul %38, %39, %cst_27 {dimension_numbers = #tpu.dot_dimension_numbers<[1], [0], [0], [1], [0, 0, 1, 1], [], []>} : vector<64x128xbf16>, vector<128x128xbf16>, vector<64x128xf32> -> vector<64x128xf32>
    %41 = math.tanh %40 : vector<64x128xf32>
    %42 = arith.subf %28, %41 : vector<64x128xf32>
    %43 = arith.truncf %42 : vector<64x128xf32> to vector<64x128xbf16>
    %c0_28 = arith.constant 0 : index
    %c0_29 = arith.constant 0 : index
    %44 = vector.load %arg3[%c0_28, %c0_29] : memref<128x128xbf16, #tpu.memory_space<vmem>>, vector<128x128xbf16>
    %cst_30 = arith.constant dense<0.000000e+00> : vector<64x128xf32>
    %45 = tpu.matmul %43, %44, %cst_30 {dimension_numbers = #tpu.dot_dimension_numbers<[1], [0], [0], [1], [0, 0, 1, 1], [], []>} : vector<64x128xbf16>, vector<128x128xbf16>, vector<64x128xf32> -> vector<64x128xf32>
    %46 = arith.subf %28, %45 : vector<64x128xf32>
    %47 = arith.truncf %37 : vector<64x128xf32> to vector<64x128xbf16>
    %c0_31 = arith.constant 0 : index
    %c0_32 = arith.constant 0 : index
    %48 = vector.load %arg2[%c0_31, %c0_32] : memref<128x128xbf16, #tpu.memory_space<vmem>>, vector<128x128xbf16>
    %cst_33 = arith.constant dense<0.000000e+00> : vector<64x128xf32>
    %49 = tpu.matmul %47, %48, %cst_33 {dimension_numbers = #tpu.dot_dimension_numbers<[1], [0], [0], [1], [0, 0, 1, 1], [], []>} : vector<64x128xbf16>, vector<128x128xbf16>, vector<64x128xf32> -> vector<64x128xf32>
    %50 = math.tanh %49 : vector<64x128xf32>
    %51 = arith.subf %37, %50 : vector<64x128xf32>
    %52 = arith.truncf %51 : vector<64x128xf32> to vector<64x128xbf16>
    %c0_34 = arith.constant 0 : index
    %c0_35 = arith.constant 0 : index
    %53 = vector.load %arg3[%c0_34, %c0_35] : memref<128x128xbf16, #tpu.memory_space<vmem>>, vector<128x128xbf16>
    %cst_36 = arith.constant dense<0.000000e+00> : vector<64x128xf32>
    %54 = tpu.matmul %52, %53, %cst_36 {dimension_numbers = #tpu.dot_dimension_numbers<[1], [0], [0], [1], [0, 0, 1, 1], [], []>} : vector<64x128xbf16>, vector<128x128xbf16>, vector<64x128xf32> -> vector<64x128xf32>
    %55 = arith.subf %37, %54 : vector<64x128xf32>
    %c3_i32 = arith.constant 3 : i32
    %56 = arith.truncf %46 : vector<64x128xf32> to vector<64x128xbf16>
    %c0_37 = arith.constant 0 : index
    %c0_38 = arith.constant 0 : index
    %57 = vector.load %arg2[%c0_37, %c0_38] : memref<128x128xbf16, #tpu.memory_space<vmem>>, vector<128x128xbf16>
    %cst_39 = arith.constant dense<0.000000e+00> : vector<64x128xf32>
    %58 = tpu.matmul %56, %57, %cst_39 {dimension_numbers = #tpu.dot_dimension_numbers<[1], [0], [0], [1], [0, 0, 1, 1], [], []>} : vector<64x128xbf16>, vector<128x128xbf16>, vector<64x128xf32> -> vector<64x128xf32>
    %59 = math.tanh %58 : vector<64x128xf32>
    %60 = arith.subf %46, %59 : vector<64x128xf32>
    %61 = arith.truncf %60 : vector<64x128xf32> to vector<64x128xbf16>
    %c0_40 = arith.constant 0 : index
    %c0_41 = arith.constant 0 : index
    %62 = vector.load %arg3[%c0_40, %c0_41] : memref<128x128xbf16, #tpu.memory_space<vmem>>, vector<128x128xbf16>
    %cst_42 = arith.constant dense<0.000000e+00> : vector<64x128xf32>
    %63 = tpu.matmul %61, %62, %cst_42 {dimension_numbers = #tpu.dot_dimension_numbers<[1], [0], [0], [1], [0, 0, 1, 1], [], []>} : vector<64x128xbf16>, vector<128x128xbf16>, vector<64x128xf32> -> vector<64x128xf32>
    %64 = arith.subf %46, %63 : vector<64x128xf32>
    %65 = arith.truncf %55 : vector<64x128xf32> to vector<64x128xbf16>
    %c0_43 = arith.constant 0 : index
    %c0_44 = arith.constant 0 : index
    %66 = vector.load %arg2[%c0_43, %c0_44] : memref<128x128xbf16, #tpu.memory_space<vmem>>, vector<128x128xbf16>
    %cst_45 = arith.constant dense<0.000000e+00> : vector<64x128xf32>
    %67 = tpu.matmul %65, %66, %cst_45 {dimension_numbers = #tpu.dot_dimension_numbers<[1], [0], [0], [1], [0, 0, 1, 1], [], []>} : vector<64x128xbf16>, vector<128x128xbf16>, vector<64x128xf32> -> vector<64x128xf32>
    %68 = math.tanh %67 : vector<64x128xf32>
    %69 = arith.subf %55, %68 : vector<64x128xf32>
    %70 = arith.truncf %69 : vector<64x128xf32> to vector<64x128xbf16>
    %c0_46 = arith.constant 0 : index
    %c0_47 = arith.constant 0 : index
    %71 = vector.load %arg3[%c0_46, %c0_47] : memref<128x128xbf16, #tpu.memory_space<vmem>>, vector<128x128xbf16>
    %cst_48 = arith.constant dense<0.000000e+00> : vector<64x128xf32>
    %72 = tpu.matmul %70, %71, %cst_48 {dimension_numbers = #tpu.dot_dimension_numbers<[1], [0], [0], [1], [0, 0, 1, 1], [], []>} : vector<64x128xbf16>, vector<128x128xbf16>, vector<64x128xf32> -> vector<64x128xf32>
    %73 = arith.subf %55, %72 : vector<64x128xf32>
    %c4_i32 = arith.constant 4 : i32
    %74 = arith.truncf %64 : vector<64x128xf32> to vector<64x128xbf16>
    %c0_49 = arith.constant 0 : index
    %c0_50 = arith.constant 0 : index
    %75 = vector.load %arg2[%c0_49, %c0_50] : memref<128x128xbf16, #tpu.memory_space<vmem>>, vector<128x128xbf16>
    %cst_51 = arith.constant dense<0.000000e+00> : vector<64x128xf32>
    %76 = tpu.matmul %74, %75, %cst_51 {dimension_numbers = #tpu.dot_dimension_numbers<[1], [0], [0], [1], [0, 0, 1, 1], [], []>} : vector<64x128xbf16>, vector<128x128xbf16>, vector<64x128xf32> -> vector<64x128xf32>
    %77 = math.tanh %76 : vector<64x128xf32>
    %78 = arith.subf %64, %77 : vector<64x128xf32>
    %79 = arith.truncf %78 : vector<64x128xf32> to vector<64x128xbf16>
    %c0_52 = arith.constant 0 : index
    %c0_53 = arith.constant 0 : index
    %80 = vector.load %arg3[%c0_52, %c0_53] : memref<128x128xbf16, #tpu.memory_space<vmem>>, vector<128x128xbf16>
    %cst_54 = arith.constant dense<0.000000e+00> : vector<64x128xf32>
    %81 = tpu.matmul %79, %80, %cst_54 {dimension_numbers = #tpu.dot_dimension_numbers<[1], [0], [0], [1], [0, 0, 1, 1], [], []>} : vector<64x128xbf16>, vector<128x128xbf16>, vector<64x128xf32> -> vector<64x128xf32>
    %82 = arith.subf %64, %81 : vector<64x128xf32>
    %83 = arith.truncf %73 : vector<64x128xf32> to vector<64x128xbf16>
    %c0_55 = arith.constant 0 : index
    %c0_56 = arith.constant 0 : index
    %84 = vector.load %arg2[%c0_55, %c0_56] : memref<128x128xbf16, #tpu.memory_space<vmem>>, vector<128x128xbf16>
    %cst_57 = arith.constant dense<0.000000e+00> : vector<64x128xf32>
    %85 = tpu.matmul %83, %84, %cst_57 {dimension_numbers = #tpu.dot_dimension_numbers<[1], [0], [0], [1], [0, 0, 1, 1], [], []>} : vector<64x128xbf16>, vector<128x128xbf16>, vector<64x128xf32> -> vector<64x128xf32>
    %86 = math.tanh %85 : vector<64x128xf32>
    %87 = arith.subf %73, %86 : vector<64x128xf32>
    %88 = arith.truncf %87 : vector<64x128xf32> to vector<64x128xbf16>
    %c0_58 = arith.constant 0 : index
    %c0_59 = arith.constant 0 : index
    %89 = vector.load %arg3[%c0_58, %c0_59] : memref<128x128xbf16, #tpu.memory_space<vmem>>, vector<128x128xbf16>
    %cst_60 = arith.constant dense<0.000000e+00> : vector<64x128xf32>
    %90 = tpu.matmul %88, %89, %cst_60 {dimension_numbers = #tpu.dot_dimension_numbers<[1], [0], [0], [1], [0, 0, 1, 1], [], []>} : vector<64x128xbf16>, vector<128x128xbf16>, vector<64x128xf32> -> vector<64x128xf32>
    %91 = arith.subf %73, %90 : vector<64x128xf32>
    %c5_i32 = arith.constant 5 : i32
    %92 = arith.truncf %82 : vector<64x128xf32> to vector<64x128xbf16>
    %c0_61 = arith.constant 0 : index
    %c0_62 = arith.constant 0 : index
    %93 = vector.load %arg2[%c0_61, %c0_62] : memref<128x128xbf16, #tpu.memory_space<vmem>>, vector<128x128xbf16>
    %cst_63 = arith.constant dense<0.000000e+00> : vector<64x128xf32>
    %94 = tpu.matmul %92, %93, %cst_63 {dimension_numbers = #tpu.dot_dimension_numbers<[1], [0], [0], [1], [0, 0, 1, 1], [], []>} : vector<64x128xbf16>, vector<128x128xbf16>, vector<64x128xf32> -> vector<64x128xf32>
    %95 = math.tanh %94 : vector<64x128xf32>
    %96 = arith.subf %82, %95 : vector<64x128xf32>
    %97 = arith.truncf %96 : vector<64x128xf32> to vector<64x128xbf16>
    %c0_64 = arith.constant 0 : index
    %c0_65 = arith.constant 0 : index
    %98 = vector.load %arg3[%c0_64, %c0_65] : memref<128x128xbf16, #tpu.memory_space<vmem>>, vector<128x128xbf16>
    %cst_66 = arith.constant dense<0.000000e+00> : vector<64x128xf32>
    %99 = tpu.matmul %97, %98, %cst_66 {dimension_numbers = #tpu.dot_dimension_numbers<[1], [0], [0], [1], [0, 0, 1, 1], [], []>} : vector<64x128xbf16>, vector<128x128xbf16>, vector<64x128xf32> -> vector<64x128xf32>
    %100 = arith.subf %82, %99 : vector<64x128xf32>
    %101 = arith.truncf %91 : vector<64x128xf32> to vector<64x128xbf16>
    %c0_67 = arith.constant 0 : index
    %c0_68 = arith.constant 0 : index
    %102 = vector.load %arg2[%c0_67, %c0_68] : memref<128x128xbf16, #tpu.memory_space<vmem>>, vector<128x128xbf16>
    %cst_69 = arith.constant dense<0.000000e+00> : vector<64x128xf32>
    %103 = tpu.matmul %101, %102, %cst_69 {dimension_numbers = #tpu.dot_dimension_numbers<[1], [0], [0], [1], [0, 0, 1, 1], [], []>} : vector<64x128xbf16>, vector<128x128xbf16>, vector<64x128xf32> -> vector<64x128xf32>
    %104 = math.tanh %103 : vector<64x128xf32>
    %105 = arith.subf %91, %104 : vector<64x128xf32>
    %106 = arith.truncf %105 : vector<64x128xf32> to vector<64x128xbf16>
    %c0_70 = arith.constant 0 : index
    %c0_71 = arith.constant 0 : index
    %107 = vector.load %arg3[%c0_70, %c0_71] : memref<128x128xbf16, #tpu.memory_space<vmem>>, vector<128x128xbf16>
    %cst_72 = arith.constant dense<0.000000e+00> : vector<64x128xf32>
    %108 = tpu.matmul %106, %107, %cst_72 {dimension_numbers = #tpu.dot_dimension_numbers<[1], [0], [0], [1], [0, 0, 1, 1], [], []>} : vector<64x128xbf16>, vector<128x128xbf16>, vector<64x128xf32> -> vector<64x128xf32>
    %109 = arith.subf %91, %108 : vector<64x128xf32>
    %c6_i32 = arith.constant 6 : i32
    %110 = arith.truncf %100 : vector<64x128xf32> to vector<64x128xbf16>
    %c0_73 = arith.constant 0 : index
    %c0_74 = arith.constant 0 : index
    %111 = vector.load %arg2[%c0_73, %c0_74] : memref<128x128xbf16, #tpu.memory_space<vmem>>, vector<128x128xbf16>
    %cst_75 = arith.constant dense<0.000000e+00> : vector<64x128xf32>
    %112 = tpu.matmul %110, %111, %cst_75 {dimension_numbers = #tpu.dot_dimension_numbers<[1], [0], [0], [1], [0, 0, 1, 1], [], []>} : vector<64x128xbf16>, vector<128x128xbf16>, vector<64x128xf32> -> vector<64x128xf32>
    %113 = math.tanh %112 : vector<64x128xf32>
    %114 = arith.subf %100, %113 : vector<64x128xf32>
    %115 = arith.truncf %114 : vector<64x128xf32> to vector<64x128xbf16>
    %c0_76 = arith.constant 0 : index
    %c0_77 = arith.constant 0 : index
    %116 = vector.load %arg3[%c0_76, %c0_77] : memref<128x128xbf16, #tpu.memory_space<vmem>>, vector<128x128xbf16>
    %cst_78 = arith.constant dense<0.000000e+00> : vector<64x128xf32>
    %117 = tpu.matmul %115, %116, %cst_78 {dimension_numbers = #tpu.dot_dimension_numbers<[1], [0], [0], [1], [0, 0, 1, 1], [], []>} : vector<64x128xbf16>, vector<128x128xbf16>, vector<64x128xf32> -> vector<64x128xf32>
    %118 = arith.subf %100, %117 : vector<64x128xf32>
    %119 = arith.truncf %109 : vector<64x128xf32> to vector<64x128xbf16>
    %c0_79 = arith.constant 0 : index
    %c0_80 = arith.constant 0 : index
    %120 = vector.load %arg2[%c0_79, %c0_80] : memref<128x128xbf16, #tpu.memory_space<vmem>>, vector<128x128xbf16>
    %cst_81 = arith.constant dense<0.000000e+00> : vector<64x128xf32>
    %121 = tpu.matmul %119, %120, %cst_81 {dimension_numbers = #tpu.dot_dimension_numbers<[1], [0], [0], [1], [0, 0, 1, 1], [], []>} : vector<64x128xbf16>, vector<128x128xbf16>, vector<64x128xf32> -> vector<64x128xf32>
    %122 = math.tanh %121 : vector<64x128xf32>
    %123 = arith.subf %109, %122 : vector<64x128xf32>
    %124 = arith.truncf %123 : vector<64x128xf32> to vector<64x128xbf16>
    %c0_82 = arith.constant 0 : index
    %c0_83 = arith.constant 0 : index
    %125 = vector.load %arg3[%c0_82, %c0_83] : memref<128x128xbf16, #tpu.memory_space<vmem>>, vector<128x128xbf16>
    %cst_84 = arith.constant dense<0.000000e+00> : vector<64x128xf32>
    %126 = tpu.matmul %124, %125, %cst_84 {dimension_numbers = #tpu.dot_dimension_numbers<[1], [0], [0], [1], [0, 0, 1, 1], [], []>} : vector<64x128xbf16>, vector<128x128xbf16>, vector<64x128xf32> -> vector<64x128xf32>
    %127 = arith.subf %109, %126 : vector<64x128xf32>
    %c7_i32 = arith.constant 7 : i32
    %128 = arith.truncf %118 : vector<64x128xf32> to vector<64x128xbf16>
    %c0_85 = arith.constant 0 : index
    %c0_86 = arith.constant 0 : index
    %129 = vector.load %arg2[%c0_85, %c0_86] : memref<128x128xbf16, #tpu.memory_space<vmem>>, vector<128x128xbf16>
    %cst_87 = arith.constant dense<0.000000e+00> : vector<64x128xf32>
    %130 = tpu.matmul %128, %129, %cst_87 {dimension_numbers = #tpu.dot_dimension_numbers<[1], [0], [0], [1], [0, 0, 1, 1], [], []>} : vector<64x128xbf16>, vector<128x128xbf16>, vector<64x128xf32> -> vector<64x128xf32>
    %131 = math.tanh %130 : vector<64x128xf32>
    %132 = arith.subf %118, %131 : vector<64x128xf32>
    %133 = arith.truncf %132 : vector<64x128xf32> to vector<64x128xbf16>
    %c0_88 = arith.constant 0 : index
    %c0_89 = arith.constant 0 : index
    %134 = vector.load %arg3[%c0_88, %c0_89] : memref<128x128xbf16, #tpu.memory_space<vmem>>, vector<128x128xbf16>
    %cst_90 = arith.constant dense<0.000000e+00> : vector<64x128xf32>
    %135 = tpu.matmul %133, %134, %cst_90 {dimension_numbers = #tpu.dot_dimension_numbers<[1], [0], [0], [1], [0, 0, 1, 1], [], []>} : vector<64x128xbf16>, vector<128x128xbf16>, vector<64x128xf32> -> vector<64x128xf32>
    %136 = arith.subf %118, %135 : vector<64x128xf32>
    %137 = arith.truncf %127 : vector<64x128xf32> to vector<64x128xbf16>
    %c0_91 = arith.constant 0 : index
    %c0_92 = arith.constant 0 : index
    %138 = vector.load %arg2[%c0_91, %c0_92] : memref<128x128xbf16, #tpu.memory_space<vmem>>, vector<128x128xbf16>
    %cst_93 = arith.constant dense<0.000000e+00> : vector<64x128xf32>
    %139 = tpu.matmul %137, %138, %cst_93 {dimension_numbers = #tpu.dot_dimension_numbers<[1], [0], [0], [1], [0, 0, 1, 1], [], []>} : vector<64x128xbf16>, vector<128x128xbf16>, vector<64x128xf32> -> vector<64x128xf32>
    %140 = math.tanh %139 : vector<64x128xf32>
    %141 = arith.subf %127, %140 : vector<64x128xf32>
    %142 = arith.truncf %141 : vector<64x128xf32> to vector<64x128xbf16>
    %c0_94 = arith.constant 0 : index
    %c0_95 = arith.constant 0 : index
    %143 = vector.load %arg3[%c0_94, %c0_95] : memref<128x128xbf16, #tpu.memory_space<vmem>>, vector<128x128xbf16>
    %cst_96 = arith.constant dense<0.000000e+00> : vector<64x128xf32>
    %144 = tpu.matmul %142, %143, %cst_96 {dimension_numbers = #tpu.dot_dimension_numbers<[1], [0], [0], [1], [0, 0, 1, 1], [], []>} : vector<64x128xbf16>, vector<128x128xbf16>, vector<64x128xf32> -> vector<64x128xf32>
    %145 = arith.subf %127, %144 : vector<64x128xf32>
    %c8_i32 = arith.constant 8 : i32
    %146 = arith.truncf %136 : vector<64x128xf32> to vector<64x128xbf16>
    %c0_97 = arith.constant 0 : index
    %c0_98 = arith.constant 0 : index
    %147 = vector.load %arg2[%c0_97, %c0_98] : memref<128x128xbf16, #tpu.memory_space<vmem>>, vector<128x128xbf16>
    %cst_99 = arith.constant dense<0.000000e+00> : vector<64x128xf32>
    %148 = tpu.matmul %146, %147, %cst_99 {dimension_numbers = #tpu.dot_dimension_numbers<[1], [0], [0], [1], [0, 0, 1, 1], [], []>} : vector<64x128xbf16>, vector<128x128xbf16>, vector<64x128xf32> -> vector<64x128xf32>
    %149 = math.tanh %148 : vector<64x128xf32>
    %150 = arith.subf %136, %149 : vector<64x128xf32>
    %151 = arith.truncf %150 : vector<64x128xf32> to vector<64x128xbf16>
    %c0_100 = arith.constant 0 : index
    %c0_101 = arith.constant 0 : index
    %152 = vector.load %arg3[%c0_100, %c0_101] : memref<128x128xbf16, #tpu.memory_space<vmem>>, vector<128x128xbf16>
    %cst_102 = arith.constant dense<0.000000e+00> : vector<64x128xf32>
    %153 = tpu.matmul %151, %152, %cst_102 {dimension_numbers = #tpu.dot_dimension_numbers<[1], [0], [0], [1], [0, 0, 1, 1], [], []>} : vector<64x128xbf16>, vector<128x128xbf16>, vector<64x128xf32> -> vector<64x128xf32>
    %154 = arith.subf %136, %153 : vector<64x128xf32>
    %155 = arith.truncf %145 : vector<64x128xf32> to vector<64x128xbf16>
    %c0_103 = arith.constant 0 : index
    %c0_104 = arith.constant 0 : index
    %156 = vector.load %arg2[%c0_103, %c0_104] : memref<128x128xbf16, #tpu.memory_space<vmem>>, vector<128x128xbf16>
    %cst_105 = arith.constant dense<0.000000e+00> : vector<64x128xf32>
    %157 = tpu.matmul %155, %156, %cst_105 {dimension_numbers = #tpu.dot_dimension_numbers<[1], [0], [0], [1], [0, 0, 1, 1], [], []>} : vector<64x128xbf16>, vector<128x128xbf16>, vector<64x128xf32> -> vector<64x128xf32>
    %158 = math.tanh %157 : vector<64x128xf32>
    %159 = arith.subf %145, %158 : vector<64x128xf32>
    %160 = arith.truncf %159 : vector<64x128xf32> to vector<64x128xbf16>
    %c0_106 = arith.constant 0 : index
    %c0_107 = arith.constant 0 : index
    %161 = vector.load %arg3[%c0_106, %c0_107] : memref<128x128xbf16, #tpu.memory_space<vmem>>, vector<128x128xbf16>
    %cst_108 = arith.constant dense<0.000000e+00> : vector<64x128xf32>
    %162 = tpu.matmul %160, %161, %cst_108 {dimension_numbers = #tpu.dot_dimension_numbers<[1], [0], [0], [1], [0, 0, 1, 1], [], []>} : vector<64x128xbf16>, vector<128x128xbf16>, vector<64x128xf32> -> vector<64x128xf32>
    %163 = arith.subf %145, %162 : vector<64x128xf32>
    %c9_i32 = arith.constant 9 : i32
    %164 = arith.truncf %154 : vector<64x128xf32> to vector<64x128xbf16>
    %c0_109 = arith.constant 0 : index
    %c0_110 = arith.constant 0 : index
    %165 = vector.load %arg2[%c0_109, %c0_110] : memref<128x128xbf16, #tpu.memory_space<vmem>>, vector<128x128xbf16>
    %cst_111 = arith.constant dense<0.000000e+00> : vector<64x128xf32>
    %166 = tpu.matmul %164, %165, %cst_111 {dimension_numbers = #tpu.dot_dimension_numbers<[1], [0], [0], [1], [0, 0, 1, 1], [], []>} : vector<64x128xbf16>, vector<128x128xbf16>, vector<64x128xf32> -> vector<64x128xf32>
    %167 = math.tanh %166 : vector<64x128xf32>
    %168 = arith.subf %154, %167 : vector<64x128xf32>
    %169 = arith.truncf %168 : vector<64x128xf32> to vector<64x128xbf16>
    %c0_112 = arith.constant 0 : index
    %c0_113 = arith.constant 0 : index
    %170 = vector.load %arg3[%c0_112, %c0_113] : memref<128x128xbf16, #tpu.memory_space<vmem>>, vector<128x128xbf16>
    %cst_114 = arith.constant dense<0.000000e+00> : vector<64x128xf32>
    %171 = tpu.matmul %169, %170, %cst_114 {dimension_numbers = #tpu.dot_dimension_numbers<[1], [0], [0], [1], [0, 0, 1, 1], [], []>} : vector<64x128xbf16>, vector<128x128xbf16>, vector<64x128xf32> -> vector<64x128xf32>
    %172 = arith.subf %154, %171 : vector<64x128xf32>
    %173 = arith.truncf %163 : vector<64x128xf32> to vector<64x128xbf16>
    %c0_115 = arith.constant 0 : index
    %c0_116 = arith.constant 0 : index
    %174 = vector.load %arg2[%c0_115, %c0_116] : memref<128x128xbf16, #tpu.memory_space<vmem>>, vector<128x128xbf16>
    %cst_117 = arith.constant dense<0.000000e+00> : vector<64x128xf32>
    %175 = tpu.matmul %173, %174, %cst_117 {dimension_numbers = #tpu.dot_dimension_numbers<[1], [0], [0], [1], [0, 0, 1, 1], [], []>} : vector<64x128xbf16>, vector<128x128xbf16>, vector<64x128xf32> -> vector<64x128xf32>
    %176 = math.tanh %175 : vector<64x128xf32>
    %177 = arith.subf %163, %176 : vector<64x128xf32>
    %178 = arith.truncf %177 : vector<64x128xf32> to vector<64x128xbf16>
    %c0_118 = arith.constant 0 : index
    %c0_119 = arith.constant 0 : index
    %179 = vector.load %arg3[%c0_118, %c0_119] : memref<128x128xbf16, #tpu.memory_space<vmem>>, vector<128x128xbf16>
    %cst_120 = arith.constant dense<0.000000e+00> : vector<64x128xf32>
    %180 = tpu.matmul %178, %179, %cst_120 {dimension_numbers = #tpu.dot_dimension_numbers<[1], [0], [0], [1], [0, 0, 1, 1], [], []>} : vector<64x128xbf16>, vector<128x128xbf16>, vector<64x128xf32> -> vector<64x128xf32>
    %181 = arith.subf %163, %180 : vector<64x128xf32>
    %c0_121 = arith.constant 0 : index
    %c0_122 = arith.constant 0 : index
    %182 = vector.load %arg4[%c0_121, %c0_122] : memref<128x128xf32, #tpu.memory_space<vmem>>, vector<64x128xf32>
    tpu.vector_store %arg4[%c0_121, %c0_122], %172 {strides = array<i32>} : memref<128x128xf32, #tpu.memory_space<vmem>>, vector<64x128xf32>,
    %c64_123 = arith.constant 64 : index
    %c0_124 = arith.constant 0 : index
    %183 = vector.load %arg4[%c64_123, %c0_124] : memref<128x128xf32, #tpu.memory_space<vmem>>, vector<64x128xf32>
    tpu.vector_store %arg4[%c64_123, %c0_124], %181 {strides = array<i32>} : memref<128x128xf32, #tpu.memory_space<vmem>>, vector<64x128xf32>,
    return
  }
  func.func @transform_0(%arg0: i32) -> (i32, i32) {
    %c0_i32 = arith.constant 0 : i32
    %c0_i32_0 = arith.constant 0 : i32
    return %arg0, %c0_i32 : i32, i32
  }
  func.func @transform_1(%arg0: i32) -> (i32, i32) {
    %c0_i32 = arith.constant 0 : i32
    %c0_i32_0 = arith.constant 0 : i32
    %c0_i32_1 = arith.constant 0 : i32
    return %c0_i32, %c0_i32_0 : i32, i32
  }
  func.func @transform_2(%arg0: i32) -> (i32, i32) {
    %c0_i32 = arith.constant 0 : i32
    %c0_i32_0 = arith.constant 0 : i32
    %c0_i32_1 = arith.constant 0 : i32
    return %c0_i32, %c0_i32_0 : i32, i32
  }
  func.func @transform_3(%arg0: i32) -> (i32, i32) {
    %c0_i32 = arith.constant 0 : i32
    %c0_i32_0 = arith.constant 0 : i32
    return %arg0, %c0_i32 : i32, i32
  }
}

</mosaic_0001>

<bundles_post_ra>
// kernel: tpu_custom_call.1
= control target key start
LH: loop header
LB: loop body
LE: loop exit
PB: predicated region body
PF: predicated region fallthrough
CT: control target
= control target key end

     0   :  { %8 = vsyncpa [#allocation3], 0  ;;  %s7585_s0 = inlined_call_operand.hbm [shape: f32[256,128], index: 0, kind: input, shape index: {}]   ;;  %s7586_s1 = inlined_call_operand.hbm [shape: bf16[128,128], index: 1, kind: input, shape index: {}]   ;;  %s7587_s2 = inlined_call_operand.hbm [shape: bf16[128,128], index: 2, kind: input, shape index: {}]   ;;  %s7588_s3 = inlined_call_operand.hbm [shape: f32[256,128], index: 3, kind: output, shape index: {}]  }
   0x1   :  { %10 = vsyncpa [#allocation3 + $0x1], 0 }
   0x2   :  { %11 = vsyncpa [#allocation6], 0 }
   0x3   :  { %12 = vsyncpa [#allocation4], 0 }
   0x4   :  { %14 = vsyncpa [#allocation4 + $0x1], 0  ;;  %s5840_s12 = smov 0   ;;  %s5842_s13 = smov 0  }
   0x5   :  { %s5844_s14 = smov 0   ;;  %s5846_s15 = smov 0  }
   0x6 LB: > { %s5861_s16 = sadd.s32 4294967295, %s5808_s15   ;;  %s3727_s17 = sadd.s32 4294967294, %s5808_s15   ;;  %s5808_s15 = sphi %s5846_s15, %s7610_s15   ;;  %s5804_s14 = sphi %s5844_s14, %s7609_s14   ;;  %s5800_s13 = sphi %s5842_s13, %s7608_s13   ;;  %s5796_s12 = sphi %s5840_s12, %s7607_s12  }
   0x7   : > { %p40_p0 = scmp.ne.s32.totalorder %s5800_s13, %s5796_s12  ;;  %p7589_p1 = scmp.eq.s32.totalorder %s5861_s16, 0 }
   0x8   : > { %p112_p3 = scmp.eq.s32.totalorder %s3727_s17, 1  ;;  %p3728_p5 = scmp.ge.s32.totalorder %s5808_s15, 1 }
   0x9   : > { %p5870_p4 = por %p7589_p1, %p40_p0  ;;  %p119_p7 = scmp.lt.s32.totalorder %s5808_s15, 3 }
   0xa   : > { %p5875_p6 = por %p112_p3, %p40_p0  ;;  %s5810_s21 = smov [#allocation5]  }
   0xb   : > { %s7593_s18 = scalar_select %p5870_p4, 1, 0 }
   0xc   : > { %s7594_s19 = scalar_select %p5875_p6, 1, 0 }
   0xd   : > { %p5880_p8 = pnand %p3728_p5, %p119_p7  ;;  %s131_s22 = sshll.u32 %s5810_s21, 4  ;;  %s132_s22 = int_to_ptr.vmem [resolvable:$true] %s131_s22 }
   0xe   : > { %s5811_s24 = smov [#allocation7]   ;;  %s5671_s26 = scalar_lea.vmem %s132_s22, 1024 }
   0xf   : > { %s7595_s20 = scalar_select %p5880_p8, 1, 0 }
  0x10   : > { %p5215_p9 = pneg %p5880_p8  ;;  %s144_s25 = sshll.u32 %s5811_s24, 4  ;;  %s145_s25 = int_to_ptr.vmem [resolvable:$true] %s144_s25 }
  0x11   : > { %p5672_p13 = scmp.ne.s32.totalorder %s132_s22, %s5671_s26  ;;  %p5679_p5 = scmp.lt.s32.totalorder %s132_s22, %s132_s22 }
  0x12   : > { %p5889_p11 = pnand %p5215_p9, %p7589_p1  ;;  %p5680_p7 = scmp.lt.s32.totalorder %s5671_s26, %s5671_s26 }
  0x14   : > { %p5662_p12 = pneg %p5889_p11  ;;  %p5681_p10 = por %p5680_p7, %p5679_p5 }
  0x16   : > { %p5674_p0 = pnand %p5672_p13, %p5662_p12 }
  0x18   : > { %p5675_p3 = pneg %p5674_p0 }
  0x1a   : > { %p5682_p9 = pnand %p5681_p10, %p5675_p3 }
  0x1c   : > { %5685 = shalt.err (!%p5682_p9)
}
  0x1d   : > { %s5812_s27 = smov 64   ;;  %s5813_s28 = smov 4  }
  0x1e   : > { %5218 = dma.hbm_to_vmem [thread:$0]  (!%p5889_p11), %s7586_s1, 1024, %s132_s22, [#allocation6], %s5812_s27, %s5812_s27, %s5813_s28  }
  0x1f   : > { %s5697_s4 = scalar_lea.vmem %s145_s25, 1024  ;;  %p5705_p2 = scmp.lt.s32.totalorder %s145_s25, %s145_s25 }
  0x20   : > { %p5698_p1 = scmp.ne.s32.totalorder %s145_s25, %s5697_s4  ;;  %p5706_p6 = scmp.lt.s32.totalorder %s5697_s4, %s5697_s4 }
  0x22   : > { %p5700_p13 = pnand %p5698_p1, %p5662_p12  ;;  %p5707_p5 = por %p5706_p6, %p5705_p2 }
  0x24   : > { %p5701_p0 = pneg %p5700_p13 }
  0x26   : > { %p5708_p10 = pnand %p5707_p5, %p5701_p0 }
  0x28   : > { %5711 = shalt.err (!%p5708_p10)
}
  0x29   : > { %5221 = dma.hbm_to_vmem [thread:$0]  (!%p5889_p11), %s7587_s2, 1024, %s145_s25, [#allocation6], %s5812_s27, %s5812_s27, %s5813_s28  }
  0x2a   : > { %s5912_s7 = sadd.s32 1, %s5808_s15   ;;  %s27_s8 = sadd.s32 1, %s5804_s14 }
  0x2b   : > { %s24_s9 = ssub.s32 %s5808_s15, %s5912_s7  ;;  %p34_p1 = scmp.ne.s32.totalorder %s5804_s14, %s5800_s13 }
  0x2c   : > { %p25_p2 = scmp.eq.s32.totalorder %s24_s9, 0  ;;  %p35_p6 = scmp.eq.s32.totalorder %s5808_s15, 0 }
  0x2d   : > { %p7597_p12 = scmp.eq.s32.totalorder %s5861_s16, 1  ;;  %p5232_p7 = scmp.lt.s32.totalorder %s5808_s15, 2 }
  0x2e   : > { %s5928_s11 = scalar_select %p25_p2, %s5804_s14, %s27_s8  }
  0x2f   : > { %p5922_p3 = por %p7597_p12, %p34_p1  ;;  %p36_p9 = por %p35_p6, %p34_p1 }
  0x30   : > { %s158_s17 = sand.u32 1, %s5804_s14   ;;  %s3761_s22 = sshll.u32 %s5808_s15, 11 }
  0x31   : > { %s7598_s10 = scalar_select %p5922_p3, 1, 0 }
  0x32   : > { %s3732_s21 = sshll.u32 %s158_s17, 7  ;;  %s5935_s25 = scalar_lea.hbm %s7585_s0, %s3761_s22 }
  0x33   : > { %s162_s26 = scalar_lea.vmem [#allocation2], %s3732_s21  ;;  %p5939_p11 = pnand %p5232_p7, %p36_p9 }
  0x34   : > { %s169_s27 = sshll.u32 %s162_s26, 4  ;;  %s5943_s29 = scalar_lea.sflag [#allocation3], %s158_s17  ;;  %s5937_s27 = int_to_ptr.vmem [resolvable:$true] %s169_s27 }
  0x35   : > { %s5712_s30 = scalar_lea.hbm %s5935_s25, 2048  ;;  %p5714_p0 = pneg %p5939_p11 }
  0x36   : > { %p5713_p13 = scmp.ne.s32.totalorder %s5935_s25, %s5712_s30  ;;  %s5717_s6 = scalar_lea.hbm %s7585_s0, 4096 }
  0x37   : > { %p5718_p1 = scmp.lt.s32.totalorder %s5935_s25, %s7585_s0  ;;  %p5719_p2 = scmp.lt.s32.totalorder %s5717_s6, %s5712_s30 }
  0x38   : > { %p5715_p5 = pnand %p5714_p0, %p5713_p13 }
  0x39   : > { %p5720_p6 = por %p5719_p2, %p5718_p1 }
  0x3a   : > { %p5716_p10 = pneg %p5715_p5 }
  0x3c   : > { %p5721_p12 = pnand %p5720_p6, %p5716_p10 }
  0x3e   : > { %5724 = shalt.err (!%p5721_p12)
}
  0x3f   : > { %s5725_s17 = scalar_lea.vmem %s5937_s27, 2048  ;;  %s5814_s21 = smov [#allocation2]  }
  0x40   : > { %p5726_p7 = scmp.ne.s32.totalorder %s5937_s27, %s5725_s17  ;;  %s5730_s22 = sshll.u32 %s5814_s21, 4  ;;  %s5731_s22 = int_to_ptr.vmem [resolvable:$false] %s5730_s22 }
  0x41   : > { %s5732_s23 = scalar_lea.vmem %s5731_s22, 4096  ;;  %p5733_p5 = scmp.lt.s32.totalorder %s5937_s27, %s5731_s22 }
  0x42   : > { %p5728_p9 = pnand %p5726_p7, %p5714_p0  ;;  %p5734_p3 = scmp.lt.s32.totalorder %s5732_s23, %s5725_s17 }
  0x44   : > { %p5729_p13 = pneg %p5728_p9  ;;  %p5735_p4 = por %p5734_p3, %p5733_p5 }
  0x46   : > { %p5736_p8 = pnand %p5735_p4, %p5729_p13 }
  0x48   : > { %5739 = shalt.err (!%p5736_p8)
}
  0x49   : > { %s5815_s24 = smov 128   ;;  %s5816_s26 = smov 8  }
  0x4a   : > { %5225 = dma.hbm_to_vmem [thread:$0]  (!%p5939_p11), %s5935_s25, 2048, %s5937_s27, %s5943_s29, %s5815_s24, %s5815_s24, %s5816_s26  }
  0x4b   : > { %p7600_p0 = scmp.ne.s32.totalorder %s7595_s20, 0 }
  0x4c   : > { %s5967_s30 = sand.u32 (!%p7600_p0), 1, %s5800_s13   ;;  %p7601_p4 = scmp.ne.s32.totalorder (!%p7600_p0), %s7593_s18, 0 }
  0x4d   : > { %181 = sbr.rel (%p7600_p0) target bundleno = 4390 (0x1126), region = 32  ;;  %s3736_s4 = sshll.u32 (!%p7600_p0), %s5967_s30, 7 }
  0x4e   : > { %s184_s5 = scalar_lea.sflag (!%p7600_p0), [#allocation3], %s5967_s30  ;;  %s5973_s6 = scalar_lea.vmem (!%p7600_p0), [#allocation2], %s3736_s4 }
  0x52   : > { %5783 = dma.done.wait (%p7601_p4), %s184_s5, 2048  }
  0x53   : > { %5785 = vsyncadd (%p7601_p4), %s184_s5, 4294965248  ;;  %p7602_p8 = scmp.eq.s32.totalorder %s5861_s16, 0 }
  0x55   : > { %5787 = dma.done.wait (%p7602_p8), [#allocation6], 2048   ;;  %p7603_p3 = pmov %p7602_p8 }
  0x56   : > { %v5983_v0 = vld [vmem:[#allocation5 + $0x38] sm:$0xff]   ;;  %v5985_v1 = vld [vmem:[#allocation5 + $0x30] sm:$0xff]   ;;  %v5990_v2 = vld [vmem:[#allocation5 + $0x28] sm:$0xff]   ;;  %s7502_s18 = scalar_lea.vmem [#allocation8], %s3736_s4  ;;  %s3762_s20 = sshll.u32 %s5861_s16, 11 }
  0x57   : > { %5789 = vsyncadd (%p7603_p3), [#allocation6], 4294965248  ;;  %4243 = vmatprep.subr.bf16.mxu0 %v5983_v0  ;;  %v5994_v3 = vld [vmem:[#allocation5 + $0x20] sm:$0xff]   ;;  %v6000_v5 = vld [vmem:[%s5973_s6 + $0x8] sm:$0xff]  ;;  %s3635_s25 = sshll.u32 %s7502_s18, 4  ;;  %s7537_s29 = scalar_lea.hbm %s7588_s3, %s3762_s20  ;;  %s7539_s25 = int_to_ptr.vmem [resolvable:$true] %s3635_s25 }
  0x58   : > { %4244 = vmatpush3.bf16.msra.mxu0 %v5983_v0  ;;  %v5997_v4 = vld [vmem:[%s5973_s6] sm:$0xff]  ;;  %v6006_v7 = vld [vmem:[#allocation5 + $0x18] sm:$0xff]   ;;  %v6008_v8 = vld [vmem:[#allocation5 + $0x10] sm:$0xff]   ;;  %s3622_s16 = scalar_lea.sflag [#allocation4], %s5967_s30  ;;  %s5740_s8 = scalar_lea.vmem %s7539_s25, 2048 }
  0x59   : > { %4245 = vmatprep.subr.bf16.mxu0 %v5985_v1  ;;  %v237_v6 = vpack.c.bf16 %v6000_v5, %v5997_v4  ;;  %v6010_v9 = vld [vmem:[#allocation7 + $0x38] sm:$0xff]   ;;  %v6013_v10 = vld [vmem:[#allocation7 + $0x30] sm:$0xff]   ;;  %v6021_v11 = vld [vmem:[#allocation5 + $0x8] sm:$0xff]   ;;  %p5741_p11 = scmp.ne.s32.totalorder %s7539_s25, %s5740_s8  ;;  %p7604_p10 = scmp.ne.s32.totalorder %s7598_s10, 0 }
  0x5a   : > { %4267 = vmatprep.subr.bf16.mxu1 %v6010_v9  ;;  %v6026_v12 = vld [vmem:[#allocation5] sm:$0xff]   ;;  %v6030_v13 = vld [vmem:[%s5973_s6 + $0x10] sm:$0xff]  ;;  %v6033_v14 = vld [vmem:[%s5973_s6 + $0x18] sm:$0xff]  ;;  %s5817_s9 = smov [#allocation8]  }
  0x5b   : > { %4259 = vmatprep.mubr.bf16.mxu0 %v237_v6  ;;  %4268 = vmatpush3.bf16.msra.mxu1 %v6010_v9  ;;  %v6037_v15 = vld [vmem:[%s5973_s6 + $0x20] sm:$0xff]  ;;  %v6040_v16 = vld [vmem:[%s5973_s6 + $0x28] sm:$0xff]  ;;  %v238_v17 = vpack.c.bf16 %v6033_v14, %v6030_v13  ;;  %v6050_v19 = vld [vmem:[%s5973_s6 + $0x30] sm:$0xff]  ;;  %p5742_p1 = pnand %p5741_p11, %p7604_p10  ;;  %s5744_s17 = sshll.u32 %s5817_s9, 4  ;;  %s5745_s17 = int_to_ptr.vmem [resolvable:$false] %s5744_s17 }
  0x5c   : > { %4246 = vmatpush3.bf16.msra.mxu0 %v5985_v1  ;;  %4269 = vmatprep.subr.bf16.mxu1 %v6013_v10  ;;  %v239_v18 = vpack.c.bf16 %v6040_v16, %v6037_v15  ;;  %v6053_v20 = vld [vmem:[%s5973_s6 + $0x38] sm:$0xff]  ;;  %v6057_v21 = vld [vmem:[%s5973_s6 + $0x40] sm:$0xff]  ;;  %v6060_v22 = vld [vmem:[%s5973_s6 + $0x48] sm:$0xff]  ;;  %s5746_s21 = scalar_lea.vmem %s5745_s17, 4096  ;;  %p5747_p6 = scmp.lt.s32.totalorder %s7539_s25, %s5745_s17 }
  0x5d   : > { %4247 = vmatprep.subr.bf16.mxu0 %v5990_v2  ;;  %v240_v23 = vpack.c.bf16 %v6053_v20, %v6050_v19  ;;  %v527_v24 = vpack.c.bf16 %v6060_v22, %v6057_v21  ;;  %v6078_v25 = vld [vmem:[%s5973_s6 + $0x50] sm:$0xff]  ;;  %v6081_v26 = vld [vmem:[%s5973_s6 + $0x58] sm:$0xff]  ;;  %v6085_v27 = vld [vmem:[%s5973_s6 + $0x60] sm:$0xff]  ;;  %p5743_p2 = pneg %p5742_p1  ;;  %p5748_p12 = scmp.lt.s32.totalorder %s5746_s21, %s5740_s8 }
  0x5e   : > { %v6088_v28 = vld [vmem:[%s5973_s6 + $0x68] sm:$0xff]  ;;  %v528_v29 = vpack.c.bf16 %v6081_v26, %v6078_v25  ;;  %v6097_v31 = vld [vmem:[%s5973_s6 + $0x70] sm:$0xff]  ;;  %v6100_v32 = vld [vmem:[%s5973_s6 + $0x78] sm:$0xff] }
  0x5f   : > { %4270 = vmatpush3.bf16.msra.mxu1 %v6013_v10  ;;  %v529_v30 = vpack.c.bf16 %v6088_v28, %v6085_v27  ;;  %v530_v33 = vpack.c.bf16 %v6100_v32, %v6097_v31  ;;  %v6120_v34 = vld [vmem:[#allocation7 + $0x28] sm:$0xff]   ;;  %v6124_v35 = vld [vmem:[#allocation7 + $0x20] sm:$0xff]   ;;  %v6128_v36 = vld [vmem:[#allocation7 + $0x18] sm:$0xff]   ;;  %p5749_p7 = por %p5748_p12, %p5747_p6 }
  0x60   : > { %4248 = vmatpush3.bf16.msra.mxu0 %v5990_v2  ;;  %4271 = vmatprep.subr.bf16.mxu1 %v6120_v34  ;;  %v6132_v37 = vld [vmem:[#allocation7 + $0x10] sm:$0xff]   ;;  %v6136_v38 = vld [vmem:[#allocation7 + $0x8] sm:$0xff]   ;;  %v6138_v39 = vld [vmem:[#allocation7] sm:$0xff]  }
  0x61   : > { %4249 = vmatprep.subr.bf16.mxu0 %v5994_v3  ;;  %p5750_p9 = pnand %p5749_p7, %p5743_p2 }
  0x63   : > { %4272 = vmatpush3.bf16.msra.mxu1 %v6120_v34 }
  0x64   : > { %4250 = vmatpush3.bf16.msra.mxu0 %v5994_v3  ;;  %4273 = vmatprep.subr.bf16.mxu1 %v6124_v35 }
  0x65   : > { %4251 = vmatprep.subr.bf16.mxu0 %v6006_v7 }
  0x67   : > { %4274 = vmatpush3.bf16.msra.mxu1 %v6124_v35 }
  0x68   : > { %4252 = vmatpush3.bf16.msra.mxu0 %v6006_v7  ;;  %4275 = vmatprep.subr.bf16.mxu1 %v6128_v36 }
  0x69   : > { %4253 = vmatprep.subr.bf16.mxu0 %v6008_v8 }
  0x6b   : > { %4276 = vmatpush3.bf16.msra.mxu1 %v6128_v36 }
  0x6c   : > { %4254 = vmatpush3.bf16.msra.mxu0 %v6008_v8  ;;  %4277 = vmatprep.subr.bf16.mxu1 %v6132_v37 }
  0x6d   : > { %4255 = vmatprep.subr.bf16.mxu0 %v6021_v11 }
  0x6f   : > { %4278 = vmatpush3.bf16.msra.mxu1 %v6132_v37 }
  0x70   : > { %4256 = vmatpush3.bf16.msra.mxu0 %v6021_v11  ;;  %4279 = vmatprep.subr.bf16.mxu1 %v6136_v38 }
  0x71   : > { %4257 = vmatprep.subr.bf16.mxu0 %v6026_v12 }
  0x73   : > { %4280 = vmatpush3.bf16.msra.mxu1 %v6136_v38 }
  0x74   : > { %4258 = vmatpush3.bf16.msra.mxu0 %v6026_v12  ;;  %4281 = vmatprep.subr.bf16.mxu1 %v6138_v39 }
  0x75   : > { %4291 = vmatprep.subr.bf16.mxu0 %v5983_v0 }
  0x77   : > { %4260 = vmatmul.mubr.bf16.vlgmr.msra.gmra.mxu0 %v238_v17  ;;  %4282 = vmatpush3.bf16.msra.mxu1 %v6138_v39 }
  0x78   : > { %4292 = vmatpush3.bf16.msra.mxu0 %v5983_v0  ;;  %4263 = vmatprep.mubr.bf16.mxu0 %v239_v18 }
  0x79   : > { %4293 = vmatprep.subr.bf16.mxu0 %v5985_v1  ;;  %4315 = vmatprep.subr.bf16.mxu1 %v6010_v9 }
  0x7c   : > { %4294 = vmatpush3.bf16.msra.mxu0 %v5985_v1 }
  0x7d   : > { %4295 = vmatprep.subr.bf16.mxu0 %v5990_v2 }
  0x7f   : > { %4264 = vmatmul.mubr.bf16.gmra.mxu0 %v240_v23 }
  0x80   : > { %4296 = vmatpush3.bf16.msra.mxu0 %v5990_v2  ;;  %4307 = vmatprep.mubr.bf16.mxu0 %v527_v24 }
  0x81   : > { %4297 = vmatprep.subr.bf16.mxu0 %v5994_v3 }
  0x84   : > { %4298 = vmatpush3.bf16.msra.mxu0 %v5994_v3 }
  0x85   : > { %4299 = vmatprep.subr.bf16.mxu0 %v6006_v7 }
  0x88   : > { %4300 = vmatpush3.bf16.msra.mxu0 %v6006_v7 }
  0x89   : > { %4301 = vmatprep.subr.bf16.mxu0 %v6008_v8 }
  0x8c   : > { %4302 = vmatpush3.bf16.msra.mxu0 %v6008_v8 }
  0x8d   : > { %4303 = vmatprep.subr.bf16.mxu0 %v6021_v11 }
  0x90   : > { %4304 = vmatpush3.bf16.msra.mxu0 %v6021_v11 }
  0x91   : > { %4305 = vmatprep.subr.bf16.mxu0 %v6026_v12 }
  0x94   : > { %4306 = vmatpush3.bf16.msra.mxu0 %v6026_v12 }
  0x95   : > { %4339 = vmatprep.subr.bf16.mxu0 %v5983_v0 }
  0x97   : > { %4308 = vmatmul.mubr.bf16.vlgmr.msra.gmra.mxu0 %v528_v29 }
  0x98   : > { %4311 = vmatprep.mubr.bf16.mxu0 %v529_v30  ;;  %4340 = vmatpush3.bf16.msra.mxu0 %v5983_v0 }
  0x99   : > { %4341 = vmatprep.subr.bf16.mxu0 %v5985_v1 }
  0x9c   : > { %4342 = vmatpush3.bf16.msra.mxu0 %v5985_v1 }
  0x9d   : > { %4343 = vmatprep.subr.bf16.mxu0 %v5990_v2 }
  0x9f   : > { %4312 = vmatmul.mubr.bf16.gmra.mxu0 %v530_v33 }
  0xa0   : > { %4344 = vmatpush3.bf16.msra.mxu0 %v5990_v2 }
  0xa1   : > { %4345 = vmatprep.subr.bf16.mxu0 %v5994_v3 }
  0xa4   : > { %4346 = vmatpush3.bf16.msra.mxu0 %v5994_v3 }
  0xa5   : > { %4347 = vmatprep.subr.bf16.mxu0 %v6006_v7 }
  0xa8   : > { %4348 = vmatpush3.bf16.msra.mxu0 %v6006_v7 }
  0xa9   : > { %4349 = vmatprep.subr.bf16.mxu0 %v6008_v8 }
  0xac   : > { %4350 = vmatpush3.bf16.msra.mxu0 %v6008_v8 }
  0xad   : > { %4351 = vmatprep.subr.bf16.mxu0 %v6021_v11 }
  0xb0   : > { %4352 = vmatpush3.bf16.msra.mxu0 %v6021_v11 }
  0xb1   : > { %4353 = vmatprep.subr.bf16.mxu0 %v6026_v12 }
  0xb4   : > { %4354 = vmatpush3.bf16.msra.mxu0 %v6026_v12 }
  0xb5   : > { %4387 = vmatprep.subr.bf16.mxu0 %v5983_v0 }
 0x137   : > { %v4261_v40 = vpop.f32.mrf.mxu0 }
 0x139   : > { %v339_v41 = vpop.f32.mrf.mxu0 }
 0x13a   : > { %5292 = vtanh.f32 %v339_v41 }
 0x13b   : > { %v4262_v42 = vpop.f32.mrf.mxu0 }
 0x13c   : > { %5294 = vtanh.f32 %v4262_v42 }
 0x13d   : > { %5296 = vtanh.f32 %v4261_v40  ;;  %v342_v43 = vpop.f32.mrf.mxu0 }
 0x13e   : > { %5298 = vtanh.f32 %v342_v43 }
 0x13f   : > { %v4265_v44 = vpop.f32.mrf.mxu0 }
 0x140   : > { %5300 = vtanh.f32 %v4265_v44 }
 0x141   : > { %v355_v45 = vpop.f32.mrf.mxu0 }
 0x142   : > { %5302 = vtanh.f32 %v355_v45 }
 0x143   : > { %v4266_v46 = vpop.f32.mrf.mxu0 }
 0x144   : > { %5304 = vtanh.f32 %v4266_v46 }
 0x145   : > { %v358_v47 = vpop.f32.mrf.mxu0 }
 0x146   : > { %5306 = vtanh.f32 %v358_v47 }
 0x147   : > { %v5293_v48 = vpop.eup %5292 }
 0x148   : > { %v378_v53 = vsub.f32 %v5997_v4, %v5293_v48 }
 0x149   : > { %v5295_v49 = vpop.eup %5294 }
 0x14a   : > { %v5297_v50 = vpop.eup %5296  ;;  %v381_v52 = vsub.f32 %v6033_v14, %v5295_v49 }
 0x14b   : > { %v5299_v51 = vpop.eup %5298  ;;  %v380_v55 = vsub.f32 %v6030_v13, %v5297_v50 }
 0x14c   : > { %v379_v54 = vsub.f32 %v6000_v5, %v5299_v51 }
 0x14d   : > { %v5301_v56 = vpop.eup %5300  ;;  %v387_v59 = vpack.c.bf16 %v381_v52, %v380_v55 }
 0x14e   : > { %v386_v57 = vpack.c.bf16 %v379_v54, %v378_v53  ;;  %v384_v61 = vsub.f32 %v6050_v19, %v5301_v56 }
 0x14f   : > { %v5303_v58 = vpop.eup %5302 }
 0x150   : > { %4283 = vmatprep.mubr.bf16.mxu1 %v386_v57  ;;  %v382_v62 = vsub.f32 %v6037_v15, %v5303_v58 }
 0x151   : > { %v5305_v60 = vpop.eup %5304  ;;  %4284 = vmatmul.mubr.bf16.vlgmr.msra.gmra.mxu1 %v387_v59 }
 0x152   : > { %4316 = vmatpush3.bf16.msra.mxu1 %v6010_v9  ;;  %v385_v63 = vsub.f32 %v6053_v20, %v5305_v60 }
 0x153   : > { %v5307_v6 = vpop.eup %5306  ;;  %4317 = vmatprep.subr.bf16.mxu1 %v6013_v10 }
 0x154   : > { %v383_v17 = vsub.f32 %v6040_v16, %v5307_v6  ;;  %v389_v18 = vpack.c.bf16 %v385_v63, %v384_v61 }
 0x156   : > { %4318 = vmatpush3.bf16.msra.mxu1 %v6013_v10  ;;  %v388_v23 = vpack.c.bf16 %v383_v17, %v382_v62 }
 0x157   : > { %v4309_v24 = vpop.f32.mrf.mxu0  ;;  %4319 = vmatprep.subr.bf16.mxu1 %v6120_v34 }
 0x158   : > { %4287 = vmatprep.mubr.bf16.mxu1 %v388_v23 }
 0x159   : > { %4288 = vmatmul.mubr.bf16.gmra.mxu1 %v389_v18  ;;  %v565_v29 = vpop.f32.mrf.mxu0 }
 0x15a   : > { %4320 = vmatpush3.bf16.msra.mxu1 %v6120_v34  ;;  %5308 = vtanh.f32 %v565_v29 }
 0x15b   : > { %v4310_v30 = vpop.f32.mrf.mxu0  ;;  %4321 = vmatprep.subr.bf16.mxu1 %v6124_v35 }
 0x15c   : > { %5310 = vtanh.f32 %v4310_v30 }
 0x15d   : > { %5312 = vtanh.f32 %v4309_v24  ;;  %v568_v33 = vpop.f32.mrf.mxu0 }
 0x15e   : > { %5314 = vtanh.f32 %v568_v33  ;;  %4322 = vmatpush3.bf16.msra.mxu1 %v6124_v35 }
 0x15f   : > { %v4313_v40 = vpop.f32.mrf.mxu0  ;;  %4323 = vmatprep.subr.bf16.mxu1 %v6128_v36 }
 0x161   : > { %v581_v41 = vpop.f32.mrf.mxu0 }
 0x162   : > { %4324 = vmatpush3.bf16.msra.mxu1 %v6128_v36  ;;  %5316 = vtanh.f32 %v581_v41 }
 0x163   : > { %v4314_v42 = vpop.f32.mrf.mxu0  ;;  %4325 = vmatprep.subr.bf16.mxu1 %v6132_v37 }
 0x164   : > { %5318 = vtanh.f32 %v4314_v42 }
 0x165   : > { %5320 = vtanh.f32 %v4313_v40  ;;  %v584_v43 = vpop.f32.mrf.mxu0 }
 0x166   : > { %5322 = vtanh.f32 %v584_v43  ;;  %4326 = vmatpush3.bf16.msra.mxu1 %v6132_v37 }
 0x167   : > { %4327 = vmatprep.subr.bf16.mxu1 %v6136_v38  ;;  %v5309_v44 = vpop.eup %5308 }
 0x168   : > { %v604_v49 = vsub.f32 %v6057_v21, %v5309_v44 }
 0x169   : > { %v5311_v45 = vpop.eup %5310 }
 0x16a   : > { %v5313_v46 = vpop.eup %5312  ;;  %4328 = vmatpush3.bf16.msra.mxu1 %v6136_v38  ;;  %v607_v48 = vsub.f32 %v6081_v26, %v5311_v45 }
 0x16b   : > { %v5315_v47 = vpop.eup %5314  ;;  %4329 = vmatprep.subr.bf16.mxu1 %v6138_v39  ;;  %v606_v51 = vsub.f32 %v6078_v25, %v5313_v46 }
 0x16c   : > { %v605_v50 = vsub.f32 %v6060_v22, %v5315_v47 }
 0x16d   : > { %v613_v53 = vpack.c.bf16 %v607_v48, %v606_v51 }
 0x16e   : > { %4330 = vmatpush3.bf16.msra.mxu1 %v6138_v39  ;;  %v612_v52 = vpack.c.bf16 %v605_v50, %v604_v49 }
 0x16f   : > { %4363 = vmatprep.subr.bf16.mxu1 %v6010_v9  ;;  %v5317_v54 = vpop.eup %5316 }
 0x170   : > { %4331 = vmatprep.mubr.bf16.mxu1 %v612_v52  ;;  %v608_v59 = vsub.f32 %v6085_v27, %v5317_v54 }
 0x171   : > { %v5319_v55 = vpop.eup %5318  ;;  %4332 = vmatmul.mubr.bf16.vlgmr.msra.gmra.mxu1 %v613_v53 }
 0x172   : > { %v5321_v56 = vpop.eup %5320  ;;  %4364 = vmatpush3.bf16.msra.mxu1 %v6010_v9  ;;  %v611_v58 = vsub.f32 %v6100_v32, %v5319_v55 }
 0x173   : > { %v5323_v57 = vpop.eup %5322  ;;  %4365 = vmatprep.subr.bf16.mxu1 %v6013_v10  ;;  %v610_v61 = vsub.f32 %v6097_v31, %v5321_v56 }
 0x174   : > { %v609_v60 = vsub.f32 %v6088_v28, %v5323_v57 }
 0x175   : > { %v615_v63 = vpack.c.bf16 %v611_v58, %v610_v61 }
 0x176   : > { %v614_v62 = vpack.c.bf16 %v609_v60, %v608_v59  ;;  %4366 = vmatpush3.bf16.msra.mxu1 %v6013_v10 }
 0x177   : > { %4367 = vmatprep.subr.bf16.mxu1 %v6120_v34 }
 0x178   : > { %4335 = vmatprep.mubr.bf16.mxu1 %v614_v62 }
 0x179   : > { %4336 = vmatmul.mubr.bf16.gmra.mxu1 %v615_v63 }
 0x17a   : > { %4368 = vmatpush3.bf16.msra.mxu1 %v6120_v34 }
 0x17b   : > { %4369 = vmatprep.subr.bf16.mxu1 %v6124_v35 }
 0x17e   : > { %4370 = vmatpush3.bf16.msra.mxu1 %v6124_v35 }
 0x17f   : > { %4371 = vmatprep.subr.bf16.mxu1 %v6128_v36 }
 0x182   : > { %4372 = vmatpush3.bf16.msra.mxu1 %v6128_v36 }
 0x183   : > { %4373 = vmatprep.subr.bf16.mxu1 %v6132_v37 }
 0x186   : > { %4374 = vmatpush3.bf16.msra.mxu1 %v6132_v37 }
 0x187   : > { %4375 = vmatprep.subr.bf16.mxu1 %v6136_v38 }
 0x18a   : > { %4376 = vmatpush3.bf16.msra.mxu1 %v6136_v38 }
 0x18b   : > { %4377 = vmatprep.subr.bf16.mxu1 %v6138_v39 }
 0x18e   : > { %4378 = vmatpush3.bf16.msra.mxu1 %v6138_v39 }
 0x18f   : > { %4411 = vmatprep.subr.bf16.mxu1 %v6010_v9 }
 0x211   : > { %v4285_v6 = vpop.f32.mrf.mxu1 }
 0x212   : > { %v6203_v33 = vsub.f32 %v6030_v13, %v4285_v6 }
 0x213   : > { %v488_v17 = vpop.f32.mrf.mxu1 }
 0x214   : > { %v6197_v29 = vsub.f32 %v5997_v4, %v488_v17 }
 0x215   : > { %v4286_v18 = vpop.f32.mrf.mxu1 }
 0x216   : > { %v6194_v23 = vsub.f32 %v6033_v14, %v4286_v18 }
 0x217   : > { %v491_v24 = vpop.f32.mrf.mxu1 }
 0x218   : > { %v6200_v30 = vsub.f32 %v6000_v5, %v491_v24  ;;  %v690_v42 = vpack.c.bf16 %v6194_v23, %v6203_v33 }
 0x219   : > { %v4289_v40 = vpop.f32.mrf.mxu1 }
 0x21a   : > { %v689_v41 = vpack.c.bf16 %v6200_v30, %v6197_v29  ;;  %v6210_v14 = vsub.f32 %v6050_v19, %v4289_v40 }
 0x21b   : > { %v504_v43 = vpop.f32.mrf.mxu1 }
 0x21c   : > { %4355 = vmatprep.mubr.bf16.mxu0 %v689_v41  ;;  %v6213_v5 = vsub.f32 %v6037_v15, %v504_v43 }
 0x21d   : > { %v4290_v4 = vpop.f32.mrf.mxu1  ;;  %4356 = vmatmul.mubr.bf16.vlgmr.msra.gmra.mxu0 %v690_v42 }
 0x21e   : > { %v6216_v13 = vsub.f32 %v6053_v20, %v4290_v4  ;;  %4388 = vmatpush3.bf16.msra.mxu0 %v5983_v0 }
 0x21f   : > { %v507_v44 = vpop.f32.mrf.mxu1  ;;  %4389 = vmatprep.subr.bf16.mxu0 %v5985_v1 }
 0x220   : > { %v6221_v45 = vsub.f32 %v6040_v16, %v507_v44  ;;  %v692_v19 = vpack.c.bf16 %v6216_v13, %v6210_v14 }
 0x222   : > { %4390 = vmatpush3.bf16.msra.mxu0 %v5985_v1  ;;  %v691_v15 = vpack.c.bf16 %v6221_v45, %v6213_v5 }
 0x223   : > { %4391 = vmatprep.subr.bf16.mxu0 %v5990_v2 }
 0x224   : > { %4359 = vmatprep.mubr.bf16.mxu0 %v691_v15 }
 0x225   : > { %4360 = vmatmul.mubr.bf16.gmra.mxu0 %v692_v19 }
 0x226   : > { %4392 = vmatpush3.bf16.msra.mxu0 %v5990_v2 }
 0x227   : > { %4393 = vmatprep.subr.bf16.mxu0 %v5994_v3 }
 0x22a   : > { %4394 = vmatpush3.bf16.msra.mxu0 %v5994_v3 }
 0x22b   : > { %4395 = vmatprep.subr.bf16.mxu0 %v6006_v7 }
 0x22e   : > { %4396 = vmatpush3.bf16.msra.mxu0 %v6006_v7 }
 0x22f   : > { %4397 = vmatprep.subr.bf16.mxu0 %v6008_v8 }
 0x231   : > { %v4333_v16 = vpop.f32.mrf.mxu1 }
 0x232   : > { %4398 = vmatpush3.bf16.msra.mxu0 %v6008_v8  ;;  %v6249_v51 = vsub.f32 %v6078_v25, %v4333_v16 }
 0x233   : > { %v650_v20 = vpop.f32.mrf.mxu1  ;;  %4399 = vmatprep.subr.bf16.mxu0 %v6021_v11 }
 0x234   : > { %v6243_v49 = vsub.f32 %v6057_v21, %v650_v20 }
 0x235   : > { %v4334_v46 = vpop.f32.mrf.mxu1 }
 0x236   : > { %4400 = vmatpush3.bf16.msra.mxu0 %v6021_v11  ;;  %v6239_v47 = vsub.f32 %v6081_v26, %v4334_v46 }
 0x237   : > { %v653_v48 = vpop.f32.mrf.mxu1  ;;  %4401 = vmatprep.subr.bf16.mxu0 %v6026_v12 }
 0x238   : > { %v6246_v50 = vsub.f32 %v6060_v22, %v653_v48  ;;  %v852_v26 = vpack.c.bf16 %v6239_v47, %v6249_v51 }
 0x239   : > { %v4337_v52 = vpop.f32.mrf.mxu1 }
 0x23a   : > { %4402 = vmatpush3.bf16.msra.mxu0 %v6026_v12  ;;  %v851_v53 = vpack.c.bf16 %v6246_v50, %v6243_v49  ;;  %v6269_v57 = vsub.f32 %v6097_v31, %v4337_v52 }
 0x23b   : > { %v666_v54 = vpop.f32.mrf.mxu1  ;;  %4435 = vmatprep.subr.bf16.mxu0 %v5983_v0 }
 0x23c   : > { %4403 = vmatprep.mubr.bf16.mxu0 %v851_v53  ;;  %v6263_v55 = vsub.f32 %v6085_v27, %v666_v54 }
 0x23d   : > { %v4338_v21 = vpop.f32.mrf.mxu1  ;;  %4404 = vmatmul.mubr.bf16.vlgmr.msra.gmra.mxu0 %v852_v26 }
 0x23e   : > { %4436 = vmatpush3.bf16.msra.mxu0 %v5983_v0  ;;  %v6259_v22 = vsub.f32 %v6100_v32, %v4338_v21 }
 0x23f   : > { %v669_v25 = vpop.f32.mrf.mxu1  ;;  %4437 = vmatprep.subr.bf16.mxu0 %v5985_v1 }
 0x240   : > { %v6266_v56 = vsub.f32 %v6088_v28, %v669_v25  ;;  %v854_v32 = vpack.c.bf16 %v6259_v22, %v6269_v57 }
 0x242   : > { %v853_v58 = vpack.c.bf16 %v6266_v56, %v6263_v55  ;;  %4438 = vmatpush3.bf16.msra.mxu0 %v5985_v1 }
 0x243   : > { %4439 = vmatprep.subr.bf16.mxu0 %v5990_v2 }
 0x244   : > { %4407 = vmatprep.mubr.bf16.mxu0 %v853_v58 }
 0x245   : > { %4408 = vmatmul.mubr.bf16.gmra.mxu0 %v854_v32 }
 0x246   : > { %4440 = vmatpush3.bf16.msra.mxu0 %v5990_v2 }
 0x247   : > { %4441 = vmatprep.subr.bf16.mxu0 %v5994_v3 }
 0x24a   : > { %4442 = vmatpush3.bf16.msra.mxu0 %v5994_v3 }
 0x24b   : > { %4443 = vmatprep.subr.bf16.mxu0 %v6006_v7 }
 0x24e   : > { %4444 = vmatpush3.bf16.msra.mxu0 %v6006_v7 }
 0x24f   : > { %4445 = vmatprep.subr.bf16.mxu0 %v6008_v8 }
 0x252   : > { %4446 = vmatpush3.bf16.msra.mxu0 %v6008_v8 }
 0x253   : > { %4447 = vmatprep.subr.bf16.mxu0 %v6021_v11 }
 0x256   : > { %4448 = vmatpush3.bf16.msra.mxu0 %v6021_v11 }
 0x257   : > { %4449 = vmatprep.subr.bf16.mxu0 %v6026_v12 }
 0x25a   : > { %4450 = vmatpush3.bf16.msra.mxu0 %v6026_v12 }
 0x25b   : > { %4483 = vmatprep.subr.bf16.mxu0 %v5983_v0 }
 0x2dd   : > { %v4357_v27 = vpop.f32.mrf.mxu0 }
 0x2df   : > { %v727_v28 = vpop.f32.mrf.mxu0 }
 0x2e0   : > { %5324 = vtanh.f32 %v727_v28 }
 0x2e1   : > { %v4358_v31 = vpop.f32.mrf.mxu0 }
 0x2e2   : > { %5326 = vtanh.f32 %v4358_v31 }
 0x2e3   : > { %5328 = vtanh.f32 %v4357_v27  ;;  %v730_v59 = vpop.f32.mrf.mxu0 }
 0x2e4   : > { %5330 = vtanh.f32 %v730_v59 }
 0x2e5   : > { %v4361_v60 = vpop.f32.mrf.mxu0 }
 0x2e7   : > { %v743_v61 = vpop.f32.mrf.mxu0 }
 0x2e8   : > { %5332 = vtanh.f32 %v743_v61 }
 0x2e9   : > { %v4362_v62 = vpop.f32.mrf.mxu0 }
 0x2ea   : > { %5334 = vtanh.f32 %v4362_v62 }
 0x2eb   : > { %5336 = vtanh.f32 %v4361_v60  ;;  %v746_v63 = vpop.f32.mrf.mxu0 }
 0x2ec   : > { %5338 = vtanh.f32 %v746_v63 }
 0x2ed   : > { %v5325_v6 = vpop.eup %5324 }
 0x2ee   : > { %v766_v41 = vsub.f32 %v6197_v29, %v5325_v6 }
 0x2ef   : > { %v5327_v17 = vpop.eup %5326 }
 0x2f0   : > { %v5329_v18 = vpop.eup %5328  ;;  %v769_v40 = vsub.f32 %v6194_v23, %v5327_v17 }
 0x2f1   : > { %v5331_v24 = vpop.eup %5330  ;;  %v768_v43 = vsub.f32 %v6203_v33, %v5329_v18 }
 0x2f2   : > { %v767_v42 = vsub.f32 %v6200_v30, %v5331_v24 }
 0x2f3   : > { %v775_v44 = vpack.c.bf16 %v769_v40, %v768_v43 }
 0x2f4   : > { %v774_v4 = vpack.c.bf16 %v767_v42, %v766_v41 }
 0x2f5   : > { %v5333_v19 = vpop.eup %5332 }
 0x2f6   : > { %4379 = vmatprep.mubr.bf16.mxu1 %v774_v4  ;;  %v770_v48 = vsub.f32 %v6213_v5, %v5333_v19 }
 0x2f7   : > { %v5335_v15 = vpop.eup %5334  ;;  %4380 = vmatmul.mubr.bf16.vlgmr.msra.gmra.mxu1 %v775_v44 }
 0x2f8   : > { %v5337_v16 = vpop.eup %5336  ;;  %4412 = vmatpush3.bf16.msra.mxu1 %v6010_v9  ;;  %v773_v46 = vsub.f32 %v6216_v13, %v5335_v15 }
 0x2f9   : > { %v5339_v20 = vpop.eup %5338  ;;  %4413 = vmatprep.subr.bf16.mxu1 %v6013_v10  ;;  %v772_v53 = vsub.f32 %v6210_v14, %v5337_v16 }
 0x2fa   : > { %v771_v52 = vsub.f32 %v6221_v45, %v5339_v20 }
 0x2fb   : > { %v777_v21 = vpack.c.bf16 %v773_v46, %v772_v53 }
 0x2fc   : > { %4414 = vmatpush3.bf16.msra.mxu1 %v6013_v10  ;;  %v776_v26 = vpack.c.bf16 %v771_v52, %v770_v48 }
 0x2fd   : > { %v4405_v54 = vpop.f32.mrf.mxu0  ;;  %4415 = vmatprep.subr.bf16.mxu1 %v6120_v34 }
 0x2fe   : > { %4383 = vmatprep.mubr.bf16.mxu1 %v776_v26 }
 0x2ff   : > { %4384 = vmatmul.mubr.bf16.gmra.mxu1 %v777_v21  ;;  %v889_v25 = vpop.f32.mrf.mxu0 }
 0x300   : > { %4416 = vmatpush3.bf16.msra.mxu1 %v6120_v34  ;;  %5340 = vtanh.f32 %v889_v25 }
 0x301   : > { %v4406_v58 = vpop.f32.mrf.mxu0  ;;  %4417 = vmatprep.subr.bf16.mxu1 %v6124_v35 }
 0x302   : > { %5342 = vtanh.f32 %v4406_v58 }
 0x303   : > { %5344 = vtanh.f32 %v4405_v54  ;;  %v892_v32 = vpop.f32.mrf.mxu0 }
 0x304   : > { %5346 = vtanh.f32 %v892_v32  ;;  %4418 = vmatpush3.bf16.msra.mxu1 %v6124_v35 }
 0x305   : > { %v4409_v27 = vpop.f32.mrf.mxu0  ;;  %4419 = vmatprep.subr.bf16.mxu1 %v6128_v36 }
 0x307   : > { %v905_v28 = vpop.f32.mrf.mxu0 }
 0x308   : > { %4420 = vmatpush3.bf16.msra.mxu1 %v6128_v36  ;;  %5348 = vtanh.f32 %v905_v28 }
 0x309   : > { %v4410_v31 = vpop.f32.mrf.mxu0  ;;  %4421 = vmatprep.subr.bf16.mxu1 %v6132_v37 }
 0x30a   : > { %5350 = vtanh.f32 %v4410_v31 }
 0x30b   : > { %5352 = vtanh.f32 %v4409_v27  ;;  %v908_v59 = vpop.f32.mrf.mxu0 }
 0x30c   : > { %5354 = vtanh.f32 %v908_v59  ;;  %4422 = vmatpush3.bf16.msra.mxu1 %v6132_v37 }
 0x30d   : > { %4423 = vmatprep.subr.bf16.mxu1 %v6136_v38  ;;  %v5341_v60 = vpop.eup %5340 }
 0x30e   : > { %v928_v17 = vsub.f32 %v6243_v49, %v5341_v60 }
 0x30f   : > { %v5343_v61 = vpop.eup %5342 }
 0x310   : > { %v5345_v62 = vpop.eup %5344  ;;  %4424 = vmatpush3.bf16.msra.mxu1 %v6136_v38  ;;  %v931_v6 = vsub.f32 %v6239_v47, %v5343_v61 }
 0x311   : > { %v5347_v63 = vpop.eup %5346  ;;  %4425 = vmatprep.subr.bf16.mxu1 %v6138_v39  ;;  %v930_v24 = vsub.f32 %v6249_v51, %v5345_v62 }
 0x312   : > { %v929_v18 = vsub.f32 %v6246_v50, %v5347_v63 }
 0x313   : > { %v937_v41 = vpack.c.bf16 %v931_v6, %v930_v24 }
 0x314   : > { %4426 = vmatpush3.bf16.msra.mxu1 %v6138_v39  ;;  %v936_v40 = vpack.c.bf16 %v929_v18, %v928_v17 }
 0x315   : > { %4459 = vmatprep.subr.bf16.mxu1 %v6010_v9  ;;  %v5349_v42 = vpop.eup %5348 }
 0x316   : > { %4427 = vmatprep.mubr.bf16.mxu1 %v936_v40  ;;  %v932_v15 = vsub.f32 %v6263_v55, %v5349_v42 }
 0x317   : > { %v5351_v43 = vpop.eup %5350  ;;  %4428 = vmatmul.mubr.bf16.vlgmr.msra.gmra.mxu1 %v937_v41 }
 0x318   : > { %v5353_v4 = vpop.eup %5352  ;;  %4460 = vmatpush3.bf16.msra.mxu1 %v6010_v9  ;;  %v935_v19 = vsub.f32 %v6259_v22, %v5351_v43 }
 0x319   : > { %v5355_v44 = vpop.eup %5354  ;;  %4461 = vmatprep.subr.bf16.mxu1 %v6013_v10  ;;  %v934_v20 = vsub.f32 %v6269_v57, %v5353_v4 }
 0x31a   : > { %v933_v16 = vsub.f32 %v6266_v56, %v5355_v44 }
 0x31b   : > { %v939_v48 = vpack.c.bf16 %v935_v19, %v934_v20 }
 0x31c   : > { %v938_v46 = vpack.c.bf16 %v933_v16, %v932_v15  ;;  %4462 = vmatpush3.bf16.msra.mxu1 %v6013_v10 }
 0x31d   : > { %4463 = vmatprep.subr.bf16.mxu1 %v6120_v34 }
 0x31e   : > { %4431 = vmatprep.mubr.bf16.mxu1 %v938_v46 }
 0x31f   : > { %4432 = vmatmul.mubr.bf16.gmra.mxu1 %v939_v48 }
 0x320   : > { %4464 = vmatpush3.bf16.msra.mxu1 %v6120_v34 }
 0x321   : > { %4465 = vmatprep.subr.bf16.mxu1 %v6124_v35 }
 0x324   : > { %4466 = vmatpush3.bf16.msra.mxu1 %v6124_v35 }
 0x325   : > { %4467 = vmatprep.subr.bf16.mxu1 %v6128_v36 }
 0x328   : > { %4468 = vmatpush3.bf16.msra.mxu1 %v6128_v36 }
 0x329   : > { %4469 = vmatprep.subr.bf16.mxu1 %v6132_v37 }
 0x32c   : > { %4470 = vmatpush3.bf16.msra.mxu1 %v6132_v37 }
 0x32d   : > { %4471 = vmatprep.subr.bf16.mxu1 %v6136_v38 }
 0x330   : > { %4472 = vmatpush3.bf16.msra.mxu1 %v6136_v38 }
 0x331   : > { %4473 = vmatprep.subr.bf16.mxu1 %v6138_v39 }
 0x334   : > { %4474 = vmatpush3.bf16.msra.mxu1 %v6138_v39 }
 0x335   : > { %4507 = vmatprep.subr.bf16.mxu1 %v6010_v9 }
 0x3b7   : > { %v4381_v10 = vpop.f32.mrf.mxu1 }
 0x3b8   : > { %v6347_v58 = vsub.f32 %v6203_v33, %v4381_v10 }
 0x3b9   : > { %v812_v52 = vpop.f32.mrf.mxu1 }
 0x3ba   : > { %v6341_v21 = vsub.f32 %v6197_v29, %v812_v52 }
 0x3bb   : > { %v4382_v53 = vpop.f32.mrf.mxu1 }
 0x3bc   : > { %v6338_v26 = vsub.f32 %v6194_v23, %v4382_v53 }
 0x3bd   : > { %v815_v54 = vpop.f32.mrf.mxu1 }
 0x3be   : > { %v6344_v25 = vsub.f32 %v6200_v30, %v815_v54  ;;  %v1014_v27 = vpack.c.bf16 %v6338_v26, %v6347_v58 }
 0x3bf   : > { %v4385_v32 = vpop.f32.mrf.mxu1 }
 0x3c0   : > { %v1013_v9 = vpack.c.bf16 %v6344_v25, %v6341_v21  ;;  %v6365_v59 = vsub.f32 %v6210_v14, %v4385_v32  ;;  %v6439_v32 = vld [vmem:[#allocation7 + $0x38] sm:$0xff]  }
 0x3c1   : > { %v828_v28 = vpop.f32.mrf.mxu1 }
 0x3c2   : > { %4451 = vmatprep.mubr.bf16.mxu0 %v1013_v9  ;;  %v6359_v33 = vsub.f32 %v6213_v5, %v828_v28 }
 0x3c3   : > { %v4386_v23 = vpop.f32.mrf.mxu1  ;;  %4452 = vmatmul.mubr.bf16.vlgmr.msra.gmra.mxu0 %v1014_v27  ;;  %v6442_v27 = vld [vmem:[#allocation7 + $0x30] sm:$0xff]  }
 0x3c4   : > { %4484 = vmatpush3.bf16.msra.mxu0 %v5983_v0  ;;  %v6355_v29 = vsub.f32 %v6216_v13, %v4386_v23 }
 0x3c5   : > { %v831_v30 = vpop.f32.mrf.mxu1  ;;  %4485 = vmatprep.subr.bf16.mxu0 %v5985_v1 }
 0x3c6   : > { %v6362_v31 = vsub.f32 %v6221_v45, %v831_v30  ;;  %v1016_v13 = vpack.c.bf16 %v6355_v29, %v6365_v59 }
 0x3c8   : > { %4486 = vmatpush3.bf16.msra.mxu0 %v5985_v1  ;;  %v1015_v60 = vpack.c.bf16 %v6362_v31, %v6359_v33 }
 0x3c9   : > { %4487 = vmatprep.subr.bf16.mxu0 %v5990_v2 }
 0x3ca   : > { %4455 = vmatprep.mubr.bf16.mxu0 %v1015_v60 }
 0x3cb   : > { %4456 = vmatmul.mubr.bf16.gmra.mxu0 %v1016_v13 }
 0x3cc   : > { %4488 = vmatpush3.bf16.msra.mxu0 %v5990_v2 }
 0x3cd   : > { %4489 = vmatprep.subr.bf16.mxu0 %v5994_v3 }
 0x3d0   : > { %4490 = vmatpush3.bf16.msra.mxu0 %v5994_v3 }
 0x3d1   : > { %4491 = vmatprep.subr.bf16.mxu0 %v6006_v7 }
 0x3d4   : > { %4492 = vmatpush3.bf16.msra.mxu0 %v6006_v7 }
 0x3d5   : > { %4493 = vmatprep.subr.bf16.mxu0 %v6008_v8 }
 0x3d7   : > { %v4429_v14 = vpop.f32.mrf.mxu1 }
 0x3d8   : > { %4494 = vmatpush3.bf16.msra.mxu0 %v6008_v8  ;;  %v6393_v17 = vsub.f32 %v6249_v51, %v4429_v14 }
 0x3d9   : > { %v974_v5 = vpop.f32.mrf.mxu1  ;;  %4495 = vmatprep.subr.bf16.mxu0 %v6021_v11 }
 0x3da   : > { %v6387_v63 = vsub.f32 %v6243_v49, %v974_v5 }
 0x3db   : > { %v4430_v45 = vpop.f32.mrf.mxu1 }
 0x3dc   : > { %4496 = vmatpush3.bf16.msra.mxu0 %v6021_v11  ;;  %v6383_v61 = vsub.f32 %v6239_v47, %v4430_v45 }
 0x3dd   : > { %v977_v62 = vpop.f32.mrf.mxu1  ;;  %4497 = vmatprep.subr.bf16.mxu0 %v6026_v12 }
 0x3de   : > { %v6390_v6 = vsub.f32 %v6246_v50, %v977_v62  ;;  %v1176_v47 = vpack.c.bf16 %v6383_v61, %v6393_v17 }
 0x3df   : > { %v4433_v18 = vpop.f32.mrf.mxu1 }
 0x3e0   : > { %4498 = vmatpush3.bf16.msra.mxu0 %v6026_v12  ;;  %v1175_v24 = vpack.c.bf16 %v6390_v6, %v6387_v63  ;;  %v6413_v43 = vsub.f32 %v6269_v57, %v4433_v18 }
 0x3e1   : > { %v990_v40 = vpop.f32.mrf.mxu1  ;;  %4531 = vmatprep.subr.bf16.mxu0 %v5983_v0 }
 0x3e2   : > { %4499 = vmatprep.mubr.bf16.mxu0 %v1175_v24  ;;  %v6407_v41 = vsub.f32 %v6263_v55, %v990_v40 }
 0x3e3   : > { %v4434_v49 = vpop.f32.mrf.mxu1  ;;  %4500 = vmatmul.mubr.bf16.vlgmr.msra.gmra.mxu0 %v1176_v47 }
 0x3e4   : > { %4532 = vmatpush3.bf16.msra.mxu0 %v5983_v0  ;;  %v6403_v50 = vsub.f32 %v6259_v22, %v4434_v49 }
 0x3e5   : > { %v993_v51 = vpop.f32.mrf.mxu1  ;;  %4533 = vmatprep.subr.bf16.mxu0 %v5985_v1 }
 0x3e6   : > { %v6410_v42 = vsub.f32 %v6266_v56, %v993_v51  ;;  %v1178_v0 = vpack.c.bf16 %v6403_v50, %v6413_v43 }
 0x3e8   : > { %v1177_v4 = vpack.c.bf16 %v6410_v42, %v6407_v41  ;;  %4534 = vmatpush3.bf16.msra.mxu0 %v5985_v1  ;;  %v6432_v1 = vld [vmem:[#allocation5 + $0x38] sm:$0xff]  }
 0x3e9   : > { %4535 = vmatprep.subr.bf16.mxu0 %v5990_v2 }
 0x3ea   : > { %4503 = vmatprep.mubr.bf16.mxu0 %v1177_v4 }
 0x3eb   : > { %4504 = vmatmul.mubr.bf16.gmra.mxu0 %v1178_v0 }
 0x3ec   : > { %4536 = vmatpush3.bf16.msra.mxu0 %v5990_v2 }
 0x3ed   : > { %4537 = vmatprep.subr.bf16.mxu0 %v5994_v3 }
 0x3f0   : > { %4538 = vmatpush3.bf16.msra.mxu0 %v5994_v3 }
 0x3f1   : > { %4539 = vmatprep.subr.bf16.mxu0 %v6006_v7 }
 0x3f4   : > { %4540 = vmatpush3.bf16.msra.mxu0 %v6006_v7 }
 0x3f5   : > { %4541 = vmatprep.subr.bf16.mxu0 %v6008_v8 }
 0x3f8   : > { %4542 = vmatpush3.bf16.msra.mxu0 %v6008_v8 }
 0x3f9   : > { %4543 = vmatprep.subr.bf16.mxu0 %v6021_v11 }
 0x3fc   : > { %4544 = vmatpush3.bf16.msra.mxu0 %v6021_v11 }
 0x3fd   : > { %4545 = vmatprep.subr.bf16.mxu0 %v6026_v12 }
 0x400   : > { %4546 = vmatpush3.bf16.msra.mxu0 %v6026_v12 }
 0x401   : > { %4579 = vmatprep.subr.bf16.mxu0 %v6432_v1 }
 0x483   : > { %v4453_v2 = vpop.f32.mrf.mxu0 }
 0x485   : > { %v1051_v3 = vpop.f32.mrf.mxu0 }
 0x486   : > { %5356 = vtanh.f32 %v1051_v3 }
 0x487   : > { %v4454_v7 = vpop.f32.mrf.mxu0 }
 0x488   : > { %5358 = vtanh.f32 %v4454_v7 }
 0x489   : > { %5360 = vtanh.f32 %v4453_v2  ;;  %v1054_v22 = vpop.f32.mrf.mxu0 }
 0x48a   : > { %5362 = vtanh.f32 %v1054_v22 }
 0x48b   : > { %v4457_v8 = vpop.f32.mrf.mxu0 }
 0x48d   : > { %v1067_v55 = vpop.f32.mrf.mxu0 }
 0x48e   : > { %5364 = vtanh.f32 %v1067_v55 }
 0x48f   : > { %v4458_v11 = vpop.f32.mrf.mxu0 }
 0x490   : > { %5366 = vtanh.f32 %v4458_v11 }
 0x491   : > { %5368 = vtanh.f32 %v4457_v8  ;;  %v1070_v56 = vpop.f32.mrf.mxu0 }
 0x492   : > { %5370 = vtanh.f32 %v1070_v56 }
 0x493   : > { %v5357_v12 = vpop.eup %5356 }
 0x494   : > { %v1090_v16 = vsub.f32 %v6341_v21, %v5357_v12 }
 0x495   : > { %v5359_v57 = vpop.eup %5358 }
 0x496   : > { %v5361_v44 = vpop.eup %5360  ;;  %v1093_v15 = vsub.f32 %v6338_v26, %v5359_v57 }
 0x497   : > { %v5363_v19 = vpop.eup %5362  ;;  %v1092_v46 = vsub.f32 %v6347_v58, %v5361_v44 }
 0x498   : > { %v1091_v20 = vsub.f32 %v6344_v25, %v5363_v19 }
 0x499   : > { %v1099_v10 = vpack.c.bf16 %v1093_v15, %v1092_v46 }
 0x49a   : > { %v1098_v48 = vpack.c.bf16 %v1091_v20, %v1090_v16 }
 0x49b   : > { %v5365_v52 = vpop.eup %5364 }
 0x49c   : > { %4475 = vmatprep.mubr.bf16.mxu1 %v1098_v48  ;;  %v1094_v23 = vsub.f32 %v6359_v33, %v5365_v52 }
 0x49d   : > { %v5367_v53 = vpop.eup %5366  ;;  %4476 = vmatmul.mubr.bf16.vlgmr.msra.gmra.mxu1 %v1099_v10 }
 0x49e   : > { %v5369_v54 = vpop.eup %5368  ;;  %4508 = vmatpush3.bf16.msra.mxu1 %v6439_v32  ;;  %v1097_v28 = vsub.f32 %v6355_v29, %v5367_v53 }
 0x49f   : > { %v5371_v9 = vpop.eup %5370  ;;  %4509 = vmatprep.subr.bf16.mxu1 %v6442_v27  ;;  %v1096_v60 = vsub.f32 %v6365_v59, %v5369_v54 }
 0x4a0   : > { %v1095_v30 = vsub.f32 %v6362_v31, %v5371_v9 }
 0x4a1   : > { %v1101_v5 = vpack.c.bf16 %v1097_v28, %v1096_v60 }
 0x4a2   : > { %4510 = vmatpush3.bf16.msra.mxu1 %v6442_v27  ;;  %v1100_v13 = vpack.c.bf16 %v1095_v30, %v1094_v23  ;;  %v6507_v23 = vld [vmem:[#allocation5 + $0x30] sm:$0xff]  }
 0x4a3   : > { %v4501_v14 = vpop.f32.mrf.mxu0  ;;  %4511 = vmatprep.subr.bf16.mxu1 %v6120_v34 }
 0x4a4   : > { %4479 = vmatprep.mubr.bf16.mxu1 %v1100_v13 }
 0x4a5   : > { %4480 = vmatmul.mubr.bf16.gmra.mxu1 %v1101_v5  ;;  %v1213_v45 = vpop.f32.mrf.mxu0 }
 0x4a6   : > { %4512 = vmatpush3.bf16.msra.mxu1 %v6120_v34  ;;  %5372 = vtanh.f32 %v1213_v45 }
 0x4a7   : > { %v4502_v62 = vpop.f32.mrf.mxu0  ;;  %4513 = vmatprep.subr.bf16.mxu1 %v6124_v35 }
 0x4a8   : > { %5374 = vtanh.f32 %v4502_v62  ;;  %v6540_v62 = vld [vmem:[#allocation5 + $0x8] sm:$0xff]  }
 0x4a9   : > { %5376 = vtanh.f32 %v4501_v14  ;;  %v1216_v18 = vpop.f32.mrf.mxu0  ;;  %v6524_v14 = vld [vmem:[#allocation5 + $0x28] sm:$0xff]  }
 0x4aa   : > { %5378 = vtanh.f32 %v1216_v18  ;;  %4514 = vmatpush3.bf16.msra.mxu1 %v6124_v35 }
 0x4ab   : > { %v4505_v24 = vpop.f32.mrf.mxu0  ;;  %4515 = vmatprep.subr.bf16.mxu1 %v6128_v36 }
 0x4ad   : > { %v1229_v47 = vpop.f32.mrf.mxu0 }
 0x4ae   : > { %4516 = vmatpush3.bf16.msra.mxu1 %v6128_v36  ;;  %5380 = vtanh.f32 %v1229_v47 }
 0x4af   : > { %v4506_v40 = vpop.f32.mrf.mxu0  ;;  %4517 = vmatprep.subr.bf16.mxu1 %v6132_v37 }
 0x4b0   : > { %5382 = vtanh.f32 %v4506_v40  ;;  %v6547_v40 = vld [vmem:[#allocation5] sm:$0xff]  }
 0x4b1   : > { %5384 = vtanh.f32 %v4505_v24  ;;  %v1232_v49 = vpop.f32.mrf.mxu0 }
 0x4b2   : > { %5386 = vtanh.f32 %v1232_v49  ;;  %4518 = vmatpush3.bf16.msra.mxu1 %v6132_v37 }
 0x4b3   : > { %4519 = vmatprep.subr.bf16.mxu1 %v6136_v38  ;;  %v5373_v51 = vpop.eup %5372 }
 0x4b4   : > { %v1252_v7 = vsub.f32 %v6387_v63, %v5373_v51 }
 0x4b5   : > { %v5375_v4 = vpop.eup %5374 }
 0x4b6   : > { %v5377_v0 = vpop.eup %5376  ;;  %4520 = vmatpush3.bf16.msra.mxu1 %v6136_v38  ;;  %v1255_v3 = vsub.f32 %v6383_v61, %v5375_v4 }
 0x4b7   : > { %v5379_v2 = vpop.eup %5378  ;;  %4521 = vmatprep.subr.bf16.mxu1 %v6138_v39  ;;  %v1254_v8 = vsub.f32 %v6393_v17, %v5377_v0 }
 0x4b8   : > { %v1253_v22 = vsub.f32 %v6390_v6, %v5379_v2 }
 0x4b9   : > { %v1261_v11 = vpack.c.bf16 %v1255_v3, %v1254_v8 }
 0x4ba   : > { %4522 = vmatpush3.bf16.msra.mxu1 %v6138_v39  ;;  %v1260_v55 = vpack.c.bf16 %v1253_v22, %v1252_v7 }
 0x4bb   : > { %4555 = vmatprep.subr.bf16.mxu1 %v6439_v32  ;;  %v5381_v56 = vpop.eup %5380 }
 0x4bc   : > { %4523 = vmatprep.mubr.bf16.mxu1 %v1260_v55  ;;  %v1256_v15 = vsub.f32 %v6407_v41, %v5381_v56 }
 0x4bd   : > { %v5383_v12 = vpop.eup %5382  ;;  %4524 = vmatmul.mubr.bf16.vlgmr.msra.gmra.mxu1 %v1261_v11 }
 0x4be   : > { %v5385_v57 = vpop.eup %5384  ;;  %4556 = vmatpush3.bf16.msra.mxu1 %v6439_v32  ;;  %v1259_v19 = vsub.f32 %v6403_v50, %v5383_v12 }
 0x4bf   : > { %v5387_v44 = vpop.eup %5386  ;;  %4557 = vmatprep.subr.bf16.mxu1 %v6442_v27  ;;  %v1258_v20 = vsub.f32 %v6413_v43, %v5385_v57 }
 0x4c0   : > { %v1257_v16 = vsub.f32 %v6410_v42, %v5387_v44 }
 0x4c1   : > { %v1263_v48 = vpack.c.bf16 %v1259_v19, %v1258_v20 }
 0x4c2   : > { %v1262_v46 = vpack.c.bf16 %v1257_v16, %v1256_v15  ;;  %4558 = vmatpush3.bf16.msra.mxu1 %v6442_v27 }
 0x4c3   : > { %4559 = vmatprep.subr.bf16.mxu1 %v6120_v34 }
 0x4c4   : > { %4527 = vmatprep.mubr.bf16.mxu1 %v1262_v46 }
 0x4c5   : > { %4528 = vmatmul.mubr.bf16.gmra.mxu1 %v1263_v48 }
 0x4c6   : > { %4560 = vmatpush3.bf16.msra.mxu1 %v6120_v34 }
 0x4c7   : > { %4561 = vmatprep.subr.bf16.mxu1 %v6124_v35 }
 0x4ca   : > { %4562 = vmatpush3.bf16.msra.mxu1 %v6124_v35 }
 0x4cb   : > { %4563 = vmatprep.subr.bf16.mxu1 %v6128_v36 }
 0x4ce   : > { %4564 = vmatpush3.bf16.msra.mxu1 %v6128_v36 }
 0x4cf   : > { %4565 = vmatprep.subr.bf16.mxu1 %v6132_v37 }
 0x4d2   : > { %4566 = vmatpush3.bf16.msra.mxu1 %v6132_v37 }
 0x4d3   : > { %4567 = vmatprep.subr.bf16.mxu1 %v6136_v38 }
 0x4d6   : > { %4568 = vmatpush3.bf16.msra.mxu1 %v6136_v38 }
 0x4d7   : > { %4569 = vmatprep.subr.bf16.mxu1 %v6138_v39 }
 0x4da   : > { %4570 = vmatpush3.bf16.msra.mxu1 %v6138_v39 }
 0x4db   : > { %4603 = vmatprep.subr.bf16.mxu1 %v6439_v32 }
 0x55d   : > { %v4477_v34 = vpop.f32.mrf.mxu1 }
 0x55e   : > { %v6497_v38 = vsub.f32 %v6347_v58, %v4477_v34 }
 0x55f   : > { %v1136_v35 = vpop.f32.mrf.mxu1 }
 0x560   : > { %v6491_v53 = vsub.f32 %v6341_v21, %v1136_v35 }
 0x561   : > { %v4478_v10 = vpop.f32.mrf.mxu1 }
 0x562   : > { %v6488_v52 = vsub.f32 %v6338_v26, %v4478_v10 }
 0x563   : > { %v1139_v36 = vpop.f32.mrf.mxu1 }
 0x564   : > { %v6494_v37 = vsub.f32 %v6344_v25, %v1139_v36  ;;  %v1338_v9 = vpack.c.bf16 %v6488_v52, %v6497_v38 }
 0x565   : > { %v4481_v54 = vpop.f32.mrf.mxu1 }
 0x566   : > { %v1337_v39 = vpack.c.bf16 %v6494_v37, %v6491_v53  ;;  %v6517_v60 = vsub.f32 %v6365_v59, %v4481_v54  ;;  %v6536_v59 = vld [vmem:[#allocation5 + $0x10] sm:$0xff]  }
 0x567   : > { %v1152_v28 = vpop.f32.mrf.mxu1 }
 0x568   : > { %4547 = vmatprep.mubr.bf16.mxu0 %v1337_v39  ;;  %v6511_v58 = vsub.f32 %v6359_v33, %v1152_v28  ;;  %v6528_v33 = vld [vmem:[#allocation5 + $0x20] sm:$0xff]  }
 0x569   : > { %v4482_v26 = vpop.f32.mrf.mxu1  ;;  %4548 = vmatmul.mubr.bf16.vlgmr.msra.gmra.mxu0 %v1338_v9 }
 0x56a   : > { %4580 = vmatpush3.bf16.msra.mxu0 %v6432_v1  ;;  %v6505_v21 = vsub.f32 %v6355_v29, %v4482_v26 }
 0x56b   : > { %v1155_v25 = vpop.f32.mrf.mxu1  ;;  %4581 = vmatprep.subr.bf16.mxu0 %v6507_v23 }
 0x56c   : > { %v6514_v30 = vsub.f32 %v6362_v31, %v1155_v25  ;;  %v1340_v13 = vpack.c.bf16 %v6505_v21, %v6517_v60  ;;  %v6532_v31 = vld [vmem:[#allocation5 + $0x18] sm:$0xff]  }
 0x56e   : > { %4582 = vmatpush3.bf16.msra.mxu0 %v6507_v23  ;;  %v1339_v29 = vpack.c.bf16 %v6514_v30, %v6511_v58 }
 0x56f   : > { %4583 = vmatprep.subr.bf16.mxu0 %v6524_v14 }
 0x570   : > { %4551 = vmatprep.mubr.bf16.mxu0 %v1339_v29 }
 0x571   : > { %4552 = vmatmul.mubr.bf16.gmra.mxu0 %v1340_v13 }
 0x572   : > { %4584 = vmatpush3.bf16.msra.mxu0 %v6524_v14 }
 0x573   : > { %4585 = vmatprep.subr.bf16.mxu0 %v6528_v33 }
 0x576   : > { %4586 = vmatpush3.bf16.msra.mxu0 %v6528_v33 }
 0x577   : > { %4587 = vmatprep.subr.bf16.mxu0 %v6532_v31 }
 0x57a   : > { %4588 = vmatpush3.bf16.msra.mxu0 %v6532_v31 }
 0x57b   : > { %4589 = vmatprep.subr.bf16.mxu0 %v6536_v59 }
 0x57d   : > { %v4525_v5 = vpop.f32.mrf.mxu1 }
 0x57e   : > { %4590 = vmatpush3.bf16.msra.mxu0 %v6536_v59  ;;  %v6557_v4 = vsub.f32 %v6393_v17, %v4525_v5 }
 0x57f   : > { %v1298_v45 = vpop.f32.mrf.mxu1  ;;  %4591 = vmatprep.subr.bf16.mxu0 %v6540_v62 }
 0x580   : > { %v6551_v49 = vsub.f32 %v6387_v63, %v1298_v45 }
 0x581   : > { %v4526_v18 = vpop.f32.mrf.mxu1 }
 0x582   : > { %4592 = vmatpush3.bf16.msra.mxu0 %v6540_v62  ;;  %v6545_v24 = vsub.f32 %v6383_v61, %v4526_v18 }
 0x583   : > { %v1301_v47 = vpop.f32.mrf.mxu1  ;;  %4593 = vmatprep.subr.bf16.mxu0 %v6547_v40 }
 0x584   : > { %v6554_v51 = vsub.f32 %v6390_v6, %v1301_v47  ;;  %v1500_v2 = vpack.c.bf16 %v6545_v24, %v6557_v4  ;;  %v6608_v47 = vld [vmem:[#allocation7 + $0x28] sm:$0xff]  }
 0x585   : > { %v4529_v0 = vpop.f32.mrf.mxu1 }
 0x586   : > { %4594 = vmatpush3.bf16.msra.mxu0 %v6547_v40  ;;  %v1499_v61 = vpack.c.bf16 %v6554_v51, %v6551_v49  ;;  %v6577_v8 = vsub.f32 %v6413_v43, %v4529_v0 }
 0x587   : > { %v1314_v3 = vpop.f32.mrf.mxu1  ;;  %4627 = vmatprep.subr.bf16.mxu0 %v6432_v1 }
 0x588   : > { %4595 = vmatprep.mubr.bf16.mxu0 %v1499_v61  ;;  %v6571_v7 = vsub.f32 %v6407_v41, %v1314_v3 }
 0x589   : > { %v4530_v63 = vpop.f32.mrf.mxu1  ;;  %4596 = vmatmul.mubr.bf16.vlgmr.msra.gmra.mxu0 %v1500_v2  ;;  %v6612_v2 = vld [vmem:[#allocation7 + $0x20] sm:$0xff]  }
 0x58a   : > { %4628 = vmatpush3.bf16.msra.mxu0 %v6432_v1  ;;  %v6567_v6 = vsub.f32 %v6403_v50, %v4530_v63 }
 0x58b   : > { %v1317_v17 = vpop.f32.mrf.mxu1  ;;  %4629 = vmatprep.subr.bf16.mxu0 %v6507_v23 }
 0x58c   : > { %v6574_v22 = vsub.f32 %v6410_v42, %v1317_v17  ;;  %v1502_v50 = vpack.c.bf16 %v6567_v6, %v6577_v8  ;;  %v6616_v17 = vld [vmem:[#allocation7 + $0x18] sm:$0xff]  }
 0x58e   : > { %v1501_v55 = vpack.c.bf16 %v6574_v22, %v6571_v7  ;;  %4630 = vmatpush3.bf16.msra.mxu0 %v6507_v23 }
 0x58f   : > { %4631 = vmatprep.subr.bf16.mxu0 %v6524_v14 }
 0x590   : > { %4599 = vmatprep.mubr.bf16.mxu0 %v1501_v55 }
 0x591   : > { %4600 = vmatmul.mubr.bf16.gmra.mxu0 %v1502_v50 }
 0x592   : > { %4632 = vmatpush3.bf16.msra.mxu0 %v6524_v14 }
 0x593   : > { %4633 = vmatprep.subr.bf16.mxu0 %v6528_v33 }
 0x596   : > { %4634 = vmatpush3.bf16.msra.mxu0 %v6528_v33 }
 0x597   : > { %4635 = vmatprep.subr.bf16.mxu0 %v6532_v31 }
 0x59a   : > { %4636 = vmatpush3.bf16.msra.mxu0 %v6532_v31 }
 0x59b   : > { %4637 = vmatprep.subr.bf16.mxu0 %v6536_v59 }
 0x59e   : > { %4638 = vmatpush3.bf16.msra.mxu0 %v6536_v59 }
 0x59f   : > { %4639 = vmatprep.subr.bf16.mxu0 %v6540_v62 }
 0x5a2   : > { %4640 = vmatpush3.bf16.msra.mxu0 %v6540_v62 }
 0x5a3   : > { %4641 = vmatprep.subr.bf16.mxu0 %v6547_v40 }
 0x5a6   : > { %4642 = vmatpush3.bf16.msra.mxu0 %v6547_v40 }
 0x5a7   : > { %4675 = vmatprep.subr.bf16.mxu0 %v6432_v1 }
 0x629   : > { %v4549_v41 = vpop.f32.mrf.mxu0 }
 0x62b   : > { %v1375_v42 = vpop.f32.mrf.mxu0 }
 0x62c   : > { %5388 = vtanh.f32 %v1375_v42 }
 0x62d   : > { %v4550_v43 = vpop.f32.mrf.mxu0 }
 0x62e   : > { %5390 = vtanh.f32 %v4550_v43  ;;  %v6624_v43 = vld [vmem:[#allocation7 + $0x8] sm:$0xff]  }
 0x62f   : > { %5392 = vtanh.f32 %v4549_v41  ;;  %v1378_v11 = vpop.f32.mrf.mxu0  ;;  %v6620_v41 = vld [vmem:[#allocation7 + $0x10] sm:$0xff]  }
 0x630   : > { %5394 = vtanh.f32 %v1378_v11 }
 0x631   : > { %v4553_v56 = vpop.f32.mrf.mxu0 }
 0x633   : > { %v1391_v12 = vpop.f32.mrf.mxu0 }
 0x634   : > { %5396 = vtanh.f32 %v1391_v12 }
 0x635   : > { %v4554_v57 = vpop.f32.mrf.mxu0 }
 0x636   : > { %5398 = vtanh.f32 %v4554_v57 }
 0x637   : > { %5400 = vtanh.f32 %v4553_v56  ;;  %v1394_v44 = vpop.f32.mrf.mxu0 }
 0x638   : > { %5402 = vtanh.f32 %v1394_v44  ;;  %v6628_v44 = vld [vmem:[#allocation7] sm:$0xff]  }
 0x639   : > { %v5389_v19 = vpop.eup %5388 }
 0x63a   : > { %v1414_v48 = vsub.f32 %v6491_v53, %v5389_v19 }
 0x63b   : > { %v5391_v15 = vpop.eup %5390 }
 0x63c   : > { %v5393_v16 = vpop.eup %5392  ;;  %v1417_v46 = vsub.f32 %v6488_v52, %v5391_v15 }
 0x63d   : > { %v5395_v20 = vpop.eup %5394  ;;  %v1416_v35 = vsub.f32 %v6497_v38, %v5393_v16 }
 0x63e   : > { %v1415_v34 = vsub.f32 %v6494_v37, %v5395_v20 }
 0x63f   : > { %v1423_v36 = vpack.c.bf16 %v1417_v46, %v1416_v35 }
 0x640   : > { %v1422_v10 = vpack.c.bf16 %v1415_v34, %v1414_v48 }
 0x641   : > { %v5397_v54 = vpop.eup %5396 }
 0x642   : > { %4571 = vmatprep.mubr.bf16.mxu1 %v1422_v10  ;;  %v1418_v25 = vsub.f32 %v6511_v58, %v5397_v54 }
 0x643   : > { %v5399_v39 = vpop.eup %5398  ;;  %4572 = vmatmul.mubr.bf16.vlgmr.msra.gmra.mxu1 %v1423_v36 }
 0x644   : > { %v5401_v9 = vpop.eup %5400  ;;  %4604 = vmatpush3.bf16.msra.mxu1 %v6439_v32  ;;  %v1421_v26 = vsub.f32 %v6505_v21, %v5399_v39 }
 0x645   : > { %v5403_v28 = vpop.eup %5402  ;;  %4605 = vmatprep.subr.bf16.mxu1 %v6442_v27  ;;  %v1420_v13 = vsub.f32 %v6517_v60, %v5401_v9 }
 0x646   : > { %v1419_v29 = vsub.f32 %v6514_v30, %v5403_v28 }
 0x647   : > { %v1425_v18 = vpack.c.bf16 %v1421_v26, %v1420_v13 }
 0x648   : > { %4606 = vmatpush3.bf16.msra.mxu1 %v6442_v27  ;;  %v1424_v5 = vpack.c.bf16 %v1419_v29, %v1418_v25 }
 0x649   : > { %v4597_v45 = vpop.f32.mrf.mxu0  ;;  %4607 = vmatprep.subr.bf16.mxu1 %v6608_v47 }
 0x64a   : > { %4575 = vmatprep.mubr.bf16.mxu1 %v1424_v5 }
 0x64b   : > { %4576 = vmatmul.mubr.bf16.gmra.mxu1 %v1425_v18  ;;  %v1537_v0 = vpop.f32.mrf.mxu0 }
 0x64c   : > { %4608 = vmatpush3.bf16.msra.mxu1 %v6608_v47  ;;  %5404 = vtanh.f32 %v1537_v0 }
 0x64d   : > { %v4598_v61 = vpop.f32.mrf.mxu0  ;;  %4609 = vmatprep.subr.bf16.mxu1 %v6612_v2 }
 0x64e   : > { %5406 = vtanh.f32 %v4598_v61 }
 0x64f   : > { %5408 = vtanh.f32 %v4597_v45  ;;  %v1540_v3 = vpop.f32.mrf.mxu0 }
 0x650   : > { %5410 = vtanh.f32 %v1540_v3  ;;  %4610 = vmatpush3.bf16.msra.mxu1 %v6612_v2 }
 0x651   : > { %v4601_v63 = vpop.f32.mrf.mxu0  ;;  %4611 = vmatprep.subr.bf16.mxu1 %v6616_v17 }
 0x653   : > { %v1553_v55 = vpop.f32.mrf.mxu0 }
 0x654   : > { %4612 = vmatpush3.bf16.msra.mxu1 %v6616_v17  ;;  %5412 = vtanh.f32 %v1553_v55 }
 0x655   : > { %v4602_v50 = vpop.f32.mrf.mxu0  ;;  %4613 = vmatprep.subr.bf16.mxu1 %v6620_v41 }
 0x656   : > { %5414 = vtanh.f32 %v4602_v50 }
 0x657   : > { %5416 = vtanh.f32 %v4601_v63  ;;  %v1556_v42 = vpop.f32.mrf.mxu0 }
 0x658   : > { %5418 = vtanh.f32 %v1556_v42  ;;  %4614 = vmatpush3.bf16.msra.mxu1 %v6620_v41 }
 0x659   : > { %4615 = vmatprep.subr.bf16.mxu1 %v6624_v43  ;;  %v5405_v11 = vpop.eup %5404 }
 0x65a   : > { %v1576_v15 = vsub.f32 %v6551_v49, %v5405_v11 }
 0x65b   : > { %v5407_v56 = vpop.eup %5406 }
 0x65c   : > { %v5409_v12 = vpop.eup %5408  ;;  %4616 = vmatpush3.bf16.msra.mxu1 %v6624_v43  ;;  %v1579_v19 = vsub.f32 %v6545_v24, %v5407_v56 }
 0x65d   : > { %v5411_v57 = vpop.eup %5410  ;;  %4617 = vmatprep.subr.bf16.mxu1 %v6628_v44  ;;  %v1578_v20 = vsub.f32 %v6557_v4, %v5409_v12 }
 0x65e   : > { %v1577_v16 = vsub.f32 %v6554_v51, %v5411_v57 }
 0x65f   : > { %v1585_v48 = vpack.c.bf16 %v1579_v19, %v1578_v20 }
 0x660   : > { %4618 = vmatpush3.bf16.msra.mxu1 %v6628_v44  ;;  %v1584_v46 = vpack.c.bf16 %v1577_v16, %v1576_v15 }
 0x661   : > { %4651 = vmatprep.subr.bf16.mxu1 %v6439_v32  ;;  %v5413_v34 = vpop.eup %5412 }
 0x662   : > { %4619 = vmatprep.mubr.bf16.mxu1 %v1584_v46  ;;  %v1580_v39 = vsub.f32 %v6571_v7, %v5413_v34 }
 0x663   : > { %v5415_v35 = vpop.eup %5414  ;;  %4620 = vmatmul.mubr.bf16.vlgmr.msra.gmra.mxu1 %v1585_v48 }
 0x664   : > { %v5417_v10 = vpop.eup %5416  ;;  %4652 = vmatpush3.bf16.msra.mxu1 %v6439_v32  ;;  %v1583_v54 = vsub.f32 %v6567_v6, %v5415_v35 }
 0x665   : > { %v5419_v36 = vpop.eup %5418  ;;  %4653 = vmatprep.subr.bf16.mxu1 %v6442_v27  ;;  %v1582_v28 = vsub.f32 %v6577_v8, %v5417_v10 }
 0x666   : > { %v1581_v9 = vsub.f32 %v6574_v22, %v5419_v36 }
 0x667   : > { %v1587_v25 = vpack.c.bf16 %v1583_v54, %v1582_v28 }
 0x668   : > { %v1586_v26 = vpack.c.bf16 %v1581_v9, %v1580_v39  ;;  %4654 = vmatpush3.bf16.msra.mxu1 %v6442_v27 }
 0x669   : > { %4655 = vmatprep.subr.bf16.mxu1 %v6608_v47 }
 0x66a   : > { %4623 = vmatprep.mubr.bf16.mxu1 %v1586_v26 }
 0x66b   : > { %4624 = vmatmul.mubr.bf16.gmra.mxu1 %v1587_v25 }
 0x66c   : > { %4656 = vmatpush3.bf16.msra.mxu1 %v6608_v47 }
 0x66d   : > { %4657 = vmatprep.subr.bf16.mxu1 %v6612_v2 }
 0x670   : > { %4658 = vmatpush3.bf16.msra.mxu1 %v6612_v2 }
 0x671   : > { %4659 = vmatprep.subr.bf16.mxu1 %v6616_v17 }
 0x674   : > { %4660 = vmatpush3.bf16.msra.mxu1 %v6616_v17 }
 0x675   : > { %4661 = vmatprep.subr.bf16.mxu1 %v6620_v41 }
 0x678   : > { %4662 = vmatpush3.bf16.msra.mxu1 %v6620_v41 }
 0x679   : > { %4663 = vmatprep.subr.bf16.mxu1 %v6624_v43 }
 0x67c   : > { %4664 = vmatpush3.bf16.msra.mxu1 %v6624_v43 }
 0x67d   : > { %4665 = vmatprep.subr.bf16.mxu1 %v6628_v44 }
 0x680   : > { %4666 = vmatpush3.bf16.msra.mxu1 %v6628_v44 }
 0x681   : > { %4699 = vmatprep.subr.bf16.mxu1 %v6439_v32 }
 0x703   : > { %v4573_v29 = vpop.f32.mrf.mxu1 }
 0x704   : > { %v6667_v3 = vsub.f32 %v6497_v38, %v4573_v29 }
 0x705   : > { %v1460_v13 = vpop.f32.mrf.mxu1 }
 0x706   : > { %v6661_v0 = vsub.f32 %v6491_v53, %v1460_v13 }
 0x707   : > { %v4574_v5 = vpop.f32.mrf.mxu1 }
 0x708   : > { %v6658_v45 = vsub.f32 %v6488_v52, %v4574_v5 }
 0x709   : > { %v1463_v18 = vpop.f32.mrf.mxu1 }
 0x70a   : > { %v6664_v61 = vsub.f32 %v6494_v37, %v1463_v18  ;;  %v1662_v50 = vpack.c.bf16 %v6658_v45, %v6667_v3 }
 0x70b   : > { %v4577_v63 = vpop.f32.mrf.mxu1 }
 0x70c   : > { %v1661_v55 = vpack.c.bf16 %v6664_v61, %v6661_v0  ;;  %v6685_v56 = vsub.f32 %v6517_v60, %v4577_v63 }
 0x70d   : > { %v1476_v42 = vpop.f32.mrf.mxu1 }
 0x70e   : > { %4643 = vmatprep.mubr.bf16.mxu0 %v1661_v55  ;;  %v6679_v38 = vsub.f32 %v6511_v58, %v1476_v42 }
 0x70f   : > { %v4578_v52 = vpop.f32.mrf.mxu1  ;;  %4644 = vmatmul.mubr.bf16.vlgmr.msra.gmra.mxu0 %v1662_v50 }
 0x710   : > { %4676 = vmatpush3.bf16.msra.mxu0 %v6432_v1  ;;  %v6675_v53 = vsub.f32 %v6505_v21, %v4578_v52 }
 0x711   : > { %v1479_v37 = vpop.f32.mrf.mxu1  ;;  %4677 = vmatprep.subr.bf16.mxu0 %v6507_v23 }
 0x712   : > { %v6682_v11 = vsub.f32 %v6514_v30, %v1479_v37  ;;  %v1664_v21 = vpack.c.bf16 %v6675_v53, %v6685_v56 }
 0x714   : > { %4678 = vmatpush3.bf16.msra.mxu0 %v6507_v23  ;;  %v1663_v12 = vpack.c.bf16 %v6682_v11, %v6679_v38 }
 0x715   : > { %4679 = vmatprep.subr.bf16.mxu0 %v6524_v14 }
 0x716   : > { %4647 = vmatprep.mubr.bf16.mxu0 %v1663_v12 }
 0x717   : > { %4648 = vmatmul.mubr.bf16.gmra.mxu0 %v1664_v21 }
 0x718   : > { %4680 = vmatpush3.bf16.msra.mxu0 %v6524_v14 }
 0x719   : > { %4681 = vmatprep.subr.bf16.mxu0 %v6528_v33 }
 0x71c   : > { %4682 = vmatpush3.bf16.msra.mxu0 %v6528_v33 }
 0x71d   : > { %4683 = vmatprep.subr.bf16.mxu0 %v6532_v31 }
 0x720   : > { %4684 = vmatpush3.bf16.msra.mxu0 %v6532_v31 }
 0x721   : > { %4685 = vmatprep.subr.bf16.mxu0 %v6536_v59 }
 0x723   : > { %v4621_v58 = vpop.f32.mrf.mxu1 }
 0x724   : > { %4686 = vmatpush3.bf16.msra.mxu0 %v6536_v59  ;;  %v6713_v20 = vsub.f32 %v6557_v4, %v4621_v58 }
 0x725   : > { %v1622_v30 = vpop.f32.mrf.mxu1  ;;  %4687 = vmatprep.subr.bf16.mxu0 %v6540_v62 }
 0x726   : > { %v6707_v15 = vsub.f32 %v6551_v49, %v1622_v30 }
 0x727   : > { %v4622_v60 = vpop.f32.mrf.mxu1 }
 0x728   : > { %4688 = vmatpush3.bf16.msra.mxu0 %v6540_v62  ;;  %v6703_v57 = vsub.f32 %v6545_v24, %v4622_v60 }
 0x729   : > { %v1625_v19 = vpop.f32.mrf.mxu1  ;;  %4689 = vmatprep.subr.bf16.mxu0 %v6547_v40 }
 0x72a   : > { %v6710_v16 = vsub.f32 %v6554_v51, %v1625_v19  ;;  %v1824_v24 = vpack.c.bf16 %v6703_v57, %v6713_v20 }
 0x72b   : > { %v4625_v46 = vpop.f32.mrf.mxu1 }
 0x72c   : > { %4690 = vmatpush3.bf16.msra.mxu0 %v6547_v40  ;;  %v1823_v48 = vpack.c.bf16 %v6710_v16, %v6707_v15  ;;  %v6733_v36 = vsub.f32 %v6577_v8, %v4625_v46 }
 0x72d   : > { %v1638_v34 = vpop.f32.mrf.mxu1  ;;  %4723 = vmatprep.subr.bf16.mxu0 %v6432_v1 }
 0x72e   : > { %4691 = vmatprep.mubr.bf16.mxu0 %v1823_v48  ;;  %v6727_v35 = vsub.f32 %v6571_v7, %v1638_v34 }
 0x72f   : > { %v4626_v49 = vpop.f32.mrf.mxu1  ;;  %4692 = vmatmul.mubr.bf16.vlgmr.msra.gmra.mxu0 %v1824_v24 }
 0x730   : > { %4724 = vmatpush3.bf16.msra.mxu0 %v6432_v1  ;;  %v6723_v51 = vsub.f32 %v6567_v6, %v4626_v49 }
 0x731   : > { %v1641_v4 = vpop.f32.mrf.mxu1  ;;  %4725 = vmatprep.subr.bf16.mxu0 %v6507_v23 }
 0x732   : > { %v6730_v10 = vsub.f32 %v6574_v22, %v1641_v4  ;;  %v1826_v6 = vpack.c.bf16 %v6723_v51, %v6733_v36 }
 0x734   : > { %v1825_v54 = vpack.c.bf16 %v6730_v10, %v6727_v35  ;;  %4726 = vmatpush3.bf16.msra.mxu0 %v6507_v23 }
 0x735   : > { %4727 = vmatprep.subr.bf16.mxu0 %v6524_v14 }
 0x736   : > { %4695 = vmatprep.mubr.bf16.mxu0 %v1825_v54 }
 0x737   : > { %4696 = vmatmul.mubr.bf16.gmra.mxu0 %v1826_v6 }
 0x738   : > { %4728 = vmatpush3.bf16.msra.mxu0 %v6524_v14 }
 0x739   : > { %4729 = vmatprep.subr.bf16.mxu0 %v6528_v33 }
 0x73c   : > { %4730 = vmatpush3.bf16.msra.mxu0 %v6528_v33 }
 0x73d   : > { %4731 = vmatprep.subr.bf16.mxu0 %v6532_v31 }
 0x740   : > { %4732 = vmatpush3.bf16.msra.mxu0 %v6532_v31 }
 0x741   : > { %4733 = vmatprep.subr.bf16.mxu0 %v6536_v59 }
 0x744   : > { %4734 = vmatpush3.bf16.msra.mxu0 %v6536_v59 }
 0x745   : > { %4735 = vmatprep.subr.bf16.mxu0 %v6540_v62 }
 0x748   : > { %4736 = vmatpush3.bf16.msra.mxu0 %v6540_v62 }
 0x749   : > { %4737 = vmatprep.subr.bf16.mxu0 %v6547_v40 }
 0x74c   : > { %4738 = vmatpush3.bf16.msra.mxu0 %v6547_v40 }
 0x74d   : > { %4771 = vmatprep.subr.bf16.mxu0 %v6432_v1 }
 0x7cf   : > { %v4645_v7 = vpop.f32.mrf.mxu0 }
 0x7d1   : > { %v1699_v22 = vpop.f32.mrf.mxu0 }
 0x7d2   : > { %5420 = vtanh.f32 %v1699_v22 }
 0x7d3   : > { %v4646_v8 = vpop.f32.mrf.mxu0 }
 0x7d4   : > { %5422 = vtanh.f32 %v4646_v8 }
 0x7d5   : > { %5424 = vtanh.f32 %v4645_v7  ;;  %v1702_v39 = vpop.f32.mrf.mxu0 }
 0x7d6   : > { %5426 = vtanh.f32 %v1702_v39 }
 0x7d7   : > { %v4649_v9 = vpop.f32.mrf.mxu0 }
 0x7d9   : > { %v1715_v28 = vpop.f32.mrf.mxu0 }
 0x7da   : > { %5428 = vtanh.f32 %v1715_v28 }
 0x7db   : > { %v4650_v26 = vpop.f32.mrf.mxu0 }
 0x7dc   : > { %5430 = vtanh.f32 %v4650_v26 }
 0x7dd   : > { %5432 = vtanh.f32 %v4649_v9  ;;  %v1718_v25 = vpop.f32.mrf.mxu0 }
 0x7de   : > { %5434 = vtanh.f32 %v1718_v25 }
 0x7df   : > { %v5421_v29 = vpop.eup %5420 }
 0x7e0   : > { %v1738_v63 = vsub.f32 %v6661_v0, %v5421_v29 }
 0x7e1   : > { %v5423_v13 = vpop.eup %5422 }
 0x7e2   : > { %v5425_v5 = vpop.eup %5424  ;;  %v1741_v18 = vsub.f32 %v6658_v45, %v5423_v13 }
 0x7e3   : > { %v5427_v1 = vpop.eup %5426  ;;  %v1740_v50 = vsub.f32 %v6667_v3, %v5425_v5 }
 0x7e4   : > { %v1739_v55 = vsub.f32 %v6664_v61, %v5427_v1 }
 0x7e5   : > { %v1747_v52 = vpack.c.bf16 %v1741_v18, %v1740_v50 }
 0x7e6   : > { %v1746_v42 = vpack.c.bf16 %v1739_v55, %v1738_v63 }
 0x7e7   : > { %v5429_v37 = vpop.eup %5428 }
 0x7e8   : > { %4667 = vmatprep.mubr.bf16.mxu1 %v1746_v42  ;;  %v1742_v60 = vsub.f32 %v6679_v38, %v5429_v37 }
 0x7e9   : > { %v5431_v12 = vpop.eup %5430  ;;  %4668 = vmatmul.mubr.bf16.vlgmr.msra.gmra.mxu1 %v1747_v52 }
 0x7ea   : > { %v5433_v21 = vpop.eup %5432  ;;  %4700 = vmatpush3.bf16.msra.mxu1 %v6439_v32  ;;  %v1745_v30 = vsub.f32 %v6675_v53, %v5431_v12 }
 0x7eb   : > { %v5435_v58 = vpop.eup %5434  ;;  %4701 = vmatprep.subr.bf16.mxu1 %v6442_v27  ;;  %v1744_v46 = vsub.f32 %v6685_v56, %v5433_v21 }
 0x7ec   : > { %v1743_v19 = vsub.f32 %v6682_v11, %v5435_v58 }
 0x7ed   : > { %v1749_v34 = vpack.c.bf16 %v1745_v30, %v1744_v46 }
 0x7ee   : > { %4702 = vmatpush3.bf16.msra.mxu1 %v6442_v27  ;;  %v1748_v48 = vpack.c.bf16 %v1743_v19, %v1742_v60 }
 0x7ef   : > { %v4693_v24 = vpop.f32.mrf.mxu0  ;;  %4703 = vmatprep.subr.bf16.mxu1 %v6608_v47 }
 0x7f0   : > { %4671 = vmatprep.mubr.bf16.mxu1 %v1748_v48 }
 0x7f1   : > { %4672 = vmatmul.mubr.bf16.gmra.mxu1 %v1749_v34  ;;  %v1861_v49 = vpop.f32.mrf.mxu0 }
 0x7f2   : > { %4704 = vmatpush3.bf16.msra.mxu1 %v6608_v47  ;;  %5436 = vtanh.f32 %v1861_v49 }
 0x7f3   : > { %v4694_v4 = vpop.f32.mrf.mxu0  ;;  %4705 = vmatprep.subr.bf16.mxu1 %v6612_v2 }
 0x7f4   : > { %5438 = vtanh.f32 %v4694_v4 }
 0x7f5   : > { %5440 = vtanh.f32 %v4693_v24  ;;  %v1864_v54 = vpop.f32.mrf.mxu0 }
 0x7f6   : > { %5442 = vtanh.f32 %v1864_v54  ;;  %4706 = vmatpush3.bf16.msra.mxu1 %v6612_v2 }
 0x7f7   : > { %v4697_v6 = vpop.f32.mrf.mxu0  ;;  %4707 = vmatprep.subr.bf16.mxu1 %v6616_v17 }
 0x7f9   : > { %v1877_v7 = vpop.f32.mrf.mxu0 }
 0x7fa   : > { %4708 = vmatpush3.bf16.msra.mxu1 %v6616_v17  ;;  %5444 = vtanh.f32 %v1877_v7  ;;  %v6817_v7 = vld [vmem:[#allocation5 + $0x38] sm:$0xff]  }
 0x7fb   : > { %v4698_v22 = vpop.f32.mrf.mxu0  ;;  %4709 = vmatprep.subr.bf16.mxu1 %v6620_v41 }
 0x7fc   : > { %5446 = vtanh.f32 %v4698_v22 }
 0x7fd   : > { %5448 = vtanh.f32 %v4697_v6  ;;  %v1880_v8 = vpop.f32.mrf.mxu0 }
 0x7fe   : > { %5450 = vtanh.f32 %v1880_v8  ;;  %4710 = vmatpush3.bf16.msra.mxu1 %v6620_v41 }
 0x7ff   : > { %4711 = vmatprep.subr.bf16.mxu1 %v6624_v43  ;;  %v5437_v39 = vpop.eup %5436 }
 0x800   : > { %v1900_v29 = vsub.f32 %v6707_v15, %v5437_v39 }
 0x801   : > { %v5439_v9 = vpop.eup %5438 }
 0x802   : > { %v5441_v28 = vpop.eup %5440  ;;  %4712 = vmatpush3.bf16.msra.mxu1 %v6624_v43  ;;  %v1903_v25 = vsub.f32 %v6703_v57, %v5439_v9 }
 0x803   : > { %v5443_v26 = vpop.eup %5442  ;;  %4713 = vmatprep.subr.bf16.mxu1 %v6628_v44  ;;  %v1902_v5 = vsub.f32 %v6713_v20, %v5441_v28 }
 0x804   : > { %v1901_v13 = vsub.f32 %v6710_v16, %v5443_v26 }
 0x805   : > { %v1909_v18 = vpack.c.bf16 %v1903_v25, %v1902_v5 }
 0x806   : > { %4714 = vmatpush3.bf16.msra.mxu1 %v6628_v44  ;;  %v1908_v1 = vpack.c.bf16 %v1901_v13, %v1900_v29 }
 0x807   : > { %4747 = vmatprep.subr.bf16.mxu1 %v6439_v32  ;;  %v5445_v63 = vpop.eup %5444 }
 0x808   : > { %4715 = vmatprep.mubr.bf16.mxu1 %v1908_v1  ;;  %v1904_v37 = vsub.f32 %v6727_v35, %v5445_v63 }
 0x809   : > { %v5447_v55 = vpop.eup %5446  ;;  %4716 = vmatmul.mubr.bf16.vlgmr.msra.gmra.mxu1 %v1909_v18 }
 0x80a   : > { %v5449_v50 = vpop.eup %5448  ;;  %4748 = vmatpush3.bf16.msra.mxu1 %v6439_v32  ;;  %v1907_v52 = vsub.f32 %v6723_v51, %v5447_v55 }
 0x80b   : > { %v5451_v42 = vpop.eup %5450  ;;  %4749 = vmatprep.subr.bf16.mxu1 %v6442_v27  ;;  %v1906_v21 = vsub.f32 %v6733_v36, %v5449_v50 }
 0x80c   : > { %v1905_v12 = vsub.f32 %v6730_v10, %v5451_v42 }
 0x80d   : > { %v1911_v30 = vpack.c.bf16 %v1907_v52, %v1906_v21 }
 0x80e   : > { %v1910_v58 = vpack.c.bf16 %v1905_v12, %v1904_v37  ;;  %4750 = vmatpush3.bf16.msra.mxu1 %v6442_v27 }
 0x80f   : > { %4751 = vmatprep.subr.bf16.mxu1 %v6608_v47 }
 0x810   : > { %4719 = vmatprep.mubr.bf16.mxu1 %v1910_v58 }
 0x811   : > { %4720 = vmatmul.mubr.bf16.gmra.mxu1 %v1911_v30 }
 0x812   : > { %4752 = vmatpush3.bf16.msra.mxu1 %v6608_v47 }
 0x813   : > { %4753 = vmatprep.subr.bf16.mxu1 %v6612_v2 }
 0x816   : > { %4754 = vmatpush3.bf16.msra.mxu1 %v6612_v2 }
 0x817   : > { %4755 = vmatprep.subr.bf16.mxu1 %v6616_v17 }
 0x81a   : > { %4756 = vmatpush3.bf16.msra.mxu1 %v6616_v17 }
 0x81b   : > { %4757 = vmatprep.subr.bf16.mxu1 %v6620_v41 }
 0x81e   : > { %4758 = vmatpush3.bf16.msra.mxu1 %v6620_v41 }
 0x81f   : > { %4759 = vmatprep.subr.bf16.mxu1 %v6624_v43 }
 0x822   : > { %4760 = vmatpush3.bf16.msra.mxu1 %v6624_v43 }
 0x823   : > { %4761 = vmatprep.subr.bf16.mxu1 %v6628_v44 }
 0x826   : > { %4762 = vmatpush3.bf16.msra.mxu1 %v6628_v44 }
 0x827   : > { %4795 = vmatprep.subr.bf16.mxu1 %v6439_v32 }
 0x8a9   : > { %v4669_v27 = vpop.f32.mrf.mxu1 }
 0x8aa   : > { %v6811_v49 = vsub.f32 %v6667_v3, %v4669_v27 }
 0x8ab   : > { %v1784_v60 = vpop.f32.mrf.mxu1 }
 0x8ac   : > { %v6805_v24 = vsub.f32 %v6661_v0, %v1784_v60 }
 0x8ad   : > { %v4670_v19 = vpop.f32.mrf.mxu1 }
 0x8ae   : > { %v6802_v46 = vsub.f32 %v6658_v45, %v4670_v19 }
 0x8af   : > { %v1787_v48 = vpop.f32.mrf.mxu1 }
 0x8b0   : > { %v6808_v34 = vsub.f32 %v6664_v61, %v1787_v48  ;;  %v1986_v54 = vpack.c.bf16 %v6802_v46, %v6811_v49 }
 0x8b1   : > { %v4673_v4 = vpop.f32.mrf.mxu1 }
 0x8b2   : > { %v1985_v32 = vpack.c.bf16 %v6808_v34, %v6805_v24  ;;  %v6831_v8 = vsub.f32 %v6685_v56, %v4673_v4  ;;  %v6903_v4 = vld [vmem:[#allocation7 + $0x38] sm:$0xff]  }
 0x8b3   : > { %v1800_v6 = vpop.f32.mrf.mxu1 }
 0x8b4   : > { %4739 = vmatprep.mubr.bf16.mxu0 %v1985_v32  ;;  %v6825_v3 = vsub.f32 %v6679_v38, %v1800_v6 }
 0x8b5   : > { %v4674_v45 = vpop.f32.mrf.mxu1  ;;  %4740 = vmatmul.mubr.bf16.vlgmr.msra.gmra.mxu0 %v1986_v54  ;;  %v6906_v54 = vld [vmem:[#allocation7 + $0x30] sm:$0xff]  }
 0x8b6   : > { %4772 = vmatpush3.bf16.msra.mxu0 %v6817_v7  ;;  %v6821_v0 = vsub.f32 %v6675_v53, %v4674_v45 }
 0x8b7   : > { %v1803_v61 = vpop.f32.mrf.mxu1  ;;  %4773 = vmatprep.subr.bf16.mxu0 %v6507_v23 }
 0x8b8   : > { %v6828_v22 = vsub.f32 %v6682_v11, %v1803_v61  ;;  %v1988_v53 = vpack.c.bf16 %v6821_v0, %v6831_v8 }
 0x8ba   : > { %4774 = vmatpush3.bf16.msra.mxu0 %v6507_v23  ;;  %v1987_v39 = vpack.c.bf16 %v6828_v22, %v6825_v3 }
 0x8bb   : > { %4775 = vmatprep.subr.bf16.mxu0 %v6524_v14 }
 0x8bc   : > { %4743 = vmatprep.mubr.bf16.mxu0 %v1987_v39 }
 0x8bd   : > { %4744 = vmatmul.mubr.bf16.gmra.mxu0 %v1988_v53 }
 0x8be   : > { %4776 = vmatpush3.bf16.msra.mxu0 %v6524_v14 }
 0x8bf   : > { %4777 = vmatprep.subr.bf16.mxu0 %v6528_v33 }
 0x8c2   : > { %4778 = vmatpush3.bf16.msra.mxu0 %v6528_v33 }
 0x8c3   : > { %4779 = vmatprep.subr.bf16.mxu0 %v6532_v31 }
 0x8c6   : > { %4780 = vmatpush3.bf16.msra.mxu0 %v6532_v31 }
 0x8c7   : > { %4781 = vmatprep.subr.bf16.mxu0 %v6536_v59 }
 0x8c9   : > { %v4717_v38 = vpop.f32.mrf.mxu1 }
 0x8ca   : > { %4782 = vmatpush3.bf16.msra.mxu0 %v6536_v59  ;;  %v6859_v29 = vsub.f32 %v6713_v20, %v4717_v38 }
 0x8cb   : > { %v1946_v11 = vpop.f32.mrf.mxu1  ;;  %4783 = vmatprep.subr.bf16.mxu0 %v6540_v62 }
 0x8cc   : > { %v6853_v26 = vsub.f32 %v6707_v15, %v1946_v11 }
 0x8cd   : > { %v4718_v56 = vpop.f32.mrf.mxu1 }
 0x8ce   : > { %4784 = vmatpush3.bf16.msra.mxu0 %v6540_v62  ;;  %v6849_v9 = vsub.f32 %v6703_v57, %v4718_v56 }
 0x8cf   : > { %v1949_v28 = vpop.f32.mrf.mxu1  ;;  %4785 = vmatprep.subr.bf16.mxu0 %v6547_v40 }
 0x8d0   : > { %v6856_v25 = vsub.f32 %v6710_v16, %v1949_v28  ;;  %v2148_v57 = vpack.c.bf16 %v6849_v9, %v6859_v29 }
 0x8d1   : > { %v4721_v13 = vpop.f32.mrf.mxu1 }
 0x8d2   : > { %4786 = vmatpush3.bf16.msra.mxu0 %v6547_v40  ;;  %v2147_v5 = vpack.c.bf16 %v6856_v25, %v6853_v26  ;;  %v6879_v55 = vsub.f32 %v6733_v36, %v4721_v13 }
 0x8d3   : > { %v1962_v1 = vpop.f32.mrf.mxu1  ;;  %4819 = vmatprep.subr.bf16.mxu0 %v6817_v7 }
 0x8d4   : > { %4787 = vmatprep.mubr.bf16.mxu0 %v2147_v5  ;;  %v6873_v18 = vsub.f32 %v6727_v35, %v1962_v1 }
 0x8d5   : > { %v4722_v15 = vpop.f32.mrf.mxu1  ;;  %4788 = vmatmul.mubr.bf16.vlgmr.msra.gmra.mxu0 %v2148_v57 }
 0x8d6   : > { %4820 = vmatpush3.bf16.msra.mxu0 %v6817_v7  ;;  %v6869_v16 = vsub.f32 %v6723_v51, %v4722_v15 }
 0x8d7   : > { %v1965_v20 = vpop.f32.mrf.mxu1  ;;  %4821 = vmatprep.subr.bf16.mxu0 %v6507_v23 }
 0x8d8   : > { %v6876_v63 = vsub.f32 %v6730_v10, %v1965_v20  ;;  %v2150_v51 = vpack.c.bf16 %v6869_v16, %v6879_v55 }
 0x8da   : > { %v2149_v50 = vpack.c.bf16 %v6876_v63, %v6873_v18  ;;  %4822 = vmatpush3.bf16.msra.mxu0 %v6507_v23 }
 0x8db   : > { %4823 = vmatprep.subr.bf16.mxu0 %v6524_v14 }
 0x8dc   : > { %4791 = vmatprep.mubr.bf16.mxu0 %v2149_v50 }
 0x8dd   : > { %4792 = vmatmul.mubr.bf16.gmra.mxu0 %v2150_v51 }
 0x8de   : > { %4824 = vmatpush3.bf16.msra.mxu0 %v6524_v14 }
 0x8df   : > { %4825 = vmatprep.subr.bf16.mxu0 %v6528_v33 }
 0x8e2   : > { %4826 = vmatpush3.bf16.msra.mxu0 %v6528_v33 }
 0x8e3   : > { %4827 = vmatprep.subr.bf16.mxu0 %v6532_v31 }
 0x8e6   : > { %4828 = vmatpush3.bf16.msra.mxu0 %v6532_v31 }
 0x8e7   : > { %4829 = vmatprep.subr.bf16.mxu0 %v6536_v59 }
 0x8ea   : > { %4830 = vmatpush3.bf16.msra.mxu0 %v6536_v59 }
 0x8eb   : > { %4831 = vmatprep.subr.bf16.mxu0 %v6540_v62 }
 0x8ee   : > { %4832 = vmatpush3.bf16.msra.mxu0 %v6540_v62 }
 0x8ef   : > { %4833 = vmatprep.subr.bf16.mxu0 %v6547_v40 }
 0x8f2   : > { %4834 = vmatpush3.bf16.msra.mxu0 %v6547_v40 }
 0x8f3   : > { %4867 = vmatprep.subr.bf16.mxu0 %v6817_v7 }
 0x975   : > { %v4741_v23 = vpop.f32.mrf.mxu0 }
 0x977   : > { %v2023_v14 = vpop.f32.mrf.mxu0 }
 0x978   : > { %5452 = vtanh.f32 %v2023_v14 }
 0x979   : > { %v4742_v33 = vpop.f32.mrf.mxu0 }
 0x97a   : > { %5454 = vtanh.f32 %v4742_v33 }
 0x97b   : > { %5456 = vtanh.f32 %v4741_v23  ;;  %v2026_v31 = vpop.f32.mrf.mxu0 }
 0x97c   : > { %5458 = vtanh.f32 %v2026_v31 }
 0x97d   : > { %v4745_v35 = vpop.f32.mrf.mxu0 }
 0x97f   : > { %v2039_v59 = vpop.f32.mrf.mxu0 }
 0x980   : > { %5460 = vtanh.f32 %v2039_v59 }
 0x981   : > { %v4746_v10 = vpop.f32.mrf.mxu0 }
 0x982   : > { %5462 = vtanh.f32 %v4746_v10 }
 0x983   : > { %5464 = vtanh.f32 %v4745_v35  ;;  %v2042_v62 = vpop.f32.mrf.mxu0 }
 0x984   : > { %5466 = vtanh.f32 %v2042_v62 }
 0x985   : > { %v5453_v36 = vpop.eup %5452 }
 0x986   : > { %v2062_v12 = vsub.f32 %v6805_v24, %v5453_v36 }
 0x987   : > { %v5455_v40 = vpop.eup %5454 }
 0x988   : > { %v5457_v42 = vpop.eup %5456  ;;  %v2065_v37 = vsub.f32 %v6802_v46, %v5455_v40 }
 0x989   : > { %v5459_v52 = vpop.eup %5458  ;;  %v2064_v58 = vsub.f32 %v6811_v49, %v5457_v42 }
 0x98a   : > { %v2063_v21 = vsub.f32 %v6808_v34, %v5459_v52 }
 0x98b   : > { %v2071_v27 = vpack.c.bf16 %v2065_v37, %v2064_v58 }
 0x98c   : > { %v2070_v30 = vpack.c.bf16 %v2063_v21, %v2062_v12 }
 0x98d   : > { %v5461_v60 = vpop.eup %5460 }
 0x98e   : > { %4763 = vmatprep.mubr.bf16.mxu1 %v2070_v30  ;;  %v2066_v45 = vsub.f32 %v6825_v3, %v5461_v60 }
 0x98f   : > { %v5463_v19 = vpop.eup %5462  ;;  %4764 = vmatmul.mubr.bf16.vlgmr.msra.gmra.mxu1 %v2071_v27 }
 0x990   : > { %v5465_v48 = vpop.eup %5464  ;;  %4796 = vmatpush3.bf16.msra.mxu1 %v6903_v4  ;;  %v2069_v6 = vsub.f32 %v6821_v0, %v5463_v19 }
 0x991   : > { %v5467_v32 = vpop.eup %5466  ;;  %4797 = vmatprep.subr.bf16.mxu1 %v6906_v54  ;;  %v2068_v39 = vsub.f32 %v6831_v8, %v5465_v48 }
 0x992   : > { %v2067_v61 = vsub.f32 %v6828_v22, %v5467_v32 }
 0x993   : > { %v2073_v11 = vpack.c.bf16 %v2069_v6, %v2068_v39 }
 0x994   : > { %4798 = vmatpush3.bf16.msra.mxu1 %v6906_v54  ;;  %v2072_v53 = vpack.c.bf16 %v2067_v61, %v2066_v45  ;;  %v6971_v45 = vld [vmem:[#allocation5 + $0x30] sm:$0xff]  }
 0x995   : > { %v4789_v38 = vpop.f32.mrf.mxu0  ;;  %4799 = vmatprep.subr.bf16.mxu1 %v6608_v47 }
 0x996   : > { %4767 = vmatprep.mubr.bf16.mxu1 %v2072_v53 }
 0x997   : > { %4768 = vmatmul.mubr.bf16.gmra.mxu1 %v2073_v11  ;;  %v2185_v56 = vpop.f32.mrf.mxu0 }
 0x998   : > { %4800 = vmatpush3.bf16.msra.mxu1 %v6608_v47  ;;  %5468 = vtanh.f32 %v2185_v56 }
 0x999   : > { %v4790_v28 = vpop.f32.mrf.mxu0  ;;  %4801 = vmatprep.subr.bf16.mxu1 %v6612_v2 }
 0x99a   : > { %5470 = vtanh.f32 %v4790_v28  ;;  %v7004_v28 = vld [vmem:[#allocation5 + $0x8] sm:$0xff]  }
 0x99b   : > { %5472 = vtanh.f32 %v4789_v38  ;;  %v2188_v13 = vpop.f32.mrf.mxu0  ;;  %v6988_v38 = vld [vmem:[#allocation5 + $0x28] sm:$0xff]  }
 0x99c   : > { %5474 = vtanh.f32 %v2188_v13  ;;  %4802 = vmatpush3.bf16.msra.mxu1 %v6612_v2 }
 0x99d   : > { %v4793_v5 = vpop.f32.mrf.mxu0  ;;  %4803 = vmatprep.subr.bf16.mxu1 %v6616_v17 }
 0x99f   : > { %v2201_v57 = vpop.f32.mrf.mxu0 }
 0x9a0   : > { %4804 = vmatpush3.bf16.msra.mxu1 %v6616_v17  ;;  %5476 = vtanh.f32 %v2201_v57 }
 0x9a1   : > { %v4794_v1 = vpop.f32.mrf.mxu0  ;;  %4805 = vmatprep.subr.bf16.mxu1 %v6620_v41 }
 0x9a2   : > { %5478 = vtanh.f32 %v4794_v1  ;;  %v7011_v1 = vld [vmem:[#allocation5] sm:$0xff]  }
 0x9a3   : > { %5480 = vtanh.f32 %v4793_v5  ;;  %v2204_v15 = vpop.f32.mrf.mxu0 }
 0x9a4   : > { %5482 = vtanh.f32 %v2204_v15  ;;  %4806 = vmatpush3.bf16.msra.mxu1 %v6620_v41 }
 0x9a5   : > { %4807 = vmatprep.subr.bf16.mxu1 %v6624_v43  ;;  %v5469_v20 = vpop.eup %5468 }
 0x9a6   : > { %v2224_v33 = vsub.f32 %v6853_v26, %v5469_v20 }
 0x9a7   : > { %v5471_v50 = vpop.eup %5470 }
 0x9a8   : > { %v5473_v51 = vpop.eup %5472  ;;  %4808 = vmatpush3.bf16.msra.mxu1 %v6624_v43  ;;  %v2227_v14 = vsub.f32 %v6849_v9, %v5471_v50 }
 0x9a9   : > { %v5475_v23 = vpop.eup %5474  ;;  %4809 = vmatprep.subr.bf16.mxu1 %v6628_v44  ;;  %v2226_v35 = vsub.f32 %v6859_v29, %v5473_v51 }
 0x9aa   : > { %v2225_v31 = vsub.f32 %v6856_v25, %v5475_v23 }
 0x9ab   : > { %v2233_v10 = vpack.c.bf16 %v2227_v14, %v2226_v35 }
 0x9ac   : > { %4810 = vmatpush3.bf16.msra.mxu1 %v6628_v44  ;;  %v2232_v59 = vpack.c.bf16 %v2225_v31, %v2224_v33 }
 0x9ad   : > { %4843 = vmatprep.subr.bf16.mxu1 %v6903_v4  ;;  %v5477_v62 = vpop.eup %5476 }
 0x9ae   : > { %4811 = vmatprep.mubr.bf16.mxu1 %v2232_v59  ;;  %v2228_v37 = vsub.f32 %v6873_v18, %v5477_v62 }
 0x9af   : > { %v5479_v36 = vpop.eup %5478  ;;  %4812 = vmatmul.mubr.bf16.vlgmr.msra.gmra.mxu1 %v2233_v10 }
 0x9b0   : > { %v5481_v40 = vpop.eup %5480  ;;  %4844 = vmatpush3.bf16.msra.mxu1 %v6903_v4  ;;  %v2231_v52 = vsub.f32 %v6869_v16, %v5479_v36 }
 0x9b1   : > { %v5483_v42 = vpop.eup %5482  ;;  %4845 = vmatprep.subr.bf16.mxu1 %v6906_v54  ;;  %v2230_v21 = vsub.f32 %v6879_v55, %v5481_v40 }
 0x9b2   : > { %v2229_v12 = vsub.f32 %v6876_v63, %v5483_v42 }
 0x9b3   : > { %v2235_v30 = vpack.c.bf16 %v2231_v52, %v2230_v21 }
 0x9b4   : > { %v2234_v58 = vpack.c.bf16 %v2229_v12, %v2228_v37  ;;  %4846 = vmatpush3.bf16.msra.mxu1 %v6906_v54 }
 0x9b5   : > { %4847 = vmatprep.subr.bf16.mxu1 %v6608_v47 }
 0x9b6   : > { %4815 = vmatprep.mubr.bf16.mxu1 %v2234_v58 }
 0x9b7   : > { %4816 = vmatmul.mubr.bf16.gmra.mxu1 %v2235_v30 }
 0x9b8   : > { %4848 = vmatpush3.bf16.msra.mxu1 %v6608_v47 }
 0x9b9   : > { %4849 = vmatprep.subr.bf16.mxu1 %v6612_v2 }
 0x9bc   : > { %4850 = vmatpush3.bf16.msra.mxu1 %v6612_v2 }
 0x9bd   : > { %4851 = vmatprep.subr.bf16.mxu1 %v6616_v17 }
 0x9c0   : > { %4852 = vmatpush3.bf16.msra.mxu1 %v6616_v17 }
 0x9c1   : > { %4853 = vmatprep.subr.bf16.mxu1 %v6620_v41 }
 0x9c4   : > { %4854 = vmatpush3.bf16.msra.mxu1 %v6620_v41 }
 0x9c5   : > { %4855 = vmatprep.subr.bf16.mxu1 %v6624_v43 }
 0x9c8   : > { %4856 = vmatpush3.bf16.msra.mxu1 %v6624_v43 }
 0x9c9   : > { %4857 = vmatprep.subr.bf16.mxu1 %v6628_v44 }
 0x9cc   : > { %4858 = vmatpush3.bf16.msra.mxu1 %v6628_v44 }
 0x9cd   : > { %4891 = vmatprep.subr.bf16.mxu1 %v6903_v4 }
 0xa4f   : > { %v4765_v47 = vpop.f32.mrf.mxu1 }
 0xa50   : > { %v6961_v43 = vsub.f32 %v6811_v49, %v4765_v47 }
 0xa51   : > { %v2108_v2 = vpop.f32.mrf.mxu1 }
 0xa52   : > { %v6955_v19 = vsub.f32 %v6805_v24, %v2108_v2 }
 0xa53   : > { %v4766_v27 = vpop.f32.mrf.mxu1 }
 0xa54   : > { %v6952_v60 = vsub.f32 %v6802_v46, %v4766_v27 }
 0xa55   : > { %v2111_v17 = vpop.f32.mrf.mxu1 }
 0xa56   : > { %v6958_v41 = vsub.f32 %v6808_v34, %v2111_v17  ;;  %v2310_v32 = vpack.c.bf16 %v6952_v60, %v6961_v43 }
 0xa57   : > { %v4769_v48 = vpop.f32.mrf.mxu1 }
 0xa58   : > { %v2309_v44 = vpack.c.bf16 %v6958_v41, %v6955_v19  ;;  %v6981_v39 = vsub.f32 %v6831_v8, %v4769_v48  ;;  %v7000_v8 = vld [vmem:[#allocation5 + $0x10] sm:$0xff]  }
 0xa59   : > { %v2124_v6 = vpop.f32.mrf.mxu1 }
 0xa5a   : > { %4835 = vmatprep.mubr.bf16.mxu0 %v2309_v44  ;;  %v6975_v49 = vsub.f32 %v6825_v3, %v2124_v6  ;;  %v6992_v3 = vld [vmem:[#allocation5 + $0x20] sm:$0xff]  }
 0xa5b   : > { %v4770_v46 = vpop.f32.mrf.mxu1  ;;  %4836 = vmatmul.mubr.bf16.vlgmr.msra.gmra.mxu0 %v2310_v32 }
 0xa5c   : > { %4868 = vmatpush3.bf16.msra.mxu0 %v6817_v7  ;;  %v6969_v24 = vsub.f32 %v6821_v0, %v4770_v46 }
 0xa5d   : > { %v2127_v34 = vpop.f32.mrf.mxu1  ;;  %4869 = vmatprep.subr.bf16.mxu0 %v6971_v45 }
 0xa5e   : > { %v6978_v61 = vsub.f32 %v6828_v22, %v2127_v34  ;;  %v2312_v53 = vpack.c.bf16 %v6969_v24, %v6981_v39  ;;  %v6996_v22 = vld [vmem:[#allocation5 + $0x18] sm:$0xff]  }
 0xa60   : > { %4870 = vmatpush3.bf16.msra.mxu0 %v6971_v45  ;;  %v2311_v0 = vpack.c.bf16 %v6978_v61, %v6975_v49 }
 0xa61   : > { %4871 = vmatprep.subr.bf16.mxu0 %v6988_v38 }
 0xa62   : > { %4839 = vmatprep.mubr.bf16.mxu0 %v2311_v0 }
 0xa63   : > { %4840 = vmatmul.mubr.bf16.gmra.mxu0 %v2312_v53 }
 0xa64   : > { %4872 = vmatpush3.bf16.msra.mxu0 %v6988_v38 }
 0xa65   : > { %4873 = vmatprep.subr.bf16.mxu0 %v6992_v3 }
 0xa68   : > { %4874 = vmatpush3.bf16.msra.mxu0 %v6992_v3 }
 0xa69   : > { %4875 = vmatprep.subr.bf16.mxu0 %v6996_v22 }
 0xa6c   : > { %4876 = vmatpush3.bf16.msra.mxu0 %v6996_v22 }
 0xa6d   : > { %4877 = vmatprep.subr.bf16.mxu0 %v7000_v8 }
 0xa6f   : > { %v4813_v11 = vpop.f32.mrf.mxu1 }
 0xa70   : > { %4878 = vmatpush3.bf16.msra.mxu0 %v7000_v8  ;;  %v7021_v50 = vsub.f32 %v6859_v29, %v4813_v11 }
 0xa71   : > { %v2270_v56 = vpop.f32.mrf.mxu1  ;;  %4879 = vmatprep.subr.bf16.mxu0 %v7004_v28 }
 0xa72   : > { %v7015_v15 = vsub.f32 %v6853_v26, %v2270_v56 }
 0xa73   : > { %v4814_v13 = vpop.f32.mrf.mxu1 }
 0xa74   : > { %4880 = vmatpush3.bf16.msra.mxu0 %v7004_v28  ;;  %v7009_v5 = vsub.f32 %v6849_v9, %v4814_v13 }
 0xa75   : > { %v2273_v57 = vpop.f32.mrf.mxu1  ;;  %4881 = vmatprep.subr.bf16.mxu0 %v7011_v1 }
 0xa76   : > { %v7018_v20 = vsub.f32 %v6856_v25, %v2273_v57  ;;  %v2472_v23 = vpack.c.bf16 %v7009_v5, %v7021_v50  ;;  %v7072_v57 = vld [vmem:[#allocation7 + $0x28] sm:$0xff]  }
 0xa77   : > { %v4817_v51 = vpop.f32.mrf.mxu1 }
 0xa78   : > { %4882 = vmatpush3.bf16.msra.mxu0 %v7011_v1  ;;  %v2471_v9 = vpack.c.bf16 %v7018_v20, %v7015_v15  ;;  %v7041_v35 = vsub.f32 %v6879_v55, %v4817_v51 }
 0xa79   : > { %v2286_v14 = vpop.f32.mrf.mxu1  ;;  %4915 = vmatprep.subr.bf16.mxu0 %v6817_v7 }
 0xa7a   : > { %4883 = vmatprep.mubr.bf16.mxu0 %v2471_v9  ;;  %v7035_v33 = vsub.f32 %v6873_v18, %v2286_v14 }
 0xa7b   : > { %v4818_v26 = vpop.f32.mrf.mxu1  ;;  %4884 = vmatmul.mubr.bf16.vlgmr.msra.gmra.mxu0 %v2472_v23  ;;  %v7076_v23 = vld [vmem:[#allocation7 + $0x20] sm:$0xff]  }
 0xa7c   : > { %4916 = vmatpush3.bf16.msra.mxu0 %v6817_v7  ;;  %v7031_v25 = vsub.f32 %v6869_v16, %v4818_v26 }
 0xa7d   : > { %v2289_v29 = vpop.f32.mrf.mxu1  ;;  %4917 = vmatprep.subr.bf16.mxu0 %v6971_v45 }
 0xa7e   : > { %v7038_v31 = vsub.f32 %v6876_v63, %v2289_v29  ;;  %v2474_v16 = vpack.c.bf16 %v7031_v25, %v7041_v35  ;;  %v7080_v29 = vld [vmem:[#allocation7 + $0x18] sm:$0xff]  }
 0xa80   : > { %v2473_v59 = vpack.c.bf16 %v7038_v31, %v7035_v33  ;;  %4918 = vmatpush3.bf16.msra.mxu0 %v6971_v45 }
 0xa81   : > { %4919 = vmatprep.subr.bf16.mxu0 %v6988_v38 }
 0xa82   : > { %4887 = vmatprep.mubr.bf16.mxu0 %v2473_v59 }
 0xa83   : > { %4888 = vmatmul.mubr.bf16.gmra.mxu0 %v2474_v16 }
 0xa84   : > { %4920 = vmatpush3.bf16.msra.mxu0 %v6988_v38 }
 0xa85   : > { %4921 = vmatprep.subr.bf16.mxu0 %v6992_v3 }
 0xa88   : > { %4922 = vmatpush3.bf16.msra.mxu0 %v6992_v3 }
 0xa89   : > { %4923 = vmatprep.subr.bf16.mxu0 %v6996_v22 }
 0xa8c   : > { %4924 = vmatpush3.bf16.msra.mxu0 %v6996_v22 }
 0xa8d   : > { %4925 = vmatprep.subr.bf16.mxu0 %v7000_v8 }
 0xa90   : > { %4926 = vmatpush3.bf16.msra.mxu0 %v7000_v8 }
 0xa91   : > { %4927 = vmatprep.subr.bf16.mxu0 %v7004_v28 }
 0xa94   : > { %4928 = vmatpush3.bf16.msra.mxu0 %v7004_v28 }
 0xa95   : > { %4929 = vmatprep.subr.bf16.mxu0 %v7011_v1 }
 0xa98   : > { %4930 = vmatpush3.bf16.msra.mxu0 %v7011_v1 }
 0xa99   : > { %4963 = vmatprep.subr.bf16.mxu0 %v6817_v7 }
 0xb1b   : > { %v4837_v18 = vpop.f32.mrf.mxu0 }
 0xb1d   : > { %v2347_v63 = vpop.f32.mrf.mxu0 }
 0xb1e   : > { %5484 = vtanh.f32 %v2347_v63 }
 0xb1f   : > { %v4838_v55 = vpop.f32.mrf.mxu0 }
 0xb20   : > { %5486 = vtanh.f32 %v4838_v55  ;;  %v7088_v55 = vld [vmem:[#allocation7 + $0x8] sm:$0xff]  }
 0xb21   : > { %5488 = vtanh.f32 %v4837_v18  ;;  %v2350_v10 = vpop.f32.mrf.mxu0  ;;  %v7084_v18 = vld [vmem:[#allocation7 + $0x10] sm:$0xff]  }
 0xb22   : > { %5490 = vtanh.f32 %v2350_v10 }
 0xb23   : > { %v4841_v62 = vpop.f32.mrf.mxu0 }
 0xb25   : > { %v2363_v36 = vpop.f32.mrf.mxu0 }
 0xb26   : > { %5492 = vtanh.f32 %v2363_v36 }
 0xb27   : > { %v4842_v40 = vpop.f32.mrf.mxu0 }
 0xb28   : > { %5494 = vtanh.f32 %v4842_v40 }
 0xb29   : > { %5496 = vtanh.f32 %v4841_v62  ;;  %v2366_v42 = vpop.f32.mrf.mxu0 }
 0xb2a   : > { %5498 = vtanh.f32 %v2366_v42  ;;  %v7092_v42 = vld [vmem:[#allocation7] sm:$0xff]  }
 0xb2b   : > { %v5485_v52 = vpop.eup %5484 }
 0xb2c   : > { %v2386_v30 = vsub.f32 %v6955_v19, %v5485_v52 }
 0xb2d   : > { %v5487_v37 = vpop.eup %5486 }
 0xb2e   : > { %v5489_v12 = vpop.eup %5488  ;;  %v2389_v58 = vsub.f32 %v6952_v60, %v5487_v37 }
 0xb2f   : > { %v5491_v21 = vpop.eup %5490  ;;  %v2388_v2 = vsub.f32 %v6961_v43, %v5489_v12 }
 0xb30   : > { %v2387_v47 = vsub.f32 %v6958_v41, %v5491_v21 }
 0xb31   : > { %v2395_v17 = vpack.c.bf16 %v2389_v58, %v2388_v2 }
 0xb32   : > { %v2394_v27 = vpack.c.bf16 %v2387_v47, %v2386_v30 }
 0xb33   : > { %v5493_v48 = vpop.eup %5492 }
 0xb34   : > { %4859 = vmatprep.mubr.bf16.mxu1 %v2394_v27  ;;  %v2390_v34 = vsub.f32 %v6975_v49, %v5493_v48 }
 0xb35   : > { %v5495_v44 = vpop.eup %5494  ;;  %4860 = vmatmul.mubr.bf16.vlgmr.msra.gmra.mxu1 %v2395_v17 }
 0xb36   : > { %v5497_v32 = vpop.eup %5496  ;;  %4892 = vmatpush3.bf16.msra.mxu1 %v6903_v4  ;;  %v2393_v46 = vsub.f32 %v6969_v24, %v5495_v44 }
 0xb37   : > { %v5499_v6 = vpop.eup %5498  ;;  %4893 = vmatprep.subr.bf16.mxu1 %v6906_v54  ;;  %v2392_v53 = vsub.f32 %v6981_v39, %v5497_v32 }
 0xb38   : > { %v2391_v0 = vsub.f32 %v6978_v61, %v5499_v6 }
 0xb39   : > { %v2397_v13 = vpack.c.bf16 %v2393_v46, %v2392_v53 }
 0xb3a   : > { %4894 = vmatpush3.bf16.msra.mxu1 %v6906_v54  ;;  %v2396_v11 = vpack.c.bf16 %v2391_v0, %v2390_v34 }
 0xb3b   : > { %v4885_v56 = vpop.f32.mrf.mxu0  ;;  %4895 = vmatprep.subr.bf16.mxu1 %v7072_v57 }
 0xb3c   : > { %4863 = vmatprep.mubr.bf16.mxu1 %v2396_v11 }
 0xb3d   : > { %4864 = vmatmul.mubr.bf16.gmra.mxu1 %v2397_v13  ;;  %v2509_v51 = vpop.f32.mrf.mxu0 }
 0xb3e   : > { %4896 = vmatpush3.bf16.msra.mxu1 %v7072_v57  ;;  %5500 = vtanh.f32 %v2509_v51 }
 0xb3f   : > { %v4886_v9 = vpop.f32.mrf.mxu0  ;;  %4897 = vmatprep.subr.bf16.mxu1 %v7076_v23 }
 0xb40   : > { %5502 = vtanh.f32 %v4886_v9 }
 0xb41   : > { %5504 = vtanh.f32 %v4885_v56  ;;  %v2512_v14 = vpop.f32.mrf.mxu0 }
 0xb42   : > { %5506 = vtanh.f32 %v2512_v14  ;;  %4898 = vmatpush3.bf16.msra.mxu1 %v7076_v23 }
 0xb43   : > { %v4889_v26 = vpop.f32.mrf.mxu0  ;;  %4899 = vmatprep.subr.bf16.mxu1 %v7080_v29 }
 0xb45   : > { %v2525_v59 = vpop.f32.mrf.mxu0 }
 0xb46   : > { %4900 = vmatpush3.bf16.msra.mxu1 %v7080_v29  ;;  %5508 = vtanh.f32 %v2525_v59 }
 0xb47   : > { %v4890_v16 = vpop.f32.mrf.mxu0  ;;  %4901 = vmatprep.subr.bf16.mxu1 %v7084_v18 }
 0xb48   : > { %5510 = vtanh.f32 %v4890_v16 }
 0xb49   : > { %5512 = vtanh.f32 %v4889_v26  ;;  %v2528_v63 = vpop.f32.mrf.mxu0 }
 0xb4a   : > { %5514 = vtanh.f32 %v2528_v63  ;;  %4902 = vmatpush3.bf16.msra.mxu1 %v7084_v18 }
 0xb4b   : > { %4903 = vmatprep.subr.bf16.mxu1 %v7088_v55  ;;  %v5501_v10 = vpop.eup %5500 }
 0xb4c   : > { %v2548_v37 = vsub.f32 %v7015_v15, %v5501_v10 }
 0xb4d   : > { %v5503_v62 = vpop.eup %5502 }
 0xb4e   : > { %v5505_v36 = vpop.eup %5504  ;;  %4904 = vmatpush3.bf16.msra.mxu1 %v7088_v55  ;;  %v2551_v52 = vsub.f32 %v7009_v5, %v5503_v62 }
 0xb4f   : > { %v5507_v40 = vpop.eup %5506  ;;  %4905 = vmatprep.subr.bf16.mxu1 %v7092_v42  ;;  %v2550_v21 = vsub.f32 %v7021_v50, %v5505_v36 }
 0xb50   : > { %v2549_v12 = vsub.f32 %v7018_v20, %v5507_v40 }
 0xb51   : > { %v2557_v30 = vpack.c.bf16 %v2551_v52, %v2550_v21 }
 0xb52   : > { %4906 = vmatpush3.bf16.msra.mxu1 %v7092_v42  ;;  %v2556_v58 = vpack.c.bf16 %v2549_v12, %v2548_v37 }
 0xb53   : > { %4939 = vmatprep.subr.bf16.mxu1 %v6903_v4  ;;  %v5509_v47 = vpop.eup %5508 }
 0xb54   : > { %4907 = vmatprep.mubr.bf16.mxu1 %v2556_v58  ;;  %v2552_v44 = vsub.f32 %v7035_v33, %v5509_v47 }
 0xb55   : > { %v5511_v2 = vpop.eup %5510  ;;  %4908 = vmatmul.mubr.bf16.vlgmr.msra.gmra.mxu1 %v2557_v30 }
 0xb56   : > { %v5513_v27 = vpop.eup %5512  ;;  %4940 = vmatpush3.bf16.msra.mxu1 %v6903_v4  ;;  %v2555_v48 = vsub.f32 %v7031_v25, %v5511_v2 }
 0xb57   : > { %v5515_v17 = vpop.eup %5514  ;;  %4941 = vmatprep.subr.bf16.mxu1 %v6906_v54  ;;  %v2554_v6 = vsub.f32 %v7041_v35, %v5513_v27 }
 0xb58   : > { %v2553_v32 = vsub.f32 %v7038_v31, %v5515_v17 }
 0xb59   : > { %v2559_v34 = vpack.c.bf16 %v2555_v48, %v2554_v6 }
 0xb5a   : > { %v2558_v46 = vpack.c.bf16 %v2553_v32, %v2552_v44  ;;  %4942 = vmatpush3.bf16.msra.mxu1 %v6906_v54 }
 0xb5b   : > { %4943 = vmatprep.subr.bf16.mxu1 %v7072_v57 }
 0xb5c   : > { %4911 = vmatprep.mubr.bf16.mxu1 %v2558_v46 }
 0xb5d   : > { %4912 = vmatmul.mubr.bf16.gmra.mxu1 %v2559_v34 }
 0xb5e   : > { %4944 = vmatpush3.bf16.msra.mxu1 %v7072_v57 }
 0xb5f   : > { %4945 = vmatprep.subr.bf16.mxu1 %v7076_v23 }
 0xb62   : > { %4946 = vmatpush3.bf16.msra.mxu1 %v7076_v23 }
 0xb63   : > { %4947 = vmatprep.subr.bf16.mxu1 %v7080_v29 }
 0xb66   : > { %4948 = vmatpush3.bf16.msra.mxu1 %v7080_v29 }
 0xb67   : > { %4949 = vmatprep.subr.bf16.mxu1 %v7084_v18 }
 0xb6a   : > { %4950 = vmatpush3.bf16.msra.mxu1 %v7084_v18 }
 0xb6b   : > { %4951 = vmatprep.subr.bf16.mxu1 %v7088_v55 }
 0xb6e   : > { %4952 = vmatpush3.bf16.msra.mxu1 %v7088_v55 }
 0xb6f   : > { %4953 = vmatprep.subr.bf16.mxu1 %v7092_v42 }
 0xb72   : > { %4954 = vmatpush3.bf16.msra.mxu1 %v7092_v42 }
 0xb73   : > { %4987 = vmatprep.subr.bf16.mxu1 %v6903_v4 }
 0xbf5   : > { %v4861_v0 = vpop.f32.mrf.mxu1 }
 0xbf6   : > { %v7131_v14 = vsub.f32 %v6961_v43, %v4861_v0 }
 0xbf7   : > { %v2432_v53 = vpop.f32.mrf.mxu1 }
 0xbf8   : > { %v7125_v51 = vsub.f32 %v6955_v19, %v2432_v53 }
 0xbf9   : > { %v4862_v11 = vpop.f32.mrf.mxu1 }
 0xbfa   : > { %v7122_v56 = vsub.f32 %v6952_v60, %v4862_v11 }
 0xbfb   : > { %v2435_v13 = vpop.f32.mrf.mxu1 }
 0xbfc   : > { %v7128_v9 = vsub.f32 %v6958_v41, %v2435_v13  ;;  %v2634_v16 = vpack.c.bf16 %v7122_v56, %v7131_v14 }
 0xbfd   : > { %v4865_v26 = vpop.f32.mrf.mxu1 }
 0xbfe   : > { %v2633_v59 = vpack.c.bf16 %v7128_v9, %v7125_v51  ;;  %v7149_v62 = vsub.f32 %v6981_v39, %v4865_v26 }
 0xbff   : > { %v2448_v63 = vpop.f32.mrf.mxu1 }
 0xc00   : > { %4931 = vmatprep.mubr.bf16.mxu0 %v2633_v59  ;;  %v7143_v43 = vsub.f32 %v6975_v49, %v2448_v63 }
 0xc01   : > { %v4866_v60 = vpop.f32.mrf.mxu1  ;;  %4932 = vmatmul.mubr.bf16.vlgmr.msra.gmra.mxu0 %v2634_v16 }
 0xc02   : > { %4964 = vmatpush3.bf16.msra.mxu0 %v6817_v7  ;;  %v7139_v19 = vsub.f32 %v6969_v24, %v4866_v60 }
 0xc03   : > { %v2451_v41 = vpop.f32.mrf.mxu1  ;;  %4965 = vmatprep.subr.bf16.mxu0 %v6971_v45 }
 0xc04   : > { %v7146_v10 = vsub.f32 %v6978_v61, %v2451_v41  ;;  %v2636_v24 = vpack.c.bf16 %v7139_v19, %v7149_v62 }
 0xc06   : > { %4966 = vmatpush3.bf16.msra.mxu0 %v6971_v45  ;;  %v2635_v36 = vpack.c.bf16 %v7146_v10, %v7143_v43 }
 0xc07   : > { %4967 = vmatprep.subr.bf16.mxu0 %v6988_v38 }
 0xc08   : > { %4935 = vmatprep.mubr.bf16.mxu0 %v2635_v36 }
 0xc09   : > { %4936 = vmatmul.mubr.bf16.gmra.mxu0 %v2636_v24 }
 0xc0a   : > { %4968 = vmatpush3.bf16.msra.mxu0 %v6988_v38 }
 0xc0b   : > { %4969 = vmatprep.subr.bf16.mxu0 %v6992_v3 }
 0xc0e   : > { %4970 = vmatpush3.bf16.msra.mxu0 %v6992_v3 }
 0xc0f   : > { %4971 = vmatprep.subr.bf16.mxu0 %v6996_v22 }
 0xc12   : > { %4972 = vmatpush3.bf16.msra.mxu0 %v6996_v22 }
 0xc13   : > { %4973 = vmatprep.subr.bf16.mxu0 %v7000_v8 }
 0xc15   : > { %v4909_v49 = vpop.f32.mrf.mxu1 }
 0xc16   : > { %4974 = vmatpush3.bf16.msra.mxu0 %v7000_v8  ;;  %v7177_v21 = vsub.f32 %v7021_v50, %v4909_v49 }
 0xc17   : > { %v2594_v61 = vpop.f32.mrf.mxu1  ;;  %4975 = vmatprep.subr.bf16.mxu0 %v7004_v28 }
 0xc18   : > { %v7171_v37 = vsub.f32 %v7015_v15, %v2594_v61 }
 0xc19   : > { %v4910_v39 = vpop.f32.mrf.mxu1 }
 0xc1a   : > { %4976 = vmatpush3.bf16.msra.mxu0 %v7004_v28  ;;  %v7167_v40 = vsub.f32 %v7009_v5, %v4910_v39 }
 0xc1b   : > { %v2597_v52 = vpop.f32.mrf.mxu1  ;;  %4977 = vmatprep.subr.bf16.mxu0 %v7011_v1 }
 0xc1c   : > { %v7174_v12 = vsub.f32 %v7018_v20, %v2597_v52  ;;  %v2796_v5 = vpack.c.bf16 %v7167_v40, %v7177_v21 }
 0xc1d   : > { %v4913_v58 = vpop.f32.mrf.mxu1 }
 0xc1e   : > { %4978 = vmatpush3.bf16.msra.mxu0 %v7011_v1  ;;  %v2795_v30 = vpack.c.bf16 %v7174_v12, %v7171_v37  ;;  %v7197_v17 = vsub.f32 %v7041_v35, %v4913_v58 }
 0xc1f   : > { %v2610_v47 = vpop.f32.mrf.mxu1  ;;  %5011 = vmatprep.subr.bf16.mxu0 %v6817_v7 }
 0xc20   : > { %4979 = vmatprep.mubr.bf16.mxu0 %v2795_v30  ;;  %v7191_v2 = vsub.f32 %v7035_v33, %v2610_v47 }
 0xc21   : > { %v4914_v15 = vpop.f32.mrf.mxu1  ;;  %4980 = vmatmul.mubr.bf16.vlgmr.msra.gmra.mxu0 %v2796_v5 }
 0xc22   : > { %5012 = vmatpush3.bf16.msra.mxu0 %v6817_v7  ;;  %v7187_v20 = vsub.f32 %v7031_v25, %v4914_v15 }
 0xc23   : > { %v2613_v50 = vpop.f32.mrf.mxu1  ;;  %5013 = vmatprep.subr.bf16.mxu0 %v6971_v45 }
 0xc24   : > { %v7194_v27 = vsub.f32 %v7038_v31, %v2613_v50  ;;  %v2798_v25 = vpack.c.bf16 %v7187_v20, %v7197_v17 }
 0xc26   : > { %v2797_v48 = vpack.c.bf16 %v7194_v27, %v7191_v2  ;;  %5014 = vmatpush3.bf16.msra.mxu0 %v6971_v45 }
 0xc27   : > { %5015 = vmatprep.subr.bf16.mxu0 %v6988_v38 }
 0xc28   : > { %4983 = vmatprep.mubr.bf16.mxu0 %v2797_v48 }
 0xc29   : > { %4984 = vmatmul.mubr.bf16.gmra.mxu0 %v2798_v25 }
 0xc2a   : > { %5016 = vmatpush3.bf16.msra.mxu0 %v6988_v38 }
 0xc2b   : > { %5017 = vmatprep.subr.bf16.mxu0 %v6992_v3 }
 0xc2e   : > { %5018 = vmatpush3.bf16.msra.mxu0 %v6992_v3 }
 0xc2f   : > { %5019 = vmatprep.subr.bf16.mxu0 %v6996_v22 }
 0xc32   : > { %5020 = vmatpush3.bf16.msra.mxu0 %v6996_v22 }
 0xc33   : > { %5021 = vmatprep.subr.bf16.mxu0 %v7000_v8 }
 0xc36   : > { %5022 = vmatpush3.bf16.msra.mxu0 %v7000_v8 }
 0xc37   : > { %5023 = vmatprep.subr.bf16.mxu0 %v7004_v28 }
 0xc3a   : > { %5024 = vmatpush3.bf16.msra.mxu0 %v7004_v28 }
 0xc3b   : > { %5025 = vmatprep.subr.bf16.mxu0 %v7011_v1 }
 0xc3e   : > { %5026 = vmatpush3.bf16.msra.mxu0 %v7011_v1 }
 0xc3f   : > { %5059 = vmatprep.subr.bf16.mxu0 %v6817_v7 }
 0xcc1   : > { %v4933_v33 = vpop.f32.mrf.mxu0 }
 0xcc3   : > { %v2671_v31 = vpop.f32.mrf.mxu0 }
 0xcc4   : > { %5516 = vtanh.f32 %v2671_v31 }
 0xcc5   : > { %v4934_v35 = vpop.f32.mrf.mxu0 }
 0xcc6   : > { %5518 = vtanh.f32 %v4934_v35 }
 0xcc7   : > { %5520 = vtanh.f32 %v4933_v33  ;;  %v2674_v44 = vpop.f32.mrf.mxu0 }
 0xcc8   : > { %5522 = vtanh.f32 %v2674_v44 }
 0xcc9   : > { %v4937_v32 = vpop.f32.mrf.mxu0 }
 0xccb   : > { %v2687_v6 = vpop.f32.mrf.mxu0 }
 0xccc   : > { %5524 = vtanh.f32 %v2687_v6 }
 0xccd   : > { %v4938_v46 = vpop.f32.mrf.mxu0 }
 0xcce   : > { %5526 = vtanh.f32 %v4938_v46 }
 0xccf   : > { %5528 = vtanh.f32 %v4937_v32  ;;  %v2690_v34 = vpop.f32.mrf.mxu0 }
 0xcd0   : > { %5530 = vtanh.f32 %v2690_v34 }
 0xcd1   : > { %v5517_v0 = vpop.eup %5516 }
 0xcd2   : > { %v2710_v26 = vsub.f32 %v7125_v51, %v5517_v0 }
 0xcd3   : > { %v5519_v53 = vpop.eup %5518 }
 0xcd4   : > { %v5521_v11 = vpop.eup %5520  ;;  %v2713_v13 = vsub.f32 %v7122_v56, %v5519_v53 }
 0xcd5   : > { %v5523_v7 = vpop.eup %5522  ;;  %v2712_v16 = vsub.f32 %v7131_v14, %v5521_v11 }
 0xcd6   : > { %v2711_v59 = vsub.f32 %v7128_v9, %v5523_v7 }
 0xcd7   : > { %v2719_v60 = vpack.c.bf16 %v2713_v13, %v2712_v16 }
 0xcd8   : > { %v2718_v63 = vpack.c.bf16 %v2711_v59, %v2710_v26 }
 0xcd9   : > { %v5525_v41 = vpop.eup %5524 }
 0xcda   : > { %4955 = vmatprep.mubr.bf16.mxu1 %v2718_v63  ;;  %v2714_v39 = vsub.f32 %v7143_v43, %v5525_v41 }
 0xcdb   : > { %v5527_v36 = vpop.eup %5526  ;;  %4956 = vmatmul.mubr.bf16.vlgmr.msra.gmra.mxu1 %v2719_v60 }
 0xcdc   : > { %v5529_v24 = vpop.eup %5528  ;;  %4988 = vmatpush3.bf16.msra.mxu1 %v6903_v4  ;;  %v2717_v61 = vsub.f32 %v7139_v19, %v5527_v36 }
 0xcdd   : > { %v5531_v49 = vpop.eup %5530  ;;  %4989 = vmatprep.subr.bf16.mxu1 %v6906_v54  ;;  %v2716_v58 = vsub.f32 %v7149_v62, %v5529_v24 }
 0xcde   : > { %v2715_v52 = vsub.f32 %v7146_v10, %v5531_v49 }
 0xcdf   : > { %v2721_v47 = vpack.c.bf16 %v2717_v61, %v2716_v58 }
 0xce0   : > { %4990 = vmatpush3.bf16.msra.mxu1 %v6906_v54  ;;  %v2720_v30 = vpack.c.bf16 %v2715_v52, %v2714_v39 }
 0xce1   : > { %v4981_v5 = vpop.f32.mrf.mxu0  ;;  %4991 = vmatprep.subr.bf16.mxu1 %v7072_v57 }
 0xce2   : > { %4959 = vmatprep.mubr.bf16.mxu1 %v2720_v30 }
 0xce3   : > { %4960 = vmatmul.mubr.bf16.gmra.mxu1 %v2721_v47  ;;  %v2833_v15 = vpop.f32.mrf.mxu0 }
 0xce4   : > { %4992 = vmatpush3.bf16.msra.mxu1 %v7072_v57  ;;  %5532 = vtanh.f32 %v2833_v15 }
 0xce5   : > { %v4982_v50 = vpop.f32.mrf.mxu0  ;;  %4993 = vmatprep.subr.bf16.mxu1 %v7076_v23 }
 0xce6   : > { %5534 = vtanh.f32 %v4982_v50 }
 0xce7   : > { %5536 = vtanh.f32 %v4981_v5  ;;  %v2836_v48 = vpop.f32.mrf.mxu0 }
 0xce8   : > { %5538 = vtanh.f32 %v2836_v48  ;;  %4994 = vmatpush3.bf16.msra.mxu1 %v7076_v23 }
 0xce9   : > { %v4985_v25 = vpop.f32.mrf.mxu0  ;;  %4995 = vmatprep.subr.bf16.mxu1 %v7080_v29 }
 0xceb   : > { %v2849_v33 = vpop.f32.mrf.mxu0 }
 0xcec   : > { %4996 = vmatpush3.bf16.msra.mxu1 %v7080_v29  ;;  %5540 = vtanh.f32 %v2849_v33  ;;  %v7281_v33 = vld [vmem:[#allocation5 + $0x38] sm:$0xff]  }
 0xced   : > { %v4986_v31 = vpop.f32.mrf.mxu0  ;;  %4997 = vmatprep.subr.bf16.mxu1 %v7084_v18 }
 0xcee   : > { %5542 = vtanh.f32 %v4986_v31 }
 0xcef   : > { %5544 = vtanh.f32 %v4985_v25  ;;  %v2852_v35 = vpop.f32.mrf.mxu0 }
 0xcf0   : > { %5546 = vtanh.f32 %v2852_v35  ;;  %4998 = vmatpush3.bf16.msra.mxu1 %v7084_v18 }
 0xcf1   : > { %4999 = vmatprep.subr.bf16.mxu1 %v7088_v55  ;;  %v5533_v44 = vpop.eup %5532 }
 0xcf2   : > { %v2872_v0 = vsub.f32 %v7171_v37, %v5533_v44 }
 0xcf3   : > { %v5535_v32 = vpop.eup %5534 }
 0xcf4   : > { %v5537_v6 = vpop.eup %5536  ;;  %5000 = vmatpush3.bf16.msra.mxu1 %v7088_v55  ;;  %v2875_v34 = vsub.f32 %v7167_v40, %v5535_v32 }
 0xcf5   : > { %v5539_v46 = vpop.eup %5538  ;;  %5001 = vmatprep.subr.bf16.mxu1 %v7092_v42  ;;  %v2874_v11 = vsub.f32 %v7177_v21, %v5537_v6 }
 0xcf6   : > { %v2873_v53 = vsub.f32 %v7174_v12, %v5539_v46 }
 0xcf7   : > { %v2881_v13 = vpack.c.bf16 %v2875_v34, %v2874_v11 }
 0xcf8   : > { %5002 = vmatpush3.bf16.msra.mxu1 %v7092_v42  ;;  %v2880_v7 = vpack.c.bf16 %v2873_v53, %v2872_v0 }
 0xcf9   : > { %5035 = vmatprep.subr.bf16.mxu1 %v6903_v4  ;;  %v5541_v26 = vpop.eup %5540 }
 0xcfa   : > { %5003 = vmatprep.mubr.bf16.mxu1 %v2880_v7  ;;  %v2876_v41 = vsub.f32 %v7191_v2, %v5541_v26 }
 0xcfb   : > { %v5543_v59 = vpop.eup %5542  ;;  %5004 = vmatmul.mubr.bf16.vlgmr.msra.gmra.mxu1 %v2881_v13 }
 0xcfc   : > { %v5545_v16 = vpop.eup %5544  ;;  %5036 = vmatpush3.bf16.msra.mxu1 %v6903_v4  ;;  %v2879_v60 = vsub.f32 %v7187_v20, %v5543_v59 }
 0xcfd   : > { %v5547_v63 = vpop.eup %5546  ;;  %5037 = vmatprep.subr.bf16.mxu1 %v6906_v54  ;;  %v2878_v24 = vsub.f32 %v7197_v17, %v5545_v16 }
 0xcfe   : > { %v2877_v36 = vsub.f32 %v7194_v27, %v5547_v63 }
 0xcff   : > { %v2883_v61 = vpack.c.bf16 %v2879_v60, %v2878_v24 }
 0xd00   : > { %v2882_v49 = vpack.c.bf16 %v2877_v36, %v2876_v41  ;;  %5038 = vmatpush3.bf16.msra.mxu1 %v6906_v54 }
 0xd01   : > { %5039 = vmatprep.subr.bf16.mxu1 %v7072_v57 }
 0xd02   : > { %5007 = vmatprep.mubr.bf16.mxu1 %v2882_v49 }
 0xd03   : > { %5008 = vmatmul.mubr.bf16.gmra.mxu1 %v2883_v61 }
 0xd04   : > { %5040 = vmatpush3.bf16.msra.mxu1 %v7072_v57 }
 0xd05   : > { %5041 = vmatprep.subr.bf16.mxu1 %v7076_v23 }
 0xd08   : > { %5042 = vmatpush3.bf16.msra.mxu1 %v7076_v23 }
 0xd09   : > { %5043 = vmatprep.subr.bf16.mxu1 %v7080_v29 }
 0xd0c   : > { %5044 = vmatpush3.bf16.msra.mxu1 %v7080_v29 }
 0xd0d   : > { %5045 = vmatprep.subr.bf16.mxu1 %v7084_v18 }
 0xd10   : > { %5046 = vmatpush3.bf16.msra.mxu1 %v7084_v18 }
 0xd11   : > { %5047 = vmatprep.subr.bf16.mxu1 %v7088_v55 }
 0xd14   : > { %5048 = vmatpush3.bf16.msra.mxu1 %v7088_v55 }
 0xd15   : > { %5049 = vmatprep.subr.bf16.mxu1 %v7092_v42 }
 0xd18   : > { %5050 = vmatpush3.bf16.msra.mxu1 %v7092_v42 }
 0xd19   : > { %5083 = vmatprep.subr.bf16.mxu1 %v6903_v4 }
 0xd9b   : > { %v4957_v54 = vpop.f32.mrf.mxu1 }
 0xd9c   : > { %v7275_v15 = vsub.f32 %v7131_v14, %v4957_v54 }
 0xd9d   : > { %v2756_v39 = vpop.f32.mrf.mxu1 }
 0xd9e   : > { %v7269_v5 = vsub.f32 %v7125_v51, %v2756_v39 }
 0xd9f   : > { %v4958_v52 = vpop.f32.mrf.mxu1 }
 0xda0   : > { %v7266_v58 = vsub.f32 %v7122_v56, %v4958_v52 }
 0xda1   : > { %v2759_v30 = vpop.f32.mrf.mxu1 }
 0xda2   : > { %v7272_v47 = vsub.f32 %v7128_v9, %v2759_v30  ;;  %v2958_v48 = vpack.c.bf16 %v7266_v58, %v7275_v15 }
 0xda3   : > { %v4961_v50 = vpop.f32.mrf.mxu1 }
 0xda4   : > { %v2957_v4 = vpack.c.bf16 %v7272_v47, %v7269_v5  ;;  %v7295_v35 = vsub.f32 %v7149_v62, %v4961_v50  ;;  %v7367_v50 = vld [vmem:[#allocation7 + $0x38] sm:$0xff]  }
 0xda5   : > { %v2772_v25 = vpop.f32.mrf.mxu1 }
 0xda6   : > { %5027 = vmatprep.mubr.bf16.mxu0 %v2957_v4  ;;  %v7289_v14 = vsub.f32 %v7143_v43, %v2772_v25 }
 0xda7   : > { %v4962_v56 = vpop.f32.mrf.mxu1  ;;  %5028 = vmatmul.mubr.bf16.vlgmr.msra.gmra.mxu0 %v2958_v48  ;;  %v7370_v48 = vld [vmem:[#allocation7 + $0x30] sm:$0xff]  }
 0xda8   : > { %5060 = vmatpush3.bf16.msra.mxu0 %v7281_v33  ;;  %v7285_v51 = vsub.f32 %v7139_v19, %v4962_v56 }
 0xda9   : > { %v2775_v9 = vpop.f32.mrf.mxu1  ;;  %5061 = vmatprep.subr.bf16.mxu0 %v6971_v45 }
 0xdaa   : > { %v7292_v31 = vsub.f32 %v7146_v10, %v2775_v9  ;;  %v2960_v19 = vpack.c.bf16 %v7285_v51, %v7295_v35 }
 0xdac   : > { %5062 = vmatpush3.bf16.msra.mxu0 %v6971_v45  ;;  %v2959_v44 = vpack.c.bf16 %v7292_v31, %v7289_v14 }
 0xdad   : > { %5063 = vmatprep.subr.bf16.mxu0 %v6988_v38 }
 0xdae   : > { %5031 = vmatprep.mubr.bf16.mxu0 %v2959_v44 }
 0xdaf   : > { %5032 = vmatmul.mubr.bf16.gmra.mxu0 %v2960_v19 }
 0xdb0   : > { %5064 = vmatpush3.bf16.msra.mxu0 %v6988_v38 }
 0xdb1   : > { %5065 = vmatprep.subr.bf16.mxu0 %v6992_v3 }
 0xdb4   : > { %5066 = vmatpush3.bf16.msra.mxu0 %v6992_v3 }
 0xdb5   : > { %5067 = vmatprep.subr.bf16.mxu0 %v6996_v22 }
 0xdb8   : > { %5068 = vmatpush3.bf16.msra.mxu0 %v6996_v22 }
 0xdb9   : > { %5069 = vmatprep.subr.bf16.mxu0 %v7000_v8 }
 0xdbb   : > { %v5005_v43 = vpop.f32.mrf.mxu1 }
 0xdbc   : > { %5070 = vmatpush3.bf16.msra.mxu0 %v7000_v8  ;;  %v7323_v0 = vsub.f32 %v7177_v21, %v5005_v43 }
 0xdbd   : > { %v2918_v10 = vpop.f32.mrf.mxu1  ;;  %5071 = vmatprep.subr.bf16.mxu0 %v7004_v28 }
 0xdbe   : > { %v7317_v46 = vsub.f32 %v7171_v37, %v2918_v10 }
 0xdbf   : > { %v5006_v62 = vpop.f32.mrf.mxu1 }
 0xdc0   : > { %5072 = vmatpush3.bf16.msra.mxu0 %v7004_v28  ;;  %v7313_v32 = vsub.f32 %v7167_v40, %v5006_v62 }
 0xdc1   : > { %v2921_v6 = vpop.f32.mrf.mxu1  ;;  %5073 = vmatprep.subr.bf16.mxu0 %v7011_v1 }
 0xdc2   : > { %v7320_v34 = vsub.f32 %v7174_v12, %v2921_v6  ;;  %v3120_v40 = vpack.c.bf16 %v7313_v32, %v7323_v0 }
 0xdc3   : > { %v5009_v53 = vpop.f32.mrf.mxu1 }
 0xdc4   : > { %5074 = vmatpush3.bf16.msra.mxu0 %v7011_v1  ;;  %v3119_v11 = vpack.c.bf16 %v7320_v34, %v7317_v46  ;;  %v7343_v59 = vsub.f32 %v7197_v17, %v5009_v53 }
 0xdc5   : > { %v2934_v7 = vpop.f32.mrf.mxu1  ;;  %5107 = vmatprep.subr.bf16.mxu0 %v7281_v33 }
 0xdc6   : > { %5075 = vmatprep.mubr.bf16.mxu0 %v3119_v11  ;;  %v7337_v13 = vsub.f32 %v7191_v2, %v2934_v7 }
 0xdc7   : > { %v5010_v37 = vpop.f32.mrf.mxu1  ;;  %5076 = vmatmul.mubr.bf16.vlgmr.msra.gmra.mxu0 %v3120_v40 }
 0xdc8   : > { %5108 = vmatpush3.bf16.msra.mxu0 %v7281_v33  ;;  %v7333_v12 = vsub.f32 %v7187_v20, %v5010_v37 }
 0xdc9   : > { %v2937_v21 = vpop.f32.mrf.mxu1  ;;  %5109 = vmatprep.subr.bf16.mxu0 %v6971_v45 }
 0xdca   : > { %v7340_v26 = vsub.f32 %v7194_v27, %v2937_v21  ;;  %v3122_v20 = vpack.c.bf16 %v7333_v12, %v7343_v59 }
 0xdcc   : > { %v3121_v16 = vpack.c.bf16 %v7340_v26, %v7337_v13  ;;  %5110 = vmatpush3.bf16.msra.mxu0 %v6971_v45 }
 0xdcd   : > { %5111 = vmatprep.subr.bf16.mxu0 %v6988_v38 }
 0xdce   : > { %5079 = vmatprep.mubr.bf16.mxu0 %v3121_v16 }
 0xdcf   : > { %5080 = vmatmul.mubr.bf16.gmra.mxu0 %v3122_v20 }
 0xdd0   : > { %5112 = vmatpush3.bf16.msra.mxu0 %v6988_v38 }
 0xdd1   : > { %5113 = vmatprep.subr.bf16.mxu0 %v6992_v3 }
 0xdd4   : > { %5114 = vmatpush3.bf16.msra.mxu0 %v6992_v3 }
 0xdd5   : > { %5115 = vmatprep.subr.bf16.mxu0 %v6996_v22 }
 0xdd8   : > { %5116 = vmatpush3.bf16.msra.mxu0 %v6996_v22 }
 0xdd9   : > { %5117 = vmatprep.subr.bf16.mxu0 %v7000_v8 }
 0xddc   : > { %5118 = vmatpush3.bf16.msra.mxu0 %v7000_v8 }
 0xddd   : > { %5119 = vmatprep.subr.bf16.mxu0 %v7004_v28 }
 0xde0   : > { %5120 = vmatpush3.bf16.msra.mxu0 %v7004_v28 }
 0xde1   : > { %5121 = vmatprep.subr.bf16.mxu0 %v7011_v1 }
 0xde4   : > { %5122 = vmatpush3.bf16.msra.mxu0 %v7011_v1 }
 0xde5   : > { %5155 = vmatprep.subr.bf16.mxu0 %v7281_v33 }
 0xe67   : > { %v5029_v45 = vpop.f32.mrf.mxu0 }
 0xe69   : > { %v2995_v38 = vpop.f32.mrf.mxu0 }
 0xe6a   : > { %5548 = vtanh.f32 %v2995_v38 }
 0xe6b   : > { %v5030_v3 = vpop.f32.mrf.mxu0 }
 0xe6c   : > { %5550 = vtanh.f32 %v5030_v3 }
 0xe6d   : > { %5552 = vtanh.f32 %v5029_v45  ;;  %v2998_v22 = vpop.f32.mrf.mxu0 }
 0xe6e   : > { %5554 = vtanh.f32 %v2998_v22 }
 0xe6f   : > { %v5033_v2 = vpop.f32.mrf.mxu0 }
 0xe71   : > { %v3011_v8 = vpop.f32.mrf.mxu0 }
 0xe72   : > { %5556 = vtanh.f32 %v3011_v8 }
 0xe73   : > { %v5034_v27 = vpop.f32.mrf.mxu0 }
 0xe74   : > { %5558 = vtanh.f32 %v5034_v27 }
 0xe75   : > { %5560 = vtanh.f32 %v5033_v2  ;;  %v3014_v28 = vpop.f32.mrf.mxu0 }
 0xe76   : > { %5562 = vtanh.f32 %v3014_v28 }
 0xe77   : > { %v5549_v17 = vpop.eup %5548 }
 0xe78   : > { %v3034_v36 = vsub.f32 %v7269_v5, %v5549_v17 }
 0xe79   : > { %v5551_v1 = vpop.eup %5550 }
 0xe7a   : > { %v5553_v63 = vpop.eup %5552  ;;  %v3037_v41 = vsub.f32 %v7266_v58, %v5551_v1 }
 0xe7b   : > { %v5555_v60 = vpop.eup %5554  ;;  %v3036_v49 = vsub.f32 %v7275_v15, %v5553_v63 }
 0xe7c   : > { %v3035_v24 = vsub.f32 %v7272_v47, %v5555_v60 }
 0xe7d   : > { %v3043_v54 = vpack.c.bf16 %v3037_v41, %v3036_v49 }
 0xe7e   : > { %v3042_v61 = vpack.c.bf16 %v3035_v24, %v3034_v36 }
 0xe7f   : > { %v5557_v39 = vpop.eup %5556 }
 0xe80   : > { %5051 = vmatprep.mubr.bf16.mxu1 %v3042_v61  ;;  %v3038_v56 = vsub.f32 %v7289_v14, %v5557_v39 }
 0xe81   : > { %v5559_v52 = vpop.eup %5558  ;;  %5052 = vmatmul.mubr.bf16.vlgmr.msra.gmra.mxu1 %v3043_v54 }
 0xe82   : > { %v5561_v30 = vpop.eup %5560  ;;  %5084 = vmatpush3.bf16.msra.mxu1 %v7367_v50  ;;  %v3041_v25 = vsub.f32 %v7285_v51, %v5559_v52 }
 0xe83   : > { %v5563_v4 = vpop.eup %5562  ;;  %5085 = vmatprep.subr.bf16.mxu1 %v7370_v48  ;;  %v3040_v44 = vsub.f32 %v7295_v35, %v5561_v30 }
 0xe84   : > { %v3039_v9 = vsub.f32 %v7292_v31, %v5563_v4 }
 0xe85   : > { %v3045_v10 = vpack.c.bf16 %v3041_v25, %v3040_v44 }
 0xe86   : > { %5086 = vmatpush3.bf16.msra.mxu1 %v7370_v48  ;;  %v3044_v19 = vpack.c.bf16 %v3039_v9, %v3038_v56  ;;  %v5647_v56 = vld [vmem:[#allocation5 + $0x30] sm:$0xff]  }
 0xe87   : > { %v5077_v43 = vpop.f32.mrf.mxu0  ;;  %5087 = vmatprep.subr.bf16.mxu1 %v7072_v57 }
 0xe88   : > { %5055 = vmatprep.mubr.bf16.mxu1 %v3044_v19 }
 0xe89   : > { %5056 = vmatmul.mubr.bf16.gmra.mxu1 %v3045_v10  ;;  %v3157_v62 = vpop.f32.mrf.mxu0 }
 0xe8a   : > { %5088 = vmatpush3.bf16.msra.mxu1 %v7072_v57  ;;  %5564 = vtanh.f32 %v3157_v62  ;;  %v5652_v62 = vld [vmem:[#allocation5 + $0x8] sm:$0xff]  }
 0xe8b   : > { %v5078_v6 = vpop.f32.mrf.mxu0  ;;  %5089 = vmatprep.subr.bf16.mxu1 %v7076_v23 }
 0xe8c   : > { %5566 = vtanh.f32 %v5078_v6 }
 0xe8d   : > { %5568 = vtanh.f32 %v5077_v43  ;;  %v3160_v53 = vpop.f32.mrf.mxu0 }
 0xe8e   : > { %5570 = vtanh.f32 %v3160_v53  ;;  %5090 = vmatpush3.bf16.msra.mxu1 %v7076_v23 }
 0xe8f   : > { %v5081_v11 = vpop.f32.mrf.mxu0  ;;  %5091 = vmatprep.subr.bf16.mxu1 %v7080_v29 }
 0xe91   : > { %v3173_v40 = vpop.f32.mrf.mxu0 }
 0xe92   : > { %5092 = vmatpush3.bf16.msra.mxu1 %v7080_v29  ;;  %5572 = vtanh.f32 %v3173_v40  ;;  %v5653_v40 = vld [vmem:[#allocation5] sm:$0xff]  }
 0xe93   : > { %v5082_v7 = vpop.f32.mrf.mxu0  ;;  %5093 = vmatprep.subr.bf16.mxu1 %v7084_v18 }
 0xe94   : > { %5574 = vtanh.f32 %v5082_v7 }
 0xe95   : > { %5576 = vtanh.f32 %v5081_v11  ;;  %v3176_v37 = vpop.f32.mrf.mxu0 }
 0xe96   : > { %5578 = vtanh.f32 %v3176_v37  ;;  %5094 = vmatpush3.bf16.msra.mxu1 %v7084_v18 }
 0xe97   : > { %5095 = vmatprep.subr.bf16.mxu1 %v7088_v55  ;;  %v5565_v21 = vpop.eup %5564 }
 0xe98   : > { %v3196_v3 = vsub.f32 %v7317_v46, %v5565_v21 }
 0xe99   : > { %v5567_v16 = vpop.eup %5566 }
 0xe9a   : > { %v5569_v20 = vpop.eup %5568  ;;  %5096 = vmatpush3.bf16.msra.mxu1 %v7088_v55  ;;  %v3199_v38 = vsub.f32 %v7313_v32, %v5567_v16 }
 0xe9b   : > { %v5571_v45 = vpop.eup %5570  ;;  %5097 = vmatprep.subr.bf16.mxu1 %v7092_v42  ;;  %v3198_v2 = vsub.f32 %v7323_v0, %v5569_v20 }
 0xe9c   : > { %v3197_v22 = vsub.f32 %v7320_v34, %v5571_v45 }
 0xe9d   : > { %v3205_v27 = vpack.c.bf16 %v3199_v38, %v3198_v2 }
 0xe9e   : > { %5098 = vmatpush3.bf16.msra.mxu1 %v7092_v42  ;;  %v3204_v8 = vpack.c.bf16 %v3197_v22, %v3196_v3 }
 0xe9f   : > { %5131 = vmatprep.subr.bf16.mxu1 %v7367_v50  ;;  %v5573_v28 = vpop.eup %5572 }
 0xea0   : > { %5099 = vmatprep.mubr.bf16.mxu1 %v3204_v8  ;;  %v3200_v41 = vsub.f32 %v7337_v13, %v5573_v28 }
 0xea1   : > { %v5575_v17 = vpop.eup %5574  ;;  %5100 = vmatmul.mubr.bf16.vlgmr.msra.gmra.mxu1 %v3205_v27 }
 0xea2   : > { %v5577_v1 = vpop.eup %5576  ;;  %5132 = vmatpush3.bf16.msra.mxu1 %v7367_v50  ;;  %v3203_v60 = vsub.f32 %v7333_v12, %v5575_v17 }
 0xea3   : > { %v5579_v63 = vpop.eup %5578  ;;  %5133 = vmatprep.subr.bf16.mxu1 %v7370_v48  ;;  %v3202_v24 = vsub.f32 %v7343_v59, %v5577_v1 }
 0xea4   : > { %v3201_v36 = vsub.f32 %v7340_v26, %v5579_v63 }
 0xea5   : > { %v3207_v61 = vpack.c.bf16 %v3203_v60, %v3202_v24 }
 0xea6   : > { %v3206_v49 = vpack.c.bf16 %v3201_v36, %v3200_v41  ;;  %5134 = vmatpush3.bf16.msra.mxu1 %v7370_v48 }
 0xea7   : > { %5135 = vmatprep.subr.bf16.mxu1 %v7072_v57 }
 0xea8   : > { %5103 = vmatprep.mubr.bf16.mxu1 %v3206_v49 }
 0xea9   : > { %5104 = vmatmul.mubr.bf16.gmra.mxu1 %v3207_v61 }
 0xeaa   : > { %5136 = vmatpush3.bf16.msra.mxu1 %v7072_v57 }
 0xeab   : > { %5137 = vmatprep.subr.bf16.mxu1 %v7076_v23 }
 0xeae   : > { %5138 = vmatpush3.bf16.msra.mxu1 %v7076_v23 }
 0xeaf   : > { %5139 = vmatprep.subr.bf16.mxu1 %v7080_v29 }
 0xeb2   : > { %5140 = vmatpush3.bf16.msra.mxu1 %v7080_v29 }
 0xeb3   : > { %5141 = vmatprep.subr.bf16.mxu1 %v7084_v18 }
 0xeb6   : > { %5142 = vmatpush3.bf16.msra.mxu1 %v7084_v18 }
 0xeb7   : > { %5143 = vmatprep.subr.bf16.mxu1 %v7088_v55 }
 0xeba   : > { %5144 = vmatpush3.bf16.msra.mxu1 %v7088_v55 }
 0xebb   : > { %5145 = vmatprep.subr.bf16.mxu1 %v7092_v42 }
 0xebe   : > { %5146 = vmatpush3.bf16.msra.mxu1 %v7092_v42 }
 0xebf   : > { %5179 = vmatprep.subr.bf16.mxu1 %v7367_v50 }
 0xf41   : > { %v5053_v57 = vpop.f32.mrf.mxu1 }
 0xf42   : > { %v7425_v55 = vsub.f32 %v7275_v15, %v5053_v57 }
 0xf43   : > { %v3080_v23 = vpop.f32.mrf.mxu1 }
 0xf44   : > { %v7419_v52 = vsub.f32 %v7269_v5, %v3080_v23 }
 0xf45   : > { %v5054_v54 = vpop.f32.mrf.mxu1 }
 0xf46   : > { %v7416_v39 = vsub.f32 %v7266_v58, %v5054_v54 }
 0xf47   : > { %v3083_v29 = vpop.f32.mrf.mxu1 }
 0xf48   : > { %v7422_v18 = vsub.f32 %v7272_v47, %v3083_v29  ;;  %v3282_v4 = vpack.c.bf16 %v7416_v39, %v7425_v55 }
 0xf49   : > { %v5057_v30 = vpop.f32.mrf.mxu1 }
 0xf4a   : > { %v3281_v42 = vpack.c.bf16 %v7422_v18, %v7419_v52  ;;  %v7442_v44 = vsub.f32 %v7295_v35, %v5057_v30  ;;  %v5651_v35 = vld [vmem:[#allocation5 + $0x10] sm:$0xff]  }
 0xf4b   : > { %v3096_v25 = vpop.f32.mrf.mxu1 }
 0xf4c   : > { %5123 = vmatprep.mubr.bf16.mxu0 %v3281_v42  ;;  %v7436_v15 = vsub.f32 %v7289_v14, %v3096_v25  ;;  %v5649_v14 = vld [vmem:[#allocation5 + $0x20] sm:$0xff]  }
 0xf4d   : > { %v5058_v58 = vpop.f32.mrf.mxu1  ;;  %5124 = vmatmul.mubr.bf16.vlgmr.msra.gmra.mxu0 %v3282_v4 }
 0xf4e   : > { %5156 = vmatpush3.bf16.msra.mxu0 %v7281_v33  ;;  %v7433_v5 = vsub.f32 %v7285_v51, %v5058_v58  ;;  %v5648_v51 = vld [vmem:[#allocation5 + $0x28] sm:$0xff]  }
 0xf4f   : > { %v3099_v47 = vpop.f32.mrf.mxu1  ;;  %5157 = vmatprep.subr.bf16.mxu0 %v5647_v56 }
 0xf50   : > { %v7439_v9 = vsub.f32 %v7292_v31, %v3099_v47  ;;  %v3284_v33 = vpack.c.bf16 %v7433_v5, %v7442_v44  ;;  %v5650_v31 = vld [vmem:[#allocation5 + $0x18] sm:$0xff]  }
 0xf52   : > { %5158 = vmatpush3.bf16.msra.mxu0 %v5647_v56  ;;  %v3283_v19 = vpack.c.bf16 %v7439_v9, %v7436_v15 }
 0xf53   : > { %5159 = vmatprep.subr.bf16.mxu0 %v5648_v51 }
 0xf54   : > { %5127 = vmatprep.mubr.bf16.mxu0 %v3283_v19 }
 0xf55   : > { %5128 = vmatmul.mubr.bf16.gmra.mxu0 %v3284_v33 }
 0xf56   : > { %5160 = vmatpush3.bf16.msra.mxu0 %v5648_v51 }
 0xf57   : > { %5161 = vmatprep.subr.bf16.mxu0 %v5649_v14 }
 0xf5a   : > { %5162 = vmatpush3.bf16.msra.mxu0 %v5649_v14  ;;  %v5654_v14 = vld [vmem:[#allocation7 + $0x28] sm:$0xff]  }
 0xf5b   : > { %5163 = vmatprep.subr.bf16.mxu0 %v5650_v31 }
 0xf5e   : > { %5164 = vmatpush3.bf16.msra.mxu0 %v5650_v31 }
 0xf5f   : > { %5165 = vmatprep.subr.bf16.mxu0 %v5651_v35 }
 0xf61   : > { %v5101_v43 = vpop.f32.mrf.mxu1 }
 0xf62   : > { %5166 = vmatpush3.bf16.msra.mxu0 %v5651_v35  ;;  %v7458_v21 = vsub.f32 %v7323_v0, %v5101_v43  ;;  %v5655_v35 = vld [vmem:[#allocation7 + $0x20] sm:$0xff]  }
 0xf63   : > { %v3242_v10 = vpop.f32.mrf.mxu1  ;;  %5167 = vmatprep.subr.bf16.mxu0 %v5652_v62 }
 0xf64   : > { %v7452_v7 = vsub.f32 %v7317_v46, %v3242_v10 }
 0xf65   : > { %v5102_v6 = vpop.f32.mrf.mxu1 }
 0xf66   : > { %5168 = vmatpush3.bf16.msra.mxu0 %v5652_v62  ;;  %v7449_v53 = vsub.f32 %v7313_v32, %v5102_v6 }
 0xf67   : > { %v3245_v11 = vpop.f32.mrf.mxu1  ;;  %5169 = vmatprep.subr.bf16.mxu0 %v5653_v40 }
 0xf68   : > { %v7455_v37 = vsub.f32 %v7320_v34, %v3245_v11  ;;  %v3444_v32 = vpack.c.bf16 %v7449_v53, %v7458_v21  ;;  %v5657_v11 = vld [vmem:[#allocation7 + $0x10] sm:$0xff]  }
 0xf69   : > { %v5105_v16 = vpop.f32.mrf.mxu1 }
 0xf6a   : > { %5170 = vmatpush3.bf16.msra.mxu0 %v5653_v40  ;;  %v3443_v20 = vpack.c.bf16 %v7455_v37, %v7452_v7  ;;  %v7474_v22 = vsub.f32 %v7343_v59, %v5105_v16  ;;  %v5658_v16 = vld [vmem:[#allocation7 + $0x8] sm:$0xff]  }
 0xf6b   : > { %v3258_v45 = vpop.f32.mrf.mxu1 }
 0xf6c   : > { %5171 = vmatprep.mubr.bf16.mxu0 %v3443_v20  ;;  %v7468_v3 = vsub.f32 %v7337_v13, %v3258_v45 }
 0xf6d   : > { %v5106_v38 = vpop.f32.mrf.mxu1  ;;  %5172 = vmatmul.mubr.bf16.vlgmr.msra.gmra.mxu0 %v3444_v32 }
 0xf6e   : > { %v7465_v46 = vsub.f32 %v7333_v12, %v5106_v38 }
 0xf6f   : > { %v3261_v34 = vpop.f32.mrf.mxu1 }
 0xf70   : > { %v7471_v0 = vsub.f32 %v7340_v26, %v3261_v34  ;;  %v3446_v8 = vpack.c.bf16 %v7465_v46, %v7474_v22 }
 0xf72   : > { %v3445_v2 = vpack.c.bf16 %v7471_v0, %v7468_v3 }
 0xf74   : > { %5175 = vmatprep.mubr.bf16.mxu0 %v3445_v2  ;;  %v5659_v2 = vld [vmem:[#allocation7] sm:$0xff]  }
 0xf75   : > { %5176 = vmatmul.mubr.bf16.gmra.mxu0 %v3446_v8 }
0x100d   : > { %v5125_v12 = vpop.f32.mrf.mxu0 }
0x100f   : > { %v3319_v27 = vpop.f32.mrf.mxu0 }
0x1010   : > { %5580 = vtanh.f32 %v3319_v27 }
0x1011   : > { %v5126_v28 = vpop.f32.mrf.mxu0 }
0x1012   : > { %5582 = vtanh.f32 %v5126_v28 }
0x1013   : > { %5584 = vtanh.f32 %v5125_v12  ;;  %v3322_v13 = vpop.f32.mrf.mxu0 }
0x1014   : > { %5586 = vtanh.f32 %v3322_v13 }
0x1015   : > { %v5129_v26 = vpop.f32.mrf.mxu0 }
0x1017   : > { %v3335_v17 = vpop.f32.mrf.mxu0 }
0x1018   : > { %5588 = vtanh.f32 %v3335_v17 }
0x1019   : > { %v5130_v59 = vpop.f32.mrf.mxu0 }
0x101a   : > { %5590 = vtanh.f32 %v5130_v59 }
0x101b   : > { %5592 = vtanh.f32 %v5129_v26  ;;  %v3338_v1 = vpop.f32.mrf.mxu0 }
0x101c   : > { %5594 = vtanh.f32 %v3338_v1 }
0x101d   : > { %v5581_v63 = vpop.eup %5580 }
0x101e   : > { %v3358_v49 = vsub.f32 %v7419_v52, %v5581_v63 }
0x101f   : > { %v5583_v60 = vpop.eup %5582 }
0x1020   : > { %v5585_v41 = vpop.eup %5584  ;;  %v3361_v24 = vsub.f32 %v7416_v39, %v5583_v60 }
0x1021   : > { %v5587_v36 = vpop.eup %5586  ;;  %v3360_v57 = vsub.f32 %v7425_v55, %v5585_v41 }
0x1022   : > { %v3359_v61 = vsub.f32 %v7422_v18, %v5587_v36 }
0x1023   : > { %v3367_v54 = vpack.c.bf16 %v3361_v24, %v3360_v57 }
0x1024   : > { %v3366_v23 = vpack.c.bf16 %v3359_v61, %v3358_v49 }
0x1025   : > { %v5589_v29 = vpop.eup %5588 }
0x1026   : > { %5147 = vmatprep.mubr.bf16.mxu1 %v3366_v23  ;;  %v3362_v58 = vsub.f32 %v7436_v15, %v5589_v29 }
0x1027   : > { %v5591_v30 = vpop.eup %5590  ;;  %5148 = vmatmul.mubr.bf16.vlgmr.msra.gmra.mxu1 %v3367_v54 }
0x1028   : > { %v5593_v42 = vpop.eup %5592  ;;  %5180 = vmatpush3.bf16.msra.mxu1 %v7367_v50  ;;  %v3365_v25 = vsub.f32 %v7433_v5, %v5591_v30 }
0x1029   : > { %v5595_v4 = vpop.eup %5594  ;;  %5181 = vmatprep.subr.bf16.mxu1 %v7370_v48  ;;  %v3364_v56 = vsub.f32 %v7442_v44, %v5593_v42 }
0x102a   : > { %v3363_v47 = vsub.f32 %v7439_v9, %v5595_v4 }
0x102b   : > { %v3369_v51 = vpack.c.bf16 %v3365_v25, %v3364_v56 }
0x102c   : > { %5182 = vmatpush3.bf16.msra.mxu1 %v7370_v48  ;;  %v3368_v19 = vpack.c.bf16 %v3363_v47, %v3362_v58  ;;  %v5656_v48 = vld [vmem:[#allocation7 + $0x18] sm:$0xff]  }
0x102d   : > { %v5173_v33 = vpop.f32.mrf.mxu0  ;;  %5183 = vmatprep.subr.bf16.mxu1 %v5654_v14 }
0x102e   : > { %5151 = vmatprep.mubr.bf16.mxu1 %v3368_v19 }
0x102f   : > { %5152 = vmatmul.mubr.bf16.gmra.mxu1 %v3369_v51  ;;  %v3481_v50 = vpop.f32.mrf.mxu0 }
0x1030   : > { %5184 = vmatpush3.bf16.msra.mxu1 %v5654_v14  ;;  %5596 = vtanh.f32 %v3481_v50 }
0x1031   : > { %v5174_v31 = vpop.f32.mrf.mxu0  ;;  %5185 = vmatprep.subr.bf16.mxu1 %v5655_v35 }
0x1032   : > { %5598 = vtanh.f32 %v5174_v31 }
0x1033   : > { %5600 = vtanh.f32 %v5173_v33  ;;  %v3484_v43 = vpop.f32.mrf.mxu0 }
0x1034   : > { %5602 = vtanh.f32 %v3484_v43  ;;  %5186 = vmatpush3.bf16.msra.mxu1 %v5655_v35 }
0x1035   : > { %v5177_v10 = vpop.f32.mrf.mxu0  ;;  %5187 = vmatprep.subr.bf16.mxu1 %v5656_v48 }
0x1037   : > { %v3497_v62 = vpop.f32.mrf.mxu0 }
0x1038   : > { %5188 = vmatpush3.bf16.msra.mxu1 %v5656_v48  ;;  %5604 = vtanh.f32 %v3497_v62 }
0x1039   : > { %v5178_v6 = vpop.f32.mrf.mxu0  ;;  %5189 = vmatprep.subr.bf16.mxu1 %v5657_v11 }
0x103a   : > { %5606 = vtanh.f32 %v5178_v6 }
0x103b   : > { %5608 = vtanh.f32 %v5177_v10  ;;  %v3500_v40 = vpop.f32.mrf.mxu0 }
0x103c   : > { %5610 = vtanh.f32 %v3500_v40  ;;  %5190 = vmatpush3.bf16.msra.mxu1 %v5657_v11 }
0x103d   : > { %5191 = vmatprep.subr.bf16.mxu1 %v5658_v16  ;;  %v5597_v20 = vpop.eup %5596 }
0x103e   : > { %v3520_v8 = vsub.f32 %v7452_v7, %v5597_v20 }
0x103f   : > { %v5599_v32 = vpop.eup %5598 }
0x1040   : > { %v5601_v45 = vpop.eup %5600  ;;  %5192 = vmatpush3.bf16.msra.mxu1 %v5658_v16  ;;  %v3523_v34 = vsub.f32 %v7449_v53, %v5599_v32 }
0x1041   : > { %v5603_v38 = vpop.eup %5602  ;;  %5193 = vmatprep.subr.bf16.mxu1 %v5659_v2  ;;  %v3522_v27 = vsub.f32 %v7458_v21, %v5601_v45 }
0x1042   : > { %v3521_v12 = vsub.f32 %v7455_v37, %v5603_v38 }
0x1043   : > { %v3529_v13 = vpack.c.bf16 %v3523_v34, %v3522_v27 }
0x1044   : > { %5194 = vmatpush3.bf16.msra.mxu1 %v5659_v2  ;;  %v3528_v28 = vpack.c.bf16 %v3521_v12, %v3520_v8 }
0x1045   : > { %v5605_v26 = vpop.eup %5604 }
0x1046   : > { %5195 = vmatprep.mubr.bf16.mxu1 %v3528_v28  ;;  %v3524_v60 = vsub.f32 %v7468_v3, %v5605_v26 }
0x1047   : > { %v5607_v17 = vpop.eup %5606  ;;  %5196 = vmatmul.mubr.bf16.vlgmr.msra.gmra.mxu1 %v3529_v13 }
0x1048   : > { %v5609_v59 = vpop.eup %5608  ;;  %v3527_v63 = vsub.f32 %v7465_v46, %v5607_v17 }
0x1049   : > { %v5611_v1 = vpop.eup %5610  ;;  %v3526_v36 = vsub.f32 %v7474_v22, %v5609_v59 }
0x104a   : > { %v3525_v41 = vsub.f32 %v7471_v0, %v5611_v1 }
0x104b   : > { %v3531_v49 = vpack.c.bf16 %v3527_v63, %v3526_v36 }
0x104c   : > { %v3530_v24 = vpack.c.bf16 %v3525_v41, %v3524_v60 }
0x104e   : > { %5199 = vmatprep.mubr.bf16.mxu1 %v3530_v24 }
0x104f   : > { %5200 = vmatmul.mubr.bf16.gmra.mxu1 %v3531_v49 }
0x10e7   : > { %v5149_v61 = vpop.f32.mrf.mxu1 }
0x10e8   : > { %v3437_v57 = vsub.f32 %v7425_v55, %v5149_v61 }
0x10e9   : > { %v3404_v23 = vpop.f32.mrf.mxu1 }
0x10ea   : > { %3607 = vst [vmem:[%s7502_s18 + $0x10] sm:$0xff] %v3437_v57  ;;  %v3435_v54 = vsub.f32 %v7419_v52, %v3404_v23 }
0x10eb   : > { %v5150_v29 = vpop.f32.mrf.mxu1 }
0x10ec   : > { %3605 = vst [vmem:[%s7502_s18] sm:$0xff] %v3435_v54  ;;  %v3438_v30 = vsub.f32 %v7416_v39, %v5150_v29 }
0x10ed   : > { %v3407_v55 = vpop.f32.mrf.mxu1 }
0x10ee   : > { %3608 = vst [vmem:[%s7502_s18 + $0x18] sm:$0xff] %v3438_v30  ;;  %v3436_v42 = vsub.f32 %v7422_v18, %v3407_v55 }
0x10ef   : > { %v5153_v4 = vpop.f32.mrf.mxu1 }
0x10f0   : > { %3606 = vst [vmem:[%s7502_s18 + $0x8] sm:$0xff] %v3436_v42  ;;  %v3441_v25 = vsub.f32 %v7442_v44, %v5153_v4 }
0x10f1   : > { %v3420_v58 = vpop.f32.mrf.mxu1 }
0x10f2   : > { %3611 = vst [vmem:[%s7502_s18 + $0x30] sm:$0xff] %v3441_v25  ;;  %v3439_v52 = vsub.f32 %v7436_v15, %v3420_v58 }
0x10f3   : > { %v5154_v47 = vpop.f32.mrf.mxu1 }
0x10f4   : > { %3609 = vst [vmem:[%s7502_s18 + $0x20] sm:$0xff] %v3439_v52  ;;  %v3442_v39 = vsub.f32 %v7433_v5, %v5154_v47 }
0x10f5   : > { %v3423_v56 = vpop.f32.mrf.mxu1 }
0x10f6   : > { %3612 = vst [vmem:[%s7502_s18 + $0x38] sm:$0xff] %v3442_v39  ;;  %v3440_v18 = vsub.f32 %v7439_v9, %v3423_v56 }
0x10f8   : > { %3610 = vst [vmem:[%s7502_s18 + $0x28] sm:$0xff] %v3440_v18 }
0x1107   : > { %v5197_v19 = vpop.f32.mrf.mxu1 }
0x1108   : > { %v3599_v44 = vsub.f32 %v7458_v21, %v5197_v19 }
0x1109   : > { %v3566_v33 = vpop.f32.mrf.mxu1 }
0x110a   : > { %3615 = vst [vmem:[%s7502_s18 + $0x50] sm:$0xff] %v3599_v44  ;;  %v3597_v15 = vsub.f32 %v7452_v7, %v3566_v33 }
0x110b   : > { %v5198_v51 = vpop.f32.mrf.mxu1 }
0x110c   : > { %3613 = vst [vmem:[%s7502_s18 + $0x40] sm:$0xff] %v3597_v15  ;;  %v3600_v5 = vsub.f32 %v7449_v53, %v5198_v51 }
0x110d   : > { %v3569_v14 = vpop.f32.mrf.mxu1 }
0x110e   : > { %3616 = vst [vmem:[%s7502_s18 + $0x58] sm:$0xff] %v3600_v5  ;;  %v3598_v9 = vsub.f32 %v7455_v37, %v3569_v14 }
0x110f   : > { %v5201_v50 = vpop.f32.mrf.mxu1 }
0x1110   : > { %3614 = vst [vmem:[%s7502_s18 + $0x48] sm:$0xff] %v3598_v9  ;;  %v3603_v21 = vsub.f32 %v7474_v22, %v5201_v50 }
0x1111   : > { %v3582_v31 = vpop.f32.mrf.mxu1 }
0x1112   : > { %3619 = vst [vmem:[%s7502_s18 + $0x70] sm:$0xff] %v3603_v21  ;;  %v3601_v7 = vsub.f32 %v7468_v3, %v3582_v31 }
0x1113   : > { %v5202_v35 = vpop.f32.mrf.mxu1 }
0x1114   : > { %3617 = vst [vmem:[%s7502_s18 + $0x60] sm:$0xff] %v3601_v7  ;;  %v3604_v53 = vsub.f32 %v7465_v46, %v5202_v35 }
0x1115   : > { %v3585_v43 = vpop.f32.mrf.mxu1 }
0x1116   : > { %3620 = vst [vmem:[%s7502_s18 + $0x78] sm:$0xff] %v3604_v53  ;;  %v3602_v37 = vsub.f32 %v7471_v0, %v3585_v43 }
0x1118   : > { %3618 = vst [vmem:[%s7502_s18 + $0x68] sm:$0xff] %v3602_v37 }
0x1119   : > { %5753 = shalt.err (!%p5750_p9)
}
0x111a   : > { %s5754_s22 = scalar_lea.hbm %s7537_s29, 2048  ;;  %s5758_s26 = scalar_lea.hbm %s7588_s3, 4096 }
0x111b   : > { %p5755_p13 = scmp.ne.s32.totalorder %s7537_s29, %s5754_s22  ;;  %p5759_p4 = scmp.lt.s32.totalorder %s7537_s29, %s7588_s3 }
0x111c   : > { %p5760_p8 = scmp.lt.s32.totalorder %s5758_s26, %s5754_s22 }
0x111d   : > { %p5756_p5 = pnand %p5755_p13, %p7604_p10 }
0x111e   : > { %p5761_p3 = por %p5760_p8, %p5759_p4 }
0x111f   : > { %p5757_p0 = pneg %p5756_p5 }
0x1121   : > { %p5762_p11 = pnand %p5761_p3, %p5757_p0 }
0x1123   : > { %5765 = shalt.err (!%p5762_p11)
}
0x1124   : > { %s5818_s6 = smov 128   ;;  %s5819_s18 = smov 8  }
0x1125   : > { %5213 = dma.vmem_to_hbm [thread:$0]  (%p7604_p10), %s7539_s25, 2048, %s7537_s29, %s3622_s16, %s5818_s6, %s5818_s6, %s5819_s18  }
0x1126 PF: > { %s3650_s20 = sand.u32 1, %s5796_s12   ;;  %p7605_p1 = scmp.ne.s32.totalorder %s7594_s19, 0 }
0x1127   : > { %p7606_p2 = scmp.ge.s32.totalorder %s5808_s15, 2  ;;  %s3651_s27 = scalar_lea.sflag [#allocation4], %s3650_s20 }
0x1129   : > { %p5227_p6 = pnand %p7606_p2, %p7605_p1 }
0x112b   : > { %p5228_p12 = pneg %p5227_p6 }
0x112d   : > { %5791 = dma.done.wait (%p5228_p12), %s3651_s27, 2048  }
0x112e   : > { %5793 = vsyncadd (%p5228_p12), %s3651_s27, 4294965248  ;;  %p17_p7 = scmp.ge.s32.totalorder %s5912_s7, 4   ;;  %s7607_s12 = smov %s5800_s13 }
0x112f   : > { %s7608_s13 = smov %s5804_s14  ;;  %s7609_s14 = smov %s5928_s11 }
0x1130   : > { %s7610_s15 = smov %s5912_s7  ;;  %19 = sbr.rel (!%p17_p7) target bundleno = 6 (0x6), region = 85 }
0x1135   :  { %3656 = vsyncpa [#allocation3], 1 }
0x1136   :  { %3658 = vsyncpa [#allocation3 + $0x1], 1 }
0x1137   :  { %3659 = vsyncpa [#allocation6], 1 }
0x1138   :  { %3660 = vsyncpa [#allocation4], 1 }
0x1139   :  { %3662 = vsyncpa [#allocation4 + $0x1], 1 }

</bundles_post_ra>
